<compile_context>
chip_gen: v7x
topology: tpu7x:2x2x1
jax: 0.10.0
libtpu: 0.0.40
codegen_flags: <defaults>
</compile_context>

<pallas_src>
import math
import functools

import numpy as np
import jax
import jax.numpy as jnp
from jax.experimental import pallas as pl
from jax.experimental.pallas import tpu as pltpu

# ----------------------- small, self-consistent config -----------------------
BATCH = 2
SEQ = 8
HIDDEN = 256
INTER = 512
NUM_HEADS = 4
NUM_KV_HEADS = 1
HEAD_DIM = 128
NUM_LAYERS = 2
RMS_EPS = 1e-6
SUBLN_EPS = 1e-5
ROPE_THETA = 10000.0
N_REP = NUM_HEADS // NUM_KV_HEADS
QKV_WIDTH = (NUM_HEADS + 2 * NUM_KV_HEADS) * HEAD_DIM
# lambda_init per layer: depth = layer_idx - 1  (torch reference)
LAMBDA_INITS = tuple(0.8 - 0.6 * math.exp(-0.3 * (li - 1)) for li in range(NUM_LAYERS))


def bf16_round(w):
    """Round weights to bf16-representable values (shared by kernel & reference)."""
    return w.astype(jnp.bfloat16).astype(jnp.float32)


# --------------------------------- kernel ------------------------------------
def gemma_fwd_kernel(omlf_ref, x_ref, cosq_ref, sinq_ref, cosk_ref, sink_ref,
                     fln_ref, ln_in_ref, subw_ref, wqkv_ref, wo_ref,
                     ln_post_ref, wgu_ref, wd_ref, out_ref, h_scr, attn_scr,
                     *, batch, seq, num_heads, num_kv_heads, head_dim, inter,
                     hidden, rms_eps, subln_eps):
    """One full GemmaDecoderLayer per grid step; residual stream carried in VMEM."""
    layer = pl.program_id(0)
    n_layers = pl.num_programs(0)
    half = head_dim // 2
    n_rep = num_heads // num_kv_heads
    q_w = num_heads * head_dim
    kv_w = num_kv_heads * head_dim

    # ---- layer 0: seed the residual stream (embedding scale folded in) ----
    @pl.when(layer == 0)
    def _():
        h_scr[...] = x_ref[...].astype(jnp.float32) * (hidden ** 0.5)

    x = h_scr[...]                                                     # (BS, H)

    # ---- input GemmaRMSNorm:  x * rsqrt(mean(x^2)+eps) * (1+w) ----
    h = x * jax.lax.rsqrt(jnp.mean(x * x, axis=-1, keepdims=True) + rms_eps)
    h = h * (1.0 + ln_in_ref[...].astype(jnp.float32))

    # ---- fused q|k|v projection (bf16 weights DMA'd, f32 math/accumulate) ----
    qkv = jnp.dot(h, wqkv_ref[...].astype(jnp.float32),
                  preferred_element_type=jnp.float32)                  # (BS, QKV_W)

    cos_q = cosq_ref[...]      # (BS, D)  cos * 1/sqrt(D)
    sin_q = sinq_ref[...]      # (BS, D)  sin * sign * 1/sqrt(D)
    cos_k = cosk_ref[...]      # (BS, D)  cos
    sin_k = sink_ref[...]      # (BS, D)  sin * sign

    def rope(t, c, s):         # rotate_half(t)*sin == roll(t, D/2)*signed_sin
        return t * c + pltpu.roll(t, shift=half, axis=1) * s

    one_minus_lf = omlf_ref[layer]                        # 1 - lambda_full
    subw = subw_ref[...].astype(jnp.float32)              # (1, D) incl. (1-lambda_init)

    # ---- causal additive mask, built in-register, tiled over stacked heads ----
    qpos = jax.lax.broadcasted_iota(jnp.int32, (seq, seq), 0)
    kpos = jax.lax.broadcasted_iota(jnp.int32, (seq, seq), 1)
    mask1 = jnp.where(kpos <= qpos, 0.0, -1e9).astype(jnp.float32)     # (S, S)
    mask = jnp.concatenate([mask1] * n_rep, axis=0)                    # (n_rep*S, S)

    # ---- differential attention, heads batched along sublanes ----
    for b in range(batch):
        r0 = b * seq
        qkv_b = qkv[r0:r0 + seq, :]
        cq, sq = cos_q[r0:r0 + seq, :], sin_q[r0:r0 + seq, :]
        ck, sk = cos_k[r0:r0 + seq, :], sin_k[r0:r0 + seq, :]
        cq_t = jnp.concatenate([cq] * n_rep, axis=0)                   # (n_rep*S, D)
        sq_t = jnp.concatenate([sq] * n_rep, axis=0)
        for g in range(num_kv_heads):
            k_g = rope(qkv_b[:, q_w + g * head_dim: q_w + (g + 1) * head_dim], ck, sk)
            v_g = qkv_b[:, q_w + kv_w + g * head_dim: q_w + kv_w + (g + 1) * head_dim]
            heads = list(range(g * n_rep, (g + 1) * n_rep))
            # stack this group's query heads along sublanes -> (n_rep*S, D)
            q_stack = jnp.concatenate(
                [qkv_b[:, hh * head_dim:(hh + 1) * head_dim] for hh in heads], axis=0)
            q_stack = rope(q_stack, cq_t, sq_t)     # 1/sqrt(D) already folded in
            # one QK^T for all heads of the group (contract last dims, no transpose)
            s = jax.lax.dot_general(q_stack, k_g, (((1,), (1,)), ((), ())),
                                    preferred_element_type=jnp.float32)  # (n_rep*S, S)
            s = s + mask            # (torch.nan_to_num is a no-op for finite scores)
            m = jnp.max(s, axis=-1, keepdims=True)
            e = jnp.exp(s - m)
            # fold (1 - lambda_full) into the (rows,1) reciprocal column
            inv = pl.reciprocal(jnp.sum(e, axis=-1, keepdims=True),
                                approx=True) * one_minus_lf
            p = e * inv
            o = jnp.dot(p, v_g, preferred_element_type=jnp.float32)    # (n_rep*S, D)
            # sub-RMSNorm (eps=1e-5, plain weight) with (1 - lambda_init) folded in
            o = o * jax.lax.rsqrt(jnp.mean(o * o, axis=-1, keepdims=True) + subln_eps)
            o = o * subw
            # scatter per-head outputs straight into the (BS, nh*D) scratch
            for j, hh in enumerate(heads):
                attn_scr[r0:r0 + seq, hh * head_dim:(hh + 1) * head_dim] = \
                    o[j * seq:(j + 1) * seq, :]

    # ---- o_proj + residual ----
    h1 = jnp.dot(attn_scr[...], wo_ref[...].astype(jnp.float32),
                 preferred_element_type=jnp.float32) + x               # (BS, H)

    # ---- post-attention GemmaRMSNorm ----
    h2 = h1 * jax.lax.rsqrt(jnp.mean(h1 * h1, axis=-1, keepdims=True) + rms_eps)
    h2 = h2 * (1.0 + ln_post_ref[...].astype(jnp.float32))

    # ---- fused gate|up matmul + gelu(tanh) gating + down_proj + residual ----
    gu = jnp.dot(h2, wgu_ref[...].astype(jnp.float32),
                 preferred_element_type=jnp.float32)                   # (BS, 2I)
    act = jax.nn.gelu(gu[:, :inter], approximate=True) * gu[:, inter:]
    mlp = jnp.dot(act, wd_ref[...].astype(jnp.float32),
                  preferred_element_type=jnp.float32)                  # (BS, H)
    h_new = h1 + mlp
    h_scr[...] = h_new                                                 # carry to layer+1

    # ---- last layer: final GemmaRMSNorm straight to the output block ----
    @pl.when(layer == n_layers - 1)
    def _():
        nx = h_new * jax.lax.rsqrt(jnp.mean(h_new * h_new, axis=-1, keepdims=True)
                                   + rms_eps)
        out_ref[...] = (nx * (1.0 + fln_ref[...].astype(jnp.float32))
                        ).astype(out_ref.dtype)


# ------------------------------ pallas wrapper --------------------------------
def rope_tables_2d(position_ids):
    """RoPE tables flattened to (B*S, D).  q-tables pre-scaled by 1/sqrt(D);
    sin tables sign-folded so rotate_half(x)*sin == roll(x, D/2)*signed_sin."""
    B, S = position_ids.shape
    inv_freq = 1.0 / (ROPE_THETA ** (jnp.arange(0, HEAD_DIM, 2, dtype=jnp.float32)
                                     / HEAD_DIM))
    freqs = position_ids.astype(jnp.float32)[:, :, None] * inv_freq[None, None, :]
    emb = jnp.concatenate([freqs, freqs], axis=-1)                     # (B, S, D)
    cos = jnp.cos(emb).reshape(B * S, HEAD_DIM)
    sin = jnp.sin(emb).reshape(B * S, HEAD_DIM)
    sign = jnp.where(jnp.arange(HEAD_DIM) < HEAD_DIM // 2, -1.0, 1.0
                     ).astype(jnp.float32)
    inv_scale = 1.0 / math.sqrt(HEAD_DIM)
    return cos * inv_scale, sin * sign * inv_scale, cos, sin * sign


@jax.jit
def gemma_model_fwd(inputs_embeds, stacked, final_ln_w, position_ids):
    B, S, H = inputs_embeds.shape
    BS = B * S
    n_layers = stacked["wqkv"].shape[0]
    cosq, sinq, cosk, sink = rope_tables_2d(position_ids)
    x2d = inputs_embeds.reshape(BS, H)

    kernel = functools.partial(
        gemma_fwd_kernel, batch=B, seq=S, num_heads=NUM_HEADS,
        num_kv_heads=NUM_KV_HEADS, head_dim=HEAD_DIM, inter=INTER,
        hidden=H, rms_eps=RMS_EPS, subln_eps=SUBLN_EPS)

    out2d = pl.pallas_call(
        kernel,
        out_shape=jax.ShapeDtypeStruct((BS, H), inputs_embeds.dtype),
        grid=(n_layers,),
        in_specs=[
            pl.BlockSpec(memory_space=pltpu.MemorySpace.SMEM),            # (L,) 1-lambda_full
            pl.BlockSpec((BS, H), lambda l: (0, 0)),                      # x (layer-invariant)
            pl.BlockSpec((BS, HEAD_DIM), lambda l: (0, 0)),               # cos_q (scaled)
            pl.BlockSpec((BS, HEAD_DIM), lambda l: (0, 0)),               # sin_q (signed,scaled)
            pl.BlockSpec((BS, HEAD_DIM), lambda l: (0, 0)),               # cos_k
            pl.BlockSpec((BS, HEAD_DIM), lambda l: (0, 0)),               # sin_k (signed)
            pl.BlockSpec((1, H), lambda l: (0, 0)),                       # final norm w
            pl.BlockSpec((None, 1, H), lambda l: (l, 0, 0)),              # input ln w
            pl.BlockSpec((None, 1, HEAD_DIM), lambda l: (l, 0, 0)),       # subln w (scaled)
            pl.BlockSpec((None, H, QKV_WIDTH), lambda l: (l, 0, 0)),      # Wqkv   (bf16)
            pl.BlockSpec((None, NUM_HEADS * HEAD_DIM, H),
                         lambda l: (l, 0, 0)),                            # Wo     (bf16)
            pl.BlockSpec((None, 1, H), lambda l: (l, 0, 0)),              # post ln w
            pl.BlockSpec((None, H, 2 * INTER), lambda l: (l, 0, 0)),      # Wgate|Wup (bf16)
            pl.BlockSpec((None, INTER, H), lambda l: (l, 0, 0)),          # Wdown  (bf16)
        ],
        out_specs=pl.BlockSpec((BS, H), lambda l: (0, 0)),
        scratch_shapes=[pltpu.VMEM((BS, H), jnp.float32),                 # residual stream
                        pltpu.VMEM((BS, NUM_HEADS * HEAD_DIM), jnp.float32)],  # attn out
        compiler_params=pltpu.CompilerParams(
            # layer axis carries state (residual stream) -> sequential
            dimension_semantics=("arbitrary",)),
    )(stacked["omlf"], x2d, cosq, sinq, cosk, sink, final_ln_w.reshape(1, H),
      stacked["ln_in"], stacked["subw"], stacked["wqkv"], stacked["wo"],
      stacked["ln_post"], stacked["wgu"], stacked["wd"])
    return out2d.reshape(B, S, H)


def stack_layer_params(raw_layers, lambda_inits):
    """Pre-transpose / pre-concatenate / pre-fold weights once; stack with a
    leading layer axis; matmul weights stored as bf16 (values already
    bf16-representable, so the cast is exact)."""
    wqkv, wo, wgu, wd = [], [], [], []
    ln_in, ln_post, subw, omlf = [], [], [], []
    for p, lam_init in zip(raw_layers, lambda_inits):
        wqkv.append(jnp.concatenate([p["q_w"].T, p["k_w"].T, p["v_w"].T], axis=1))
        wo.append(p["o_w"].T)
        wgu.append(jnp.concatenate([p["gate_w"].T, p["up_w"].T], axis=1))
        wd.append(p["down_w"].T)
        ln_in.append(p["input_ln_w"].reshape(1, HIDDEN))
        ln_post.append(p["post_ln_w"].reshape(1, HIDDEN))
        subw.append((p["subln_w"] * (1.0 - lam_init)).reshape(1, HEAD_DIM))
        l1 = jnp.exp(jnp.sum(p["lambda_q1"] * p["lambda_k1"]))
        l2 = jnp.exp(jnp.sum(p["lambda_q2"] * p["lambda_k2"]))
        omlf.append(1.0 - (l1 - l2 + lam_init))
    return {
        "wqkv": jnp.stack(wqkv).astype(jnp.bfloat16),
        "wo": jnp.stack(wo).astype(jnp.bfloat16),
        "wgu": jnp.stack(wgu).astype(jnp.bfloat16),
        "wd": jnp.stack(wd).astype(jnp.bfloat16),
        "ln_in": jnp.stack(ln_in).astype(jnp.float32),
        "ln_post": jnp.stack(ln_post).astype(jnp.float32),
        "subw": jnp.stack(subw).astype(jnp.float32),
        "omlf": jnp.stack(omlf).astype(jnp.float32),
    }


# ------------------------- pure-JAX reference (torch semantics) ---------------
def reference_model(inputs_embeds, raw_layers, final_ln_w, position_ids, lambda_inits):
    B, S, _ = inputs_embeds.shape

    def gemma_rms(v, w, eps=RMS_EPS):
        vf = v.astype(jnp.float32)
        n = vf * jax.lax.rsqrt(jnp.mean(vf * vf, axis=-1, keepdims=True) + eps)
        return n * (1.0 + w)

    inv_freq = 1.0 / (ROPE_THETA ** (jnp.arange(0, HEAD_DIM, 2, dtype=jnp.float32)
                                     / HEAD_DIM))
    freqs = position_ids.astype(jnp.float32)[:, :, None] * inv_freq[None, None, :]
    emb = jnp.concatenate([freqs, freqs], axis=-1)
    cos, sin = jnp.cos(emb)[:, None], jnp.sin(emb)[:, None]            # (B,1,S,D)

    causal = jnp.tril(jnp.ones((S, S), dtype=bool))
    mask = jnp.where(causal, 0.0, -1e9).astype(jnp.float32)[None, None]

    def rot_half(t):
        return jnp.concatenate([-t[..., HEAD_DIM // 2:], t[..., :HEAD_DIM // 2]], axis=-1)

    h = inputs_embeds * (HIDDEN ** 0.5)
    for p, lam_init in zip(raw_layers, lambda_inits):
        residual = h
        hs = gemma_rms(h, p["input_ln_w"])
        q = (hs @ p["q_w"].T).reshape(B, S, NUM_HEADS, HEAD_DIM).transpose(0, 2, 1, 3)
        k = (hs @ p["k_w"].T).reshape(B, S, NUM_KV_HEADS, HEAD_DIM).transpose(0, 2, 1, 3)
        v = (hs @ p["v_w"].T).reshape(B, S, NUM_KV_HEADS, HEAD_DIM).transpose(0, 2, 1, 3)
        q = q * cos + rot_half(q) * sin
        k = k * cos + rot_half(k) * sin
        k = jnp.repeat(k, N_REP, axis=1)
        v = jnp.repeat(v, N_REP, axis=1)
        s = jnp.einsum("bhqd,bhkd->bhqk", q, k) / math.sqrt(HEAD_DIM)
        s = jnp.where(jnp.isnan(s), 0.0, s) + mask
        pattn = jax.nn.softmax(s.astype(jnp.float32), axis=-1)
        l1 = jnp.exp(jnp.sum(p["lambda_q1"] * p["lambda_k1"]))
        l2 = jnp.exp(jnp.sum(p["lambda_q2"] * p["lambda_k2"]))
        lam_full = l1 - l2 + lam_init
        pattn = pattn - lam_full * pattn
        o = jnp.einsum("bhqk,bhkd->bhqd", pattn, v)
        o = o * jax.lax.rsqrt(jnp.mean(o * o, axis=-1, keepdims=True) + SUBLN_EPS)
        o = o * p["subln_w"] * (1.0 - lam_init)
        o = o.transpose(0, 2, 1, 3).reshape(B, S, NUM_HEADS * HEAD_DIM)
        h = residual + o @ p["o_w"].T
        residual = h
        hs = gemma_rms(h, p["post_ln_w"])
        g = jax.nn.gelu(hs @ p["gate_w"].T, approximate=True)
        u = hs @ p["up_w"].T
        h = residual + (g * u) @ p["down_w"].T
    return gemma_rms(h, final_ln_w)


# ----------------------------------- main --------------------------------------
if __name__ == "__main__":
    key = jax.random.PRNGKey(0)

    def nrm(k, shape, scale):
        return jax.random.normal(k, shape, dtype=jnp.float32) * scale

    keys = jax.random.split(key, NUM_LAYERS + 2)
    raw_layers = []
    for li in range(NUM_LAYERS):
        ks = jax.random.split(keys[li], 13)
        layer = {
            "q_w":      nrm(ks[0], (NUM_HEADS * HEAD_DIM, HIDDEN), 0.02),
            "k_w":      nrm(ks[1], (NUM_KV_HEADS * HEAD_DIM, HIDDEN), 0.02),
            "v_w":      nrm(ks[2], (NUM_KV_HEADS * HEAD_DIM, HIDDEN), 0.02),
            "o_w":      nrm(ks[3], (HIDDEN, NUM_HEADS * HEAD_DIM), 0.02),
            "gate_w":   nrm(ks[4], (INTER, HIDDEN), 0.02),
            "up_w":     nrm(ks[5], (INTER, HIDDEN), 0.02),
            "down_w":   nrm(ks[6], (HIDDEN, INTER), 0.02),
            "input_ln_w": nrm(ks[7], (HIDDEN,), 0.1),
            "post_ln_w":  nrm(ks[8], (HIDDEN,), 0.1),
            "lambda_q1": nrm(ks[9],  (HEAD_DIM,), 0.1),
            "lambda_k1": nrm(ks[10], (HEAD_DIM,), 0.1),
            "lambda_q2": nrm(ks[11], (HEAD_DIM,), 0.1),
            "lambda_k2": nrm(ks[12], (HEAD_DIM,), 0.1),
            "subln_w":   jnp.ones((HEAD_DIM,), dtype=jnp.float32),
        }
        # matmul weights at bf16-representable values => kernel (bf16 storage) and
        # f32 reference use numerically identical weights, tolerance stays tight.
        for name in ("q_w", "k_w", "v_w", "o_w", "gate_w", "up_w", "down_w"):
            layer[name] = bf16_round(layer[name])
        raw_layers.append(layer)

    stacked = stack_layer_params(raw_layers, LAMBDA_INITS)
    final_ln_w = nrm(keys[NUM_LAYERS], (HIDDEN,), 0.1)

    inputs_embeds = jax.random.normal(keys[NUM_LAYERS + 1], (BATCH, SEQ, HIDDEN),
                                      dtype=jnp.float32)
    position_ids = jnp.broadcast_to(jnp.arange(SEQ, dtype=jnp.int32), (BATCH, SEQ))

    out = gemma_model_fwd(inputs_embeds, stacked, final_ln_w, position_ids)
    out = jax.block_until_ready(out)

    ref = jax.block_until_ready(
        reference_model(inputs_embeds, raw_layers, final_ln_w, position_ids,
                        LAMBDA_INITS))

    assert out.shape == (BATCH, SEQ, HIDDEN)
    np.testing.assert_allclose(np.asarray(out), np.asarray(ref), rtol=2e-3, atol=2e-3)

    print("KERNEL_OK")
</pallas_src>

<mosaic_0001>
module attributes {stable_mosaic.version = 11 : i64} {
  func.func @gemma_fwd_kernel(%arg0: i32, %arg1: memref<2xf32, #tpu.memory_space<smem>>, %arg2: memref<16x256xf32, #tpu.memory_space<vmem>>, %arg3: memref<16x128xf32, #tpu.memory_space<vmem>>, %arg4: memref<16x128xf32, #tpu.memory_space<vmem>>, %arg5: memref<16x128xf32, #tpu.memory_space<vmem>>, %arg6: memref<16x128xf32, #tpu.memory_space<vmem>>, %arg7: memref<1x256xf32, #tpu.memory_space<vmem>>, %arg8: memref<1x1x256xf32, #tpu.memory_space<vmem>>, %arg9: memref<1x1x128xf32, #tpu.memory_space<vmem>>, %arg10: memref<1x256x768xbf16, #tpu.memory_space<vmem>>, %arg11: memref<1x512x256xbf16, #tpu.memory_space<vmem>>, %arg12: memref<1x1x256xf32, #tpu.memory_space<vmem>>, %arg13: memref<1x256x1024xbf16, #tpu.memory_space<vmem>>, %arg14: memref<1x512x256xbf16, #tpu.memory_space<vmem>>, %arg15: memref<16x256xf32, #tpu.memory_space<vmem>>, %arg16: memref<16x256xf32, #tpu.memory_space<vmem>>, %arg17: memref<16x512xf32, #tpu.memory_space<vmem>>) attributes {dimension_semantics = [#tpu.dimension_semantics<arbitrary>], iteration_bounds = array<i64: 2>, scalar_prefetch = 0 : i64, scratch_operands = 2 : i64, tpu.core_type = #tpu.core_type<tc>, window_params = [{transform_indices = @transform_0, window_bounds = array<i64: 2>}, {pipeline_mode = #tpu.pipeline_mode<synchronous>, transform_indices = @transform_1, window_bounds = array<i64: 16, 256>}, {pipeline_mode = #tpu.pipeline_mode<synchronous>, transform_indices = @transform_2, window_bounds = array<i64: 16, 128>}, {pipeline_mode = #tpu.pipeline_mode<synchronous>, transform_indices = @transform_3, window_bounds = array<i64: 16, 128>}, {pipeline_mode = #tpu.pipeline_mode<synchronous>, transform_indices = @transform_4, window_bounds = array<i64: 16, 128>}, {pipeline_mode = #tpu.pipeline_mode<synchronous>, transform_indices = @transform_5, window_bounds = array<i64: 16, 128>}, {pipeline_mode = #tpu.pipeline_mode<synchronous>, transform_indices = @transform_6, window_bounds = array<i64: 1, 256>}, {transform_indices = @transform_7, window_bounds = array<i64: 1, 1, 256>}, {transform_indices = @transform_8, window_bounds = array<i64: 1, 1, 128>}, {transform_indices = @transform_9, window_bounds = array<i64: 1, 256, 768>}, {transform_indices = @transform_10, window_bounds = array<i64: 1, 512, 256>}, {transform_indices = @transform_11, window_bounds = array<i64: 1, 1, 256>}, {transform_indices = @transform_12, window_bounds = array<i64: 1, 256, 1024>}, {transform_indices = @transform_13, window_bounds = array<i64: 1, 512, 256>}, {pipeline_mode = #tpu.pipeline_mode<synchronous>, transform_indices = @transform_14, window_bounds = array<i64: 16, 256>}]} {
    %c0_i32 = arith.constant 0 : i32
    %0 = arith.cmpi eq, %arg0, %c0_i32 : i32
    %1 = arith.extui %0 : i1 to i32
    %c0_i32_0 = arith.constant 0 : i32
    %2 = arith.cmpi ne, %1, %c0_i32_0 : i32
    scf.if %2 {
      %c0_82 = arith.constant 0 : index
      %c0_83 = arith.constant 0 : index
      %204 = vector.load %arg2[%c0_82, %c0_83] : memref<16x256xf32, #tpu.memory_space<vmem>>, vector<16x256xf32>
      %cst_84 = arith.constant 1.600000e+01 : f32
      %205 = vector.broadcast %cst_84 : f32 to vector<16x256xf32>
      %206 = arith.mulf %204, %205 : vector<16x256xf32>
      %c0_85 = arith.constant 0 : index
      %c0_86 = arith.constant 0 : index
      %207 = vector.load %arg16[%c0_85, %c0_86] : memref<16x256xf32, #tpu.memory_space<vmem>>, vector<16x256xf32>
      tpu.vector_store %arg16[%c0_85, %c0_86], %206 {strides = array<i32>} : memref<16x256xf32, #tpu.memory_space<vmem>>, vector<16x256xf32>,
    } else {
    }
    %c0 = arith.constant 0 : index
    %c0_1 = arith.constant 0 : index
    %3 = vector.load %arg16[%c0, %c0_1] : memref<16x256xf32, #tpu.memory_space<vmem>>, vector<16x256xf32>
    %4 = arith.mulf %3, %3 : vector<16x256xf32>
    %cst = arith.constant dense<0.000000e+00> : vector<16xf32>
    %5 = vector.multi_reduction <add>, %4, %cst [1] : vector<16x256xf32> to vector<16xf32>
    %6 = vector.shape_cast %5 : vector<16xf32> to vector<16x1xf32>
    %cst_2 = arith.constant 2.560000e+02 : f32
    %7 = vector.broadcast %cst_2 : f32 to vector<16x1xf32>
    %8 = arith.divf %6, %7 : vector<16x1xf32>
    %cst_3 = arith.constant 9.99999997E-7 : f32
    %9 = vector.broadcast %cst_3 : f32 to vector<16x1xf32>
    %10 = arith.addf %8, %9 : vector<16x1xf32>
    %11 = math.rsqrt %10 : vector<16x1xf32>
    %12 = vector.broadcast %11 : vector<16x1xf32> to vector<16x256xf32>
    %13 = arith.mulf %3, %12 : vector<16x256xf32>
    %c0_4 = arith.constant 0 : index
    %c0_5 = arith.constant 0 : index
    %c0_6 = arith.constant 0 : index
    %14 = vector.load %arg8[%c0_4, %c0_5, %c0_6] : memref<1x1x256xf32, #tpu.memory_space<vmem>>, vector<1x1x256xf32>
    %15 = vector.shape_cast %14 : vector<1x1x256xf32> to vector<1x256xf32>
    %cst_7 = arith.constant 1.000000e+00 : f32
    %16 = vector.broadcast %cst_7 : f32 to vector<1x256xf32>
    %17 = arith.addf %16, %15 : vector<1x256xf32>
    %18 = vector.broadcast %17 : vector<1x256xf32> to vector<16x256xf32>
    %19 = arith.mulf %13, %18 : vector<16x256xf32>
    %c0_8 = arith.constant 0 : index
    %c0_9 = arith.constant 0 : index
    %c0_10 = arith.constant 0 : index
    %20 = vector.load %arg10[%c0_8, %c0_9, %c0_10] : memref<1x256x768xbf16, #tpu.memory_space<vmem>>, vector<1x256x768xbf16>
    %21 = vector.shape_cast %20 : vector<1x256x768xbf16> to vector<256x768xbf16>
    %22 = arith.extf %21 : vector<256x768xbf16> to vector<256x768xf32>
    %cst_11 = arith.constant dense<0.000000e+00> : vector<16x768xf32>
    %23 = tpu.matmul %19, %22, %cst_11 {dimension_numbers = #tpu.dot_dimension_numbers<[1], [0], [0], [1], [0, 0, 1, 1], [], []>} : vector<16x256xf32>, vector<256x768xf32>, vector<16x768xf32> -> vector<16x768xf32>
    %c0_12 = arith.constant 0 : index
    %c0_13 = arith.constant 0 : index
    %24 = vector.load %arg3[%c0_12, %c0_13] : memref<16x128xf32, #tpu.memory_space<vmem>>, vector<16x128xf32>
    %c0_14 = arith.constant 0 : index
    %c0_15 = arith.constant 0 : index
    %25 = vector.load %arg4[%c0_14, %c0_15] : memref<16x128xf32, #tpu.memory_space<vmem>>, vector<16x128xf32>
    %c0_16 = arith.constant 0 : index
    %c0_17 = arith.constant 0 : index
    %26 = vector.load %arg5[%c0_16, %c0_17] : memref<16x128xf32, #tpu.memory_space<vmem>>, vector<16x128xf32>
    %c0_18 = arith.constant 0 : index
    %c0_19 = arith.constant 0 : index
    %27 = vector.load %arg6[%c0_18, %c0_19] : memref<16x128xf32, #tpu.memory_space<vmem>>, vector<16x128xf32>
    %28 = arith.index_cast %arg0 : i32 to index
    %29 = memref.load %arg1[%28] : memref<2xf32, #tpu.memory_space<smem>>
    %c0_20 = arith.constant 0 : index
    %c0_21 = arith.constant 0 : index
    %c0_22 = arith.constant 0 : index
    %30 = vector.load %arg9[%c0_20, %c0_21, %c0_22] : memref<1x1x128xf32, #tpu.memory_space<vmem>>, vector<1x1x128xf32>
    %31 = vector.shape_cast %30 : vector<1x1x128xf32> to vector<1x128xf32>
    %32 = tpu.iota {dimensions = array<i32: 0>} : vector<8x8xi32>
    %33 = tpu.iota {dimensions = array<i32: 1>} : vector<8x8xi32>
    %34 = arith.cmpi sle, %33, %32 : vector<8x8xi32>
    %cst_23 = arith.constant 0.000000e+00 : f32
    %cst_24 = arith.constant -1.000000e+09 : f32
    %35 = vector.broadcast %cst_23 : f32 to vector<8x8xf32>
    %36 = vector.broadcast %cst_24 : f32 to vector<8x8xf32>
    %37 = arith.select %34, %35, %36 : vector<8x8xi1>, vector<8x8xf32>
    %38 = tpu.concatenate %37, %37, %37, %37 in 0 : vector<8x8xf32>, vector<8x8xf32>, vector<8x8xf32>, vector<8x8xf32> -> vector<32x8xf32>
    %39 = vector.extract_strided_slice %23 {offsets = [0, 0], sizes = [8, 768], strides = [1, 1]} : vector<16x768xf32> to vector<8x768xf32>
    %40 = vector.extract_strided_slice %24 {offsets = [0, 0], sizes = [8, 128], strides = [1, 1]} : vector<16x128xf32> to vector<8x128xf32>
    %41 = vector.extract_strided_slice %25 {offsets = [0, 0], sizes = [8, 128], strides = [1, 1]} : vector<16x128xf32> to vector<8x128xf32>
    %42 = vector.extract_strided_slice %26 {offsets = [0, 0], sizes = [8, 128], strides = [1, 1]} : vector<16x128xf32> to vector<8x128xf32>
    %43 = vector.extract_strided_slice %27 {offsets = [0, 0], sizes = [8, 128], strides = [1, 1]} : vector<16x128xf32> to vector<8x128xf32>
    %44 = tpu.concatenate %40, %40, %40, %40 in 0 : vector<8x128xf32>, vector<8x128xf32>, vector<8x128xf32>, vector<8x128xf32> -> vector<32x128xf32>
    %45 = tpu.concatenate %41, %41, %41, %41 in 0 : vector<8x128xf32>, vector<8x128xf32>, vector<8x128xf32>, vector<8x128xf32> -> vector<32x128xf32>
    %46 = vector.extract_strided_slice %39 {offsets = [0, 512], sizes = [8, 128], strides = [1, 1]} : vector<8x768xf32> to vector<8x128xf32>
    %47 = arith.mulf %46, %42 : vector<8x128xf32>
    %c64_i32 = arith.constant 64 : i32
    %48 = tpu.dynamic_rotate %46 by %c64_i32 dim 1 : vector<8x128xf32>, i32 -> vector<8x128xf32>
    %49 = arith.mulf %48, %43 : vector<8x128xf32>
    %50 = arith.addf %47, %49 : vector<8x128xf32>
    %51 = vector.extract_strided_slice %39 {offsets = [0, 640], sizes = [8, 128], strides = [1, 1]} : vector<8x768xf32> to vector<8x128xf32>
    %52 = vector.extract_strided_slice %39 {offsets = [0, 0], sizes = [8, 128], strides = [1, 1]} : vector<8x768xf32> to vector<8x128xf32>
    %53 = vector.extract_strided_slice %39 {offsets = [0, 128], sizes = [8, 128], strides = [1, 1]} : vector<8x768xf32> to vector<8x128xf32>
    %54 = vector.extract_strided_slice %39 {offsets = [0, 256], sizes = [8, 128], strides = [1, 1]} : vector<8x768xf32> to vector<8x128xf32>
    %55 = vector.extract_strided_slice %39 {offsets = [0, 384], sizes = [8, 128], strides = [1, 1]} : vector<8x768xf32> to vector<8x128xf32>
    %56 = tpu.concatenate %52, %53, %54, %55 in 0 : vector<8x128xf32>, vector<8x128xf32>, vector<8x128xf32>, vector<8x128xf32> -> vector<32x128xf32>
    %57 = arith.mulf %56, %44 : vector<32x128xf32>
    %c64_i32_25 = arith.constant 64 : i32
    %58 = tpu.dynamic_rotate %56 by %c64_i32_25 dim 1 : vector<32x128xf32>, i32 -> vector<32x128xf32>
    %59 = arith.mulf %58, %45 : vector<32x128xf32>
    %60 = arith.addf %57, %59 : vector<32x128xf32>
    %cst_26 = arith.constant dense<0.000000e+00> : vector<32x8xf32>
    %61 = tpu.matmul %60, %50, %cst_26 {dimension_numbers = #tpu.dot_dimension_numbers<[1], [1], [0], [0], [0, 0, 1, 0], [], []>} : vector<32x128xf32>, vector<8x128xf32>, vector<32x8xf32> -> vector<32x8xf32>
    %62 = arith.addf %61, %38 : vector<32x8xf32>
    %cst_27 = arith.constant dense<0xFF800000> : vector<32xf32>
    %63 = vector.multi_reduction <maximumf>, %62, %cst_27 [1] : vector<32x8xf32> to vector<32xf32>
    %64 = vector.shape_cast %63 : vector<32xf32> to vector<32x1xf32>
    %65 = vector.broadcast %64 : vector<32x1xf32> to vector<32x8xf32>
    %66 = arith.subf %62, %65 : vector<32x8xf32>
    %67 = math.exp %66 : vector<32x8xf32>
    %cst_28 = arith.constant dense<0.000000e+00> : vector<32xf32>
    %68 = vector.multi_reduction <add>, %67, %cst_28 [1] : vector<32x8xf32> to vector<32xf32>
    %69 = vector.shape_cast %68 : vector<32xf32> to vector<32x1xf32>
    %70 = tpu.reciprocal %69 {approx = true} : vector<32x1xf32> -> vector<32x1xf32>
    %71 = vector.broadcast %29 : f32 to vector<32x1xf32>
    %72 = arith.mulf %70, %71 : vector<32x1xf32>
    %73 = vector.broadcast %72 : vector<32x1xf32> to vector<32x8xf32>
    %74 = arith.mulf %67, %73 : vector<32x8xf32>
    %cst_29 = arith.constant dense<0.000000e+00> : vector<32x128xf32>
    %75 = tpu.matmul %74, %51, %cst_29 {dimension_numbers = #tpu.dot_dimension_numbers<[1], [0], [0], [1], [0, 0, 1, 1], [], []>} : vector<32x8xf32>, vector<8x128xf32>, vector<32x128xf32> -> vector<32x128xf32>
    %76 = arith.mulf %75, %75 : vector<32x128xf32>
    %cst_30 = arith.constant dense<0.000000e+00> : vector<32xf32>
    %77 = vector.multi_reduction <add>, %76, %cst_30 [1] : vector<32x128xf32> to vector<32xf32>
    %78 = vector.shape_cast %77 : vector<32xf32> to vector<32x1xf32>
    %cst_31 = arith.constant 1.280000e+02 : f32
    %79 = vector.broadcast %cst_31 : f32 to vector<32x1xf32>
    %80 = arith.divf %78, %79 : vector<32x1xf32>
    %cst_32 = arith.constant 9.99999974E-6 : f32
    %81 = vector.broadcast %cst_32 : f32 to vector<32x1xf32>
    %82 = arith.addf %80, %81 : vector<32x1xf32>
    %83 = math.rsqrt %82 : vector<32x1xf32>
    %84 = vector.broadcast %83 : vector<32x1xf32> to vector<32x128xf32>
    %85 = arith.mulf %75, %84 : vector<32x128xf32>
    %86 = vector.broadcast %31 : vector<1x128xf32> to vector<32x128xf32>
    %87 = arith.mulf %85, %86 : vector<32x128xf32>
    %88 = vector.extract_strided_slice %87 {offsets = [0, 0], sizes = [8, 128], strides = [1, 1]} : vector<32x128xf32> to vector<8x128xf32>
    %c0_33 = arith.constant 0 : index
    %c0_34 = arith.constant 0 : index
    %89 = vector.load %arg17[%c0_33, %c0_34] : memref<16x512xf32, #tpu.memory_space<vmem>>, vector<8x128xf32>
    tpu.vector_store %arg17[%c0_33, %c0_34], %88 {strides = array<i32>} : memref<16x512xf32, #tpu.memory_space<vmem>>, vector<8x128xf32>,
    %90 = vector.extract_strided_slice %87 {offsets = [8, 0], sizes = [8, 128], strides = [1, 1]} : vector<32x128xf32> to vector<8x128xf32>
    %c0_35 = arith.constant 0 : index
    %c128 = arith.constant 128 : index
    %91 = vector.load %arg17[%c0_35, %c128] : memref<16x512xf32, #tpu.memory_space<vmem>>, vector<8x128xf32>
    tpu.vector_store %arg17[%c0_35, %c128], %90 {strides = array<i32>} : memref<16x512xf32, #tpu.memory_space<vmem>>, vector<8x128xf32>,
    %92 = vector.extract_strided_slice %87 {offsets = [16, 0], sizes = [8, 128], strides = [1, 1]} : vector<32x128xf32> to vector<8x128xf32>
    %c0_36 = arith.constant 0 : index
    %c256 = arith.constant 256 : index
    %93 = vector.load %arg17[%c0_36, %c256] : memref<16x512xf32, #tpu.memory_space<vmem>>, vector<8x128xf32>
    tpu.vector_store %arg17[%c0_36, %c256], %92 {strides = array<i32>} : memref<16x512xf32, #tpu.memory_space<vmem>>, vector<8x128xf32>,
    %94 = vector.extract_strided_slice %87 {offsets = [24, 0], sizes = [8, 128], strides = [1, 1]} : vector<32x128xf32> to vector<8x128xf32>
    %c0_37 = arith.constant 0 : index
    %c384 = arith.constant 384 : index
    %95 = vector.load %arg17[%c0_37, %c384] : memref<16x512xf32, #tpu.memory_space<vmem>>, vector<8x128xf32>
    tpu.vector_store %arg17[%c0_37, %c384], %94 {strides = array<i32>} : memref<16x512xf32, #tpu.memory_space<vmem>>, vector<8x128xf32>,
    %96 = vector.extract_strided_slice %23 {offsets = [8, 0], sizes = [8, 768], strides = [1, 1]} : vector<16x768xf32> to vector<8x768xf32>
    %97 = vector.extract_strided_slice %24 {offsets = [8, 0], sizes = [8, 128], strides = [1, 1]} : vector<16x128xf32> to vector<8x128xf32>
    %98 = vector.extract_strided_slice %25 {offsets = [8, 0], sizes = [8, 128], strides = [1, 1]} : vector<16x128xf32> to vector<8x128xf32>
    %99 = vector.extract_strided_slice %26 {offsets = [8, 0], sizes = [8, 128], strides = [1, 1]} : vector<16x128xf32> to vector<8x128xf32>
    %100 = vector.extract_strided_slice %27 {offsets = [8, 0], sizes = [8, 128], strides = [1, 1]} : vector<16x128xf32> to vector<8x128xf32>
    %101 = tpu.concatenate %97, %97, %97, %97 in 0 : vector<8x128xf32>, vector<8x128xf32>, vector<8x128xf32>, vector<8x128xf32> -> vector<32x128xf32>
    %102 = tpu.concatenate %98, %98, %98, %98 in 0 : vector<8x128xf32>, vector<8x128xf32>, vector<8x128xf32>, vector<8x128xf32> -> vector<32x128xf32>
    %103 = vector.extract_strided_slice %96 {offsets = [0, 512], sizes = [8, 128], strides = [1, 1]} : vector<8x768xf32> to vector<8x128xf32>
    %104 = arith.mulf %103, %99 : vector<8x128xf32>
    %c64_i32_38 = arith.constant 64 : i32
    %105 = tpu.dynamic_rotate %103 by %c64_i32_38 dim 1 : vector<8x128xf32>, i32 -> vector<8x128xf32>
    %106 = arith.mulf %105, %100 : vector<8x128xf32>
    %107 = arith.addf %104, %106 : vector<8x128xf32>
    %108 = vector.extract_strided_slice %96 {offsets = [0, 640], sizes = [8, 128], strides = [1, 1]} : vector<8x768xf32> to vector<8x128xf32>
    %109 = vector.extract_strided_slice %96 {offsets = [0, 0], sizes = [8, 128], strides = [1, 1]} : vector<8x768xf32> to vector<8x128xf32>
    %110 = vector.extract_strided_slice %96 {offsets = [0, 128], sizes = [8, 128], strides = [1, 1]} : vector<8x768xf32> to vector<8x128xf32>
    %111 = vector.extract_strided_slice %96 {offsets = [0, 256], sizes = [8, 128], strides = [1, 1]} : vector<8x768xf32> to vector<8x128xf32>
    %112 = vector.extract_strided_slice %96 {offsets = [0, 384], sizes = [8, 128], strides = [1, 1]} : vector<8x768xf32> to vector<8x128xf32>
    %113 = tpu.concatenate %109, %110, %111, %112 in 0 : vector<8x128xf32>, vector<8x128xf32>, vector<8x128xf32>, vector<8x128xf32> -> vector<32x128xf32>
    %114 = arith.mulf %113, %101 : vector<32x128xf32>
    %c64_i32_39 = arith.constant 64 : i32
    %115 = tpu.dynamic_rotate %113 by %c64_i32_39 dim 1 : vector<32x128xf32>, i32 -> vector<32x128xf32>
    %116 = arith.mulf %115, %102 : vector<32x128xf32>
    %117 = arith.addf %114, %116 : vector<32x128xf32>
    %cst_40 = arith.constant dense<0.000000e+00> : vector<32x8xf32>
    %118 = tpu.matmul %117, %107, %cst_40 {dimension_numbers = #tpu.dot_dimension_numbers<[1], [1], [0], [0], [0, 0, 1, 0], [], []>} : vector<32x128xf32>, vector<8x128xf32>, vector<32x8xf32> -> vector<32x8xf32>
    %119 = arith.addf %118, %38 : vector<32x8xf32>
    %cst_41 = arith.constant dense<0xFF800000> : vector<32xf32>
    %120 = vector.multi_reduction <maximumf>, %119, %cst_41 [1] : vector<32x8xf32> to vector<32xf32>
    %121 = vector.shape_cast %120 : vector<32xf32> to vector<32x1xf32>
    %122 = vector.broadcast %121 : vector<32x1xf32> to vector<32x8xf32>
    %123 = arith.subf %119, %122 : vector<32x8xf32>
    %124 = math.exp %123 : vector<32x8xf32>
    %cst_42 = arith.constant dense<0.000000e+00> : vector<32xf32>
    %125 = vector.multi_reduction <add>, %124, %cst_42 [1] : vector<32x8xf32> to vector<32xf32>
    %126 = vector.shape_cast %125 : vector<32xf32> to vector<32x1xf32>
    %127 = tpu.reciprocal %126 {approx = true} : vector<32x1xf32> -> vector<32x1xf32>
    %128 = vector.broadcast %29 : f32 to vector<32x1xf32>
    %129 = arith.mulf %127, %128 : vector<32x1xf32>
    %130 = vector.broadcast %129 : vector<32x1xf32> to vector<32x8xf32>
    %131 = arith.mulf %124, %130 : vector<32x8xf32>
    %cst_43 = arith.constant dense<0.000000e+00> : vector<32x128xf32>
    %132 = tpu.matmul %131, %108, %cst_43 {dimension_numbers = #tpu.dot_dimension_numbers<[1], [0], [0], [1], [0, 0, 1, 1], [], []>} : vector<32x8xf32>, vector<8x128xf32>, vector<32x128xf32> -> vector<32x128xf32>
    %133 = arith.mulf %132, %132 : vector<32x128xf32>
    %cst_44 = arith.constant dense<0.000000e+00> : vector<32xf32>
    %134 = vector.multi_reduction <add>, %133, %cst_44 [1] : vector<32x128xf32> to vector<32xf32>
    %135 = vector.shape_cast %134 : vector<32xf32> to vector<32x1xf32>
    %cst_45 = arith.constant 1.280000e+02 : f32
    %136 = vector.broadcast %cst_45 : f32 to vector<32x1xf32>
    %137 = arith.divf %135, %136 : vector<32x1xf32>
    %cst_46 = arith.constant 9.99999974E-6 : f32
    %138 = vector.broadcast %cst_46 : f32 to vector<32x1xf32>
    %139 = arith.addf %137, %138 : vector<32x1xf32>
    %140 = math.rsqrt %139 : vector<32x1xf32>
    %141 = vector.broadcast %140 : vector<32x1xf32> to vector<32x128xf32>
    %142 = arith.mulf %132, %141 : vector<32x128xf32>
    %143 = vector.broadcast %31 : vector<1x128xf32> to vector<32x128xf32>
    %144 = arith.mulf %142, %143 : vector<32x128xf32>
    %145 = vector.extract_strided_slice %144 {offsets = [0, 0], sizes = [8, 128], strides = [1, 1]} : vector<32x128xf32> to vector<8x128xf32>
    %c8 = arith.constant 8 : index
    %c0_47 = arith.constant 0 : index
    %146 = vector.load %arg17[%c8, %c0_47] : memref<16x512xf32, #tpu.memory_space<vmem>>, vector<8x128xf32>
    tpu.vector_store %arg17[%c8, %c0_47], %145 {strides = array<i32>} : memref<16x512xf32, #tpu.memory_space<vmem>>, vector<8x128xf32>,
    %147 = vector.extract_strided_slice %144 {offsets = [8, 0], sizes = [8, 128], strides = [1, 1]} : vector<32x128xf32> to vector<8x128xf32>
    %c8_48 = arith.constant 8 : index
    %c128_49 = arith.constant 128 : index
    %148 = vector.load %arg17[%c8_48, %c128_49] : memref<16x512xf32, #tpu.memory_space<vmem>>, vector<8x128xf32>
    tpu.vector_store %arg17[%c8_48, %c128_49], %147 {strides = array<i32>} : memref<16x512xf32, #tpu.memory_space<vmem>>, vector<8x128xf32>,
    %149 = vector.extract_strided_slice %144 {offsets = [16, 0], sizes = [8, 128], strides = [1, 1]} : vector<32x128xf32> to vector<8x128xf32>
    %c8_50 = arith.constant 8 : index
    %c256_51 = arith.constant 256 : index
    %150 = vector.load %arg17[%c8_50, %c256_51] : memref<16x512xf32, #tpu.memory_space<vmem>>, vector<8x128xf32>
    tpu.vector_store %arg17[%c8_50, %c256_51], %149 {strides = array<i32>} : memref<16x512xf32, #tpu.memory_space<vmem>>, vector<8x128xf32>,
    %151 = vector.extract_strided_slice %144 {offsets = [24, 0], sizes = [8, 128], strides = [1, 1]} : vector<32x128xf32> to vector<8x128xf32>
    %c8_52 = arith.constant 8 : index
    %c384_53 = arith.constant 384 : index
    %152 = vector.load %arg17[%c8_52, %c384_53] : memref<16x512xf32, #tpu.memory_space<vmem>>, vector<8x128xf32>
    tpu.vector_store %arg17[%c8_52, %c384_53], %151 {strides = array<i32>} : memref<16x512xf32, #tpu.memory_space<vmem>>, vector<8x128xf32>,
    %c0_54 = arith.constant 0 : index
    %c0_55 = arith.constant 0 : index
    %153 = vector.load %arg17[%c0_54, %c0_55] : memref<16x512xf32, #tpu.memory_space<vmem>>, vector<16x512xf32>
    %c0_56 = arith.constant 0 : index
    %c0_57 = arith.constant 0 : index
    %c0_58 = arith.constant 0 : index
    %154 = vector.load %arg11[%c0_56, %c0_57, %c0_58] : memref<1x512x256xbf16, #tpu.memory_space<vmem>>, vector<1x512x256xbf16>
    %155 = vector.shape_cast %154 : vector<1x512x256xbf16> to vector<512x256xbf16>
    %156 = arith.extf %155 : vector<512x256xbf16> to vector<512x256xf32>
    %cst_59 = arith.constant dense<0.000000e+00> : vector<16x256xf32>
    %157 = tpu.matmul %153, %156, %cst_59 {dimension_numbers = #tpu.dot_dimension_numbers<[1], [0], [0], [1], [0, 0, 1, 1], [], []>} : vector<16x512xf32>, vector<512x256xf32>, vector<16x256xf32> -> vector<16x256xf32>
    %158 = arith.addf %157, %3 : vector<16x256xf32>
    %159 = arith.mulf %158, %158 : vector<16x256xf32>
    %cst_60 = arith.constant dense<0.000000e+00> : vector<16xf32>
    %160 = vector.multi_reduction <add>, %159, %cst_60 [1] : vector<16x256xf32> to vector<16xf32>
    %161 = vector.shape_cast %160 : vector<16xf32> to vector<16x1xf32>
    %cst_61 = arith.constant 2.560000e+02 : f32
    %162 = vector.broadcast %cst_61 : f32 to vector<16x1xf32>
    %163 = arith.divf %161, %162 : vector<16x1xf32>
    %cst_62 = arith.constant 9.99999997E-7 : f32
    %164 = vector.broadcast %cst_62 : f32 to vector<16x1xf32>
    %165 = arith.addf %163, %164 : vector<16x1xf32>
    %166 = math.rsqrt %165 : vector<16x1xf32>
    %167 = vector.broadcast %166 : vector<16x1xf32> to vector<16x256xf32>
    %168 = arith.mulf %158, %167 : vector<16x256xf32>
    %c0_63 = arith.constant 0 : index
    %c0_64 = arith.constant 0 : index
    %c0_65 = arith.constant 0 : index
    %169 = vector.load %arg12[%c0_63, %c0_64, %c0_65] : memref<1x1x256xf32, #tpu.memory_space<vmem>>, vector<1x1x256xf32>
    %170 = vector.shape_cast %169 : vector<1x1x256xf32> to vector<1x256xf32>
    %cst_66 = arith.constant 1.000000e+00 : f32
    %171 = vector.broadcast %cst_66 : f32 to vector<1x256xf32>
    %172 = arith.addf %171, %170 : vector<1x256xf32>
    %173 = vector.broadcast %172 : vector<1x256xf32> to vector<16x256xf32>
    %174 = arith.mulf %168, %173 : vector<16x256xf32>
    %c0_67 = arith.constant 0 : index
    %c0_68 = arith.constant 0 : index
    %c0_69 = arith.constant 0 : index
    %175 = vector.load %arg13[%c0_67, %c0_68, %c0_69] : memref<1x256x1024xbf16, #tpu.memory_space<vmem>>, vector<1x256x1024xbf16>
    %176 = vector.shape_cast %175 : vector<1x256x1024xbf16> to vector<256x1024xbf16>
    %177 = arith.extf %176 : vector<256x1024xbf16> to vector<256x1024xf32>
    %cst_70 = arith.constant dense<0.000000e+00> : vector<16x1024xf32>
    %178 = tpu.matmul %174, %177, %cst_70 {dimension_numbers = #tpu.dot_dimension_numbers<[1], [0], [0], [1], [0, 0, 1, 1], [], []>} : vector<16x256xf32>, vector<256x1024xf32>, vector<16x1024xf32> -> vector<16x1024xf32>
    %179 = vector.extract_strided_slice %178 {offsets = [0, 0], sizes = [16, 512], strides = [1, 1]} : vector<16x1024xf32> to vector<16x512xf32>
    %180 = arith.mulf %179, %179 : vector<16x512xf32>
    %181 = arith.mulf %179, %180 : vector<16x512xf32>
    %cst_71 = arith.constant 4.471500e-02 : f32
    %182 = vector.broadcast %cst_71 : f32 to vector<16x512xf32>
    %183 = arith.mulf %182, %181 : vector<16x512xf32>
    %184 = arith.addf %179, %183 : vector<16x512xf32>
    %cst_72 = arith.constant 0.797884583 : f32
    %185 = vector.broadcast %cst_72 : f32 to vector<16x512xf32>
    %186 = arith.mulf %185, %184 : vector<16x512xf32>
    %187 = math.tanh %186 : vector<16x512xf32>
    %cst_73 = arith.constant 1.000000e+00 : f32
    %188 = vector.broadcast %cst_73 : f32 to vector<16x512xf32>
    %189 = arith.addf %188, %187 : vector<16x512xf32>
    %cst_74 = arith.constant 5.000000e-01 : f32
    %190 = vector.broadcast %cst_74 : f32 to vector<16x512xf32>
    %191 = arith.mulf %190, %189 : vector<16x512xf32>
    %192 = arith.mulf %179, %191 : vector<16x512xf32>
    %193 = vector.extract_strided_slice %178 {offsets = [0, 512], sizes = [16, 512], strides = [1, 1]} : vector<16x1024xf32> to vector<16x512xf32>
    %194 = arith.mulf %192, %193 : vector<16x512xf32>
    %c0_75 = arith.constant 0 : index
    %c0_76 = arith.constant 0 : index
    %c0_77 = arith.constant 0 : index
    %195 = vector.load %arg14[%c0_75, %c0_76, %c0_77] : memref<1x512x256xbf16, #tpu.memory_space<vmem>>, vector<1x512x256xbf16>
    %196 = vector.shape_cast %195 : vector<1x512x256xbf16> to vector<512x256xbf16>
    %197 = arith.extf %196 : vector<512x256xbf16> to vector<512x256xf32>
    %cst_78 = arith.constant dense<0.000000e+00> : vector<16x256xf32>
    %198 = tpu.matmul %194, %197, %cst_78 {dimension_numbers = #tpu.dot_dimension_numbers<[1], [0], [0], [1], [0, 0, 1, 1], [], []>} : vector<16x512xf32>, vector<512x256xf32>, vector<16x256xf32> -> vector<16x256xf32>
    %199 = arith.addf %158, %198 : vector<16x256xf32>
    %c0_79 = arith.constant 0 : index
    %c0_80 = arith.constant 0 : index
    %200 = vector.load %arg16[%c0_79, %c0_80] : memref<16x256xf32, #tpu.memory_space<vmem>>, vector<16x256xf32>
    tpu.vector_store %arg16[%c0_79, %c0_80], %199 {strides = array<i32>} : memref<16x256xf32, #tpu.memory_space<vmem>>, vector<16x256xf32>,
    %c1_i32 = arith.constant 1 : i32
    %201 = arith.cmpi eq, %arg0, %c1_i32 : i32
    %202 = arith.extui %201 : i1 to i32
    %c0_i32_81 = arith.constant 0 : i32
    %203 = arith.cmpi ne, %202, %c0_i32_81 : i32
    scf.if %203 {
      %204 = arith.mulf %199, %199 : vector<16x256xf32>
      %cst_82 = arith.constant dense<0.000000e+00> : vector<16xf32>
      %205 = vector.multi_reduction <add>, %204, %cst_82 [1] : vector<16x256xf32> to vector<16xf32>
      %206 = vector.shape_cast %205 : vector<16xf32> to vector<16x1xf32>
      %cst_83 = arith.constant 2.560000e+02 : f32
      %207 = vector.broadcast %cst_83 : f32 to vector<16x1xf32>
      %208 = arith.divf %206, %207 : vector<16x1xf32>
      %cst_84 = arith.constant 9.99999997E-7 : f32
      %209 = vector.broadcast %cst_84 : f32 to vector<16x1xf32>
      %210 = arith.addf %208, %209 : vector<16x1xf32>
      %211 = math.rsqrt %210 : vector<16x1xf32>
      %212 = vector.broadcast %211 : vector<16x1xf32> to vector<16x256xf32>
      %213 = arith.mulf %199, %212 : vector<16x256xf32>
      %c0_85 = arith.constant 0 : index
      %c0_86 = arith.constant 0 : index
      %214 = vector.load %arg7[%c0_85, %c0_86] : memref<1x256xf32, #tpu.memory_space<vmem>>, vector<1x256xf32>
      %cst_87 = arith.constant 1.000000e+00 : f32
      %215 = vector.broadcast %cst_87 : f32 to vector<1x256xf32>
      %216 = arith.addf %215, %214 : vector<1x256xf32>
      %217 = vector.broadcast %216 : vector<1x256xf32> to vector<16x256xf32>
      %218 = arith.mulf %213, %217 : vector<16x256xf32>
      %c0_88 = arith.constant 0 : index
      %c0_89 = arith.constant 0 : index
      %219 = vector.load %arg15[%c0_88, %c0_89] : memref<16x256xf32, #tpu.memory_space<vmem>>, vector<16x256xf32>
      tpu.vector_store %arg15[%c0_88, %c0_89], %218 {strides = array<i32>} : memref<16x256xf32, #tpu.memory_space<vmem>>, vector<16x256xf32>,
    } else {
    }
    return
  }
  func.func @transform_0(%arg0: i32) -> i32 {
    %c0_i32 = arith.constant 0 : i32
    %c0_i32_0 = arith.constant 0 : i32
    return %c0_i32 : i32
  }
  func.func @transform_1(%arg0: i32) -> (i32, i32) {
    %c0_i32 = arith.constant 0 : i32
    %c0_i32_0 = arith.constant 0 : i32
    %c0_i32_1 = arith.constant 0 : i32
    return %c0_i32, %c0_i32_0 : i32, i32
  }
  func.func @transform_2(%arg0: i32) -> (i32, i32) {
    %c0_i32 = arith.constant 0 : i32
    %c0_i32_0 = arith.constant 0 : i32
    %c0_i32_1 = arith.constant 0 : i32
    return %c0_i32, %c0_i32_0 : i32, i32
  }
  func.func @transform_3(%arg0: i32) -> (i32, i32) {
    %c0_i32 = arith.constant 0 : i32
    %c0_i32_0 = arith.constant 0 : i32
    %c0_i32_1 = arith.constant 0 : i32
    return %c0_i32, %c0_i32_0 : i32, i32
  }
  func.func @transform_4(%arg0: i32) -> (i32, i32) {
    %c0_i32 = arith.constant 0 : i32
    %c0_i32_0 = arith.constant 0 : i32
    %c0_i32_1 = arith.constant 0 : i32
    return %c0_i32, %c0_i32_0 : i32, i32
  }
  func.func @transform_5(%arg0: i32) -> (i32, i32) {
    %c0_i32 = arith.constant 0 : i32
    %c0_i32_0 = arith.constant 0 : i32
    %c0_i32_1 = arith.constant 0 : i32
    return %c0_i32, %c0_i32_0 : i32, i32
  }
  func.func @transform_6(%arg0: i32) -> (i32, i32) {
    %c0_i32 = arith.constant 0 : i32
    %c0_i32_0 = arith.constant 0 : i32
    %c0_i32_1 = arith.constant 0 : i32
    return %c0_i32, %c0_i32_0 : i32, i32
  }
  func.func @transform_7(%arg0: i32) -> (i32, i32, i32) {
    %c0_i32 = arith.constant 0 : i32
    %c0_i32_0 = arith.constant 0 : i32
    %c0_i32_1 = arith.constant 0 : i32
    return %arg0, %c0_i32, %c0_i32_0 : i32, i32, i32
  }
  func.func @transform_8(%arg0: i32) -> (i32, i32, i32) {
    %c0_i32 = arith.constant 0 : i32
    %c0_i32_0 = arith.constant 0 : i32
    %c0_i32_1 = arith.constant 0 : i32
    return %arg0, %c0_i32, %c0_i32_0 : i32, i32, i32
  }
  func.func @transform_9(%arg0: i32) -> (i32, i32, i32) {
    %c0_i32 = arith.constant 0 : i32
    %c0_i32_0 = arith.constant 0 : i32
    %c0_i32_1 = arith.constant 0 : i32
    return %arg0, %c0_i32, %c0_i32_0 : i32, i32, i32
  }
  func.func @transform_10(%arg0: i32) -> (i32, i32, i32) {
    %c0_i32 = arith.constant 0 : i32
    %c0_i32_0 = arith.constant 0 : i32
    %c0_i32_1 = arith.constant 0 : i32
    return %arg0, %c0_i32, %c0_i32_0 : i32, i32, i32
  }
  func.func @transform_11(%arg0: i32) -> (i32, i32, i32) {
    %c0_i32 = arith.constant 0 : i32
    %c0_i32_0 = arith.constant 0 : i32
    %c0_i32_1 = arith.constant 0 : i32
    return %arg0, %c0_i32, %c0_i32_0 : i32, i32, i32
  }
  func.func @transform_12(%arg0: i32) -> (i32, i32, i32) {
    %c0_i32 = arith.constant 0 : i32
    %c0_i32_0 = arith.constant 0 : i32
    %c0_i32_1 = arith.constant 0 : i32
    return %arg0, %c0_i32, %c0_i32_0 : i32, i32, i32
  }
  func.func @transform_13(%arg0: i32) -> (i32, i32, i32) {
    %c0_i32 = arith.constant 0 : i32
    %c0_i32_0 = arith.constant 0 : i32
    %c0_i32_1 = arith.constant 0 : i32
    return %arg0, %c0_i32, %c0_i32_0 : i32, i32, i32
  }
  func.func @transform_14(%arg0: i32) -> (i32, i32) {
    %c0_i32 = arith.constant 0 : i32
    %c0_i32_0 = arith.constant 0 : i32
    %c0_i32_1 = arith.constant 0 : i32
    return %c0_i32, %c0_i32_0 : i32, i32
  }
}

</mosaic_0001>

<bundles_post_ra>
// kernel: gemma_model_fwd.1
= control target key start
LH: loop header
LB: loop body
LE: loop exit
PB: predicated region body
PF: predicated region fallthrough
CT: control target
= control target key end

     0   :  { %s6508_s0 = inlined_call_operand.vmem [shape: f32[2], index: 0, kind: input, shape index: {}]   ;;  %s6509_s1 = inlined_call_operand.vmem [shape: f32[16,256], index: 1, kind: input, shape index: {}]   ;;  %s6510_s2 = inlined_call_operand.vmem [shape: f32[16,128], index: 2, kind: input, shape index: {}]   ;;  %s6511_s3 = inlined_call_operand.vmem [shape: f32[16,128], index: 3, kind: input, shape index: {}]   ;;  %s6512_s4 = inlined_call_operand.vmem [shape: f32[16,128], index: 4, kind: input, shape index: {}]   ;;  %s6513_s5 = inlined_call_operand.vmem [shape: f32[16,128], index: 5, kind: input, shape index: {}]   ;;  %s6514_s6 = inlined_call_operand.vmem [shape: f32[1,256], index: 6, kind: input, shape index: {}]   ;;  %s6515_s7 = inlined_call_operand.vmem [shape: f32[2,1,256], index: 7, kind: input, shape index: {}]   ;;  %s6516_s8 = inlined_call_operand.vmem [shape: f32[2,1,128], index: 8, kind: input, shape index: {}]   ;;  %s6517_s9 = inlined_call_operand.hbm [shape: bf16[2,256,768], index: 9, kind: input, shape index: {}]   ;;  %s6518_s10 = inlined_call_operand.hbm [shape: bf16[2,512,256], index: 10, kind: input, shape index: {}]   ;;  %s6519_s11 = inlined_call_operand.vmem [shape: f32[2,1,256], index: 11, kind: input, shape index: {}]   ;;  %s6520_s12 = inlined_call_operand.hbm [shape: bf16[2,256,1024], index: 12, kind: input, shape index: {}]   ;;  %s6521_s13 = inlined_call_operand.hbm [shape: bf16[2,512,256], index: 13, kind: input, shape index: {}]   ;;  %s6522_s14 = inlined_call_operand.hbm [shape: f32[16,256], index: 14, kind: output, shape index: {}]  }
   0x1   :  { %6535 = sst [smem:[#allocation23_spill]] %s6508_s0 }
   0x2   :  { %6536 = sst [smem:[#allocation24_spill]] %s6513_s5 }
   0x3   :  { %6537 = sst [smem:[#allocation25_spill]] %s6514_s6 }
   0x4   :  { %6538 = sst [smem:[#allocation26_spill]] %s6517_s9 }
   0x5   :  { %6539 = sst [smem:[#allocation27_spill]] %s6518_s10 }
   0x6   :  { %6540 = sst [smem:[#allocation28_spill]] %s6522_s14 }
   0x7   :  { %19 = vsyncpa [#allocation7], 0 }
   0x8   :  { %20 = vsyncpa [#allocation5], 0 }
   0x9   :  { %22 = vsyncpa [#allocation5 + $0x1], 0 }
   0xa   :  { %23 = vsyncpa [#allocation10], 0 }
   0xb   :  { %25 = vsyncpa [#allocation10 + $0x1], 0 }
   0xc   :  { %26 = vsyncpa [#allocation13], 0 }
   0xd   :  { %28 = vsyncpa [#allocation13 + $0x1], 0 }
   0xe   :  { %29 = vsyncpa [#allocation6], 0  ;;  %s5533_s29 = smov 0   ;;  %s5535_s30 = smov 0  }
   0xf   :  { %s5537_s15 = smov 0   ;;  %s5539_s16 = smov 0  }
  0x10 LB: > { %6541 = sst [smem:[#allocation20_spill]] %s5436_s15  ;;  %s5554_s17 = sadd.s32 1, %s5440_s16   ;;  %s5440_s16 = sphi %s5539_s16, %s6565_s16   ;;  %s5436_s15 = sphi %s5537_s15, %s6567_s15   ;;  %s5432_s30 = sphi %s5535_s30, %s6569_s30   ;;  %s5428_s29 = sphi %s5533_s29, %s6568_s29  }
  0x11   : > { %6542 = sst [smem:[#allocation21_spill]] %s5554_s17  ;;  %s241_s18 = sadd.s32 1, %s5436_s15 }
  0x12   : > { %s238_s19 = ssub.s32 %s5440_s16, %s5554_s17  ;;  %p248_p0 = scmp.ne.s32.totalorder %s5436_s15, %s5432_s30 }
  0x13   : > { %p239_p1 = scmp.eq.s32.totalorder %s238_s19, 0  ;;  %p249_p2 = scmp.eq.s32.totalorder %s5440_s16, 0 }
  0x14   : > { %p4765_p3 = scmp.lt.s32.totalorder %s5440_s16, 2  ;;  %s5567_s21 = sand.u32 1, %s5436_s15  }
  0x15   : > { %s5564_s20 = scalar_select %p239_p1, %s5436_s15, %s241_s18  }
  0x16   : > { %p250_p4 = por %p249_p2, %p248_p0  ;;  %s466_s22 = sand.u32 1, %s5440_s16  }
  0x17   : > { %6543 = sst [smem:[#allocation22_spill]] %s5564_s20  ;;  %s6526_s23 = sshll.u32 %s5567_s21, 9 }
  0x18   : > { %p5571_p5 = pnand %p4765_p3, %p250_p4  ;;  %s6527_s25 = sshll.u32 %s5440_s16, 13 }
  0x19   : > { %s6545_s10 = sld [smem:[#allocation27_spill]]  ;;  %s470_s18 = scalar_lea.vmem [#allocation9], %s6526_s23 }
  0x1a   : > { %s477_s19 = sshll.u32 %s470_s18, 4  ;;  %s5587_s20 = scalar_lea.sflag [#allocation10], %s466_s22  ;;  %s5585_s19 = int_to_ptr.vmem [resolvable:$true] %s477_s19 }
  0x1b   : > { %p5593_p7 = pneg %p5571_p5 }
  0x1f   : > { %s5581_s28 = scalar_lea.hbm %s6545_s10, %s6527_s25  ;;  %s5234_s23 = scalar_lea.hbm %s6545_s10, 16384 }
  0x20   : > { %s5229_s15 = scalar_lea.hbm %s5581_s28, 8192  ;;  %p5235_p10 = scmp.lt.u32.totalorder %s5581_s28, %s6545_s10 }
  0x21   : > { %p5230_p6 = scmp.ne.s32.totalorder %s5581_s28, %s5229_s15  ;;  %p5236_p11 = scmp.lt.u32.totalorder %s5234_s23, %s5229_s15 }
  0x22   : > { %p5238_p13 = scmp.lt.u32.totalorder %s5229_s15, %s5581_s28 }
  0x23   : > { %p5232_p8 = pnand %p5593_p7, %p5230_p6  ;;  %p5237_p12 = por %p5236_p11, %p5235_p10 }
  0x25   : > { %p5233_p9 = pneg %p5232_p8  ;;  %p5239_p0 = por %p5238_p13, %p5237_p12 }
  0x27   : > { %p5240_p1 = pnand %p5239_p0, %p5233_p9 }
  0x29   : > { %5243 = shalt.err (!%p5240_p1)
}
  0x2a   : > { %s5244_s22 = scalar_lea.vmem %s5585_s19, 8192  ;;  %s5442_s26 = smov [#allocation9]  }
  0x2b   : > { %p5245_p2 = scmp.ne.s32.totalorder %s5585_s19, %s5244_s22  ;;  %s5249_s27 = sshll.u32 %s5442_s26, 4  ;;  %s5250_s27 = int_to_ptr.vmem [resolvable:$false] %s5249_s27 }
  0x2c   : > { %s5251_s25 = scalar_lea.vmem %s5250_s27, 16384  ;;  %p5252_p6 = scmp.lt.s32.totalorder %s5585_s19, %s5250_s27 }
  0x2d   : > { %p5247_p3 = pnand %p5245_p2, %p5593_p7  ;;  %p5253_p8 = scmp.lt.s32.totalorder %s5251_s25, %s5244_s22 }
  0x2f   : > { %p5248_p4 = pneg %p5247_p3  ;;  %p5254_p10 = por %p5253_p8, %p5252_p6 }
  0x31   : > { %p5255_p11 = pnand %p5254_p10, %p5248_p4 }
  0x33   : > { %5258 = shalt.err (!%p5255_p11)
}
  0x34   : > { %s6528_s15 = smov 128   ;;  %s6529_s23 = smov 8  }
  0x35   : > { %4757 = dma.hbm_to_vmem [thread:$0]  (!%p5571_p5), %s5581_s28, 8192, %s5585_s19, %s5587_s20, %s6528_s15, %s6528_s15, %s6529_s23  }
  0x36   : > { %s5621_s18 = sadd.s32 4294967295, %s5440_s16   ;;  %p254_p12 = scmp.ne.s32.totalorder %s5432_s30, %s5428_s29 }
  0x37   : > { %p6532_p9 = scmp.eq.s32.totalorder %s5621_s18, 0  ;;  %p3570_p13 = scmp.ge.s32.totalorder %s5440_s16, 1 }
  0x38   : > { %p390_p0 = scmp.lt.s32.totalorder %s5440_s16, 3  ;;  %s6548_s0 = sld [smem:[#allocation23_spill]] }
  0x39   : > { %p5631_p2 = por %p6532_p9, %p254_p12  ;;  %s4728_s29 = smul.u32 768, %s5567_s21 }
  0x3a   : > { %p5638_p3 = pnand %p3570_p13, %p390_p0  ;;  %s4729_s25 = smul.u32 12288, %s5440_s16 }
  0x3b   : > { %s6547_s22 = scalar_select %p5631_p2, 1, 0 }
  0x3c   : > { %s6549_s19 = scalar_select %p5638_p3, 1, 0 }
  0x3d   : > { %p4747_p4 = pneg %p5638_p3  ;;  %s6551_s9 = sld [smem:[#allocation26_spill]] }
  0x3e   : > { %s403_s28 = sshll.u32 %s6548_s0, 4  ;;  %s449_s27 = scalar_lea.vmem [#allocation8], %s4728_s29  ;;  %s404_s28 = int_to_ptr.vmem [resolvable:$true] %s403_s28 }
  0x3f   : > { %p5648_p6 = pnand %p4747_p4, %p6532_p9  ;;  %s456_s0 = sshll.u32 %s449_s27, 4  ;;  %s5657_s0 = int_to_ptr.vmem [resolvable:$true] %s456_s0 }
  0x40   : > { %s5259_s14 = scalar_lea.vmem %s404_s28, 16  ;;  %p5267_p13 = scmp.lt.s32.totalorder %s404_s28, %s404_s28 }
  0x41   : > { %p5260_p8 = scmp.ne.s32.totalorder %s404_s28, %s5259_s14  ;;  %p5261_p10 = pneg %p5648_p6 }
  0x42   : > { %p5268_p0 = scmp.lt.s32.totalorder %s5259_s14, %s5259_s14 }
  0x43   : > { %s5655_s26 = scalar_lea.hbm %s6551_s9, %s4729_s25  ;;  %p5262_p11 = pnand %p5261_p10, %p5260_p8 }
  0x44   : > { %p5269_p4 = por %p5268_p0, %p5267_p13 }
  0x45   : > { %p5263_p12 = pneg %p5262_p11 }
  0x47   : > { %p5270_p1 = pnand %p5269_p4, %p5263_p12 }
  0x49   : > { %5273 = shalt.err (!%p5270_p1)
}
  0x4a   : > { %s5445_s6 = smov [#allocation4]   ;;  %s3577_s10 = sshll.u32 %s5567_s21, 10 }
  0x4b   : > { %4750 = dma.vmem_to_smem (!%p5648_p6), %s404_s28, 16, %s5445_s6, [#allocation7]  }
  0x4c   : > { %s446_s23 = scalar_lea.sflag [#allocation5], %s5567_s21  ;;  %s5274_s29 = scalar_lea.hbm %s5655_s26, 12288 }
  0x4d   : > { %p5275_p8 = scmp.ne.s32.totalorder %s5655_s26, %s5274_s29  ;;  %s5279_s27 = scalar_lea.hbm %s6551_s9, 24576 }
  0x4e   : > { %p5280_p1 = scmp.lt.u32.totalorder %s5655_s26, %s6551_s9  ;;  %p5281_p12 = scmp.lt.u32.totalorder %s5279_s27, %s5274_s29 }
  0x4f   : > { %p5277_p10 = pnand %p5275_p8, %p5593_p7  ;;  %p5283_p0 = scmp.lt.u32.totalorder %s5274_s29, %s5655_s26 }
  0x50   : > { %p5282_p13 = por %p5281_p12, %p5280_p1 }
  0x51   : > { %p5278_p11 = pneg %p5277_p10 }
  0x52   : > { %p5284_p4 = por %p5283_p0, %p5282_p13 }
  0x54   : > { %p5285_p6 = pnand %p5284_p4, %p5278_p11 }
  0x56   : > { %5288 = shalt.err (!%p5285_p6)
}
  0x57   : > { %s5289_s6 = scalar_lea.vmem %s5657_s0, 12288  ;;  %s5446_s28 = smov [#allocation8]  }
  0x58   : > { %p5290_p8 = scmp.ne.s32.totalorder %s5657_s0, %s5289_s6  ;;  %s5294_s14 = sshll.u32 %s5446_s28, 4  ;;  %s5295_s14 = int_to_ptr.vmem [resolvable:$false] %s5294_s14 }
  0x59   : > { %s5296_s5 = scalar_lea.vmem %s5295_s14, 24576  ;;  %p5297_p2 = scmp.lt.s32.totalorder %s5657_s0, %s5295_s14 }
  0x5a   : > { %p5292_p10 = pnand %p5290_p8, %p5593_p7  ;;  %p5298_p3 = scmp.lt.s32.totalorder %s5296_s5, %s5289_s6 }
  0x5c   : > { %p5293_p9 = pneg %p5292_p10  ;;  %p5299_p1 = por %p5298_p3, %p5297_p2 }
  0x5e   : > { %p5300_p12 = pnand %p5299_p1, %p5293_p9 }
  0x60   : > { %5303 = shalt.err (!%p5300_p12)
}
  0x61   : > { %s5447_s29 = smov 384   ;;  %s5448_s25 = smov 24  }
  0x62   : > { %4754 = dma.hbm_to_vmem [thread:$0]  (!%p5571_p5), %s5655_s26, 12288, %s5657_s0, %s446_s23, %s5447_s29, %s5447_s29, %s5448_s25  }
  0x63   : > { %s3606_s27 = sshll.u32 %s5440_s16, 14  ;;  %s498_s14 = scalar_lea.vmem [#allocation11], %s3577_s10 }
  0x64   : > { %s5692_s6 = scalar_lea.hbm %s6520_s12, %s3606_s27  ;;  %s505_s5 = sshll.u32 %s498_s14, 4  ;;  %s5696_s5 = int_to_ptr.vmem [resolvable:$true] %s505_s5 }
  0x65   : > { %s5304_s9 = scalar_lea.hbm %s5692_s6, 16384  ;;  %s5309_s23 = scalar_lea.hbm %s6520_s12, 32768 }
  0x66   : > { %p5305_p9 = scmp.ne.s32.totalorder %s5692_s6, %s5304_s9  ;;  %p5310_p11 = scmp.lt.u32.totalorder %s5692_s6, %s6520_s12 }
  0x67   : > { %p5311_p13 = scmp.lt.u32.totalorder %s5309_s23, %s5304_s9  ;;  %p5313_p4 = scmp.lt.u32.totalorder %s5304_s9, %s5692_s6 }
  0x68   : > { %p5307_p2 = pnand %p5305_p9, %p5593_p7 }
  0x69   : > { %p5312_p0 = por %p5311_p13, %p5310_p11 }
  0x6a   : > { %p5308_p3 = pneg %p5307_p2 }
  0x6b   : > { %p5314_p6 = por %p5313_p4, %p5312_p0 }
  0x6d   : > { %p5315_p8 = pnand %p5314_p6, %p5308_p3 }
  0x6f   : > { %5318 = shalt.err (!%p5315_p8)
}
  0x70   : > { %s5319_s10 = scalar_lea.vmem %s5696_s5, 16384  ;;  %s5449_s27 = smov [#allocation11]  }
  0x71   : > { %p5320_p10 = scmp.ne.s32.totalorder %s5696_s5, %s5319_s10  ;;  %s5324_s15 = sshll.u32 %s5449_s27, 4  ;;  %s5325_s15 = int_to_ptr.vmem [resolvable:$false] %s5324_s15 }
  0x72   : > { %s5326_s28 = scalar_lea.vmem %s5325_s15, 32768  ;;  %p5327_p9 = scmp.lt.s32.totalorder %s5696_s5, %s5325_s15 }
  0x73   : > { %p5322_p1 = pnand %p5320_p10, %p5593_p7  ;;  %p5328_p2 = scmp.lt.s32.totalorder %s5326_s28, %s5319_s10 }
  0x75   : > { %p5323_p12 = pneg %p5322_p1  ;;  %p5329_p11 = por %p5328_p2, %p5327_p9 }
  0x77   : > { %p5330_p13 = pnand %p5329_p11, %p5323_p12 }
  0x79   : > { %5333 = shalt.err (!%p5330_p13)
}
  0x7a   : > { %s5450_s9 = smov 512   ;;  %s5451_s14 = smov 32  }
  0x7b   : > { %4760 = dma.hbm_to_vmem [thread:$0]  (!%p5571_p5), %s5692_s6, 16384, %s5696_s5, %s5587_s20, %s5450_s9, %s5450_s9, %s5451_s14  }
  0x7c   : > { %s6552_s0 = sshll.u32 %s5440_s16, 13  ;;  %s6553_s25 = sshll.u32 %s5567_s21, 9 }
  0x7d   : > { %s5725_s29 = scalar_lea.hbm %s6521_s13, %s6552_s0  ;;  %s519_s10 = scalar_lea.vmem [#allocation12], %s6553_s25 }
  0x7e   : > { %s526_s27 = sshll.u32 %s519_s10, 4  ;;  %s516_s15 = scalar_lea.sflag [#allocation13], %s5567_s21  ;;  %s5729_s27 = int_to_ptr.vmem [resolvable:$true] %s526_s27 }
  0x7f   : > { %s5334_s28 = scalar_lea.hbm %s5725_s29, 8192  ;;  %s5339_s6 = scalar_lea.hbm %s6521_s13, 16384 }
  0x80   : > { %p5335_p3 = scmp.ne.s32.totalorder %s5725_s29, %s5334_s28  ;;  %p5340_p6 = scmp.lt.u32.totalorder %s5725_s29, %s6521_s13 }
  0x81   : > { %p5341_p8 = scmp.lt.u32.totalorder %s5339_s6, %s5334_s28  ;;  %p5343_p1 = scmp.lt.u32.totalorder %s5334_s28, %s5725_s29 }
  0x82   : > { %p5337_p0 = pnand %p5335_p3, %p5593_p7 }
  0x83   : > { %p5342_p10 = por %p5341_p8, %p5340_p6 }
  0x84   : > { %p5338_p4 = pneg %p5337_p0 }
  0x85   : > { %p5344_p12 = por %p5343_p1, %p5342_p10 }
  0x87   : > { %p5345_p9 = pnand %p5344_p12, %p5338_p4 }
  0x89   : > { %5348 = shalt.err (!%p5345_p9)
}
  0x8a   : > { %s5349_s14 = scalar_lea.vmem %s5729_s27, 8192  ;;  %s5452_s0 = smov [#allocation12]  }
  0x8b   : > { %p5350_p2 = scmp.ne.s32.totalorder %s5729_s27, %s5349_s14  ;;  %s5354_s26 = sshll.u32 %s5452_s0, 4  ;;  %s5355_s26 = int_to_ptr.vmem [resolvable:$false] %s5354_s26 }
  0x8c   : > { %s5356_s23 = scalar_lea.vmem %s5355_s26, 16384  ;;  %p5357_p3 = scmp.lt.s32.totalorder %s5729_s27, %s5355_s26 }
  0x8d   : > { %p5352_p11 = pnand %p5350_p2, %p5593_p7  ;;  %p5358_p0 = scmp.lt.s32.totalorder %s5356_s23, %s5349_s14 }
  0x8f   : > { %p5353_p13 = pneg %p5352_p11  ;;  %p5359_p6 = por %p5358_p0, %p5357_p3 }
  0x91   : > { %p5360_p8 = pnand %p5359_p6, %p5353_p13 }
  0x93   : > { %5363 = shalt.err (!%p5360_p8)
}
  0x94   : > { %s6554_s25 = smov 8   ;;  %s6555_s10 = smov 128  }
  0x95   : > { %4763 = dma.hbm_to_vmem [thread:$0]  (!%p5571_p5), %s5725_s29, 8192, %s5729_s27, %s516_s15, %s6555_s10, %s6555_s10, %s6554_s25  }
  0x96   : > { %p6556_p7 = scmp.ne.s32.totalorder %s6549_s19, 0 }
  0x97   : > { %p6557_p4 = scmp.eq.s32.totalorder (!%p6556_p7), %s5621_s18, 0 }
  0x98   : > { %538 = sbr.rel (%p6556_p7) target bundleno = 3412 (0xd54), region = 76 }
  0x9f   : > { %5407 = dma.done.wait (%p6557_p4), [#allocation7], 16   ;;  %p6558_p10 = pmov %p6557_p4 }
  0xa0   : > { %s544_s17 = sand.u32 1, %s5432_s30   ;;  %p6559_p1 = scmp.ne.s32.totalorder %s6547_s22, 0 }
  0xa1   : > { %5409 = vsyncadd (%p6558_p10), [#allocation7], 4294967280  ;;  %s4730_s24 = smul.u32 768, %s544_s17  ;;  %s545_s28 = scalar_lea.sflag [#allocation5], %s544_s17 }
  0xa3   : > { %s5765_s16 = scalar_lea.vmem [#allocation8], %s4730_s24 }
  0xa4   : > { %5411 = dma.done.wait (%p6559_p1), %s545_s28, 12288  }
  0xa5   : > { %5413 = vsyncadd (%p6559_p1), %s545_s28, 4294955008  ;;  %s553_s21 = sand.u32 1, %s5621_s18   ;;  %s3585_s19 = sshll.u32 %s544_s17, 9 }
  0xa6   : > { %s554_s29 = scalar_lea.sflag [#allocation10], %s553_s21  ;;  %s5772_s27 = scalar_lea.vmem [#allocation9], %s3585_s19 }
  0xa7   : > { %5415 = dma.done.wait (%p6559_p1), %s554_s29, 24576  }
  0xa8   : > { %5417 = vsyncadd (%p6559_p1), %s554_s29, 4294942720  ;;  %s3586_s15 = sshll.u32 %s544_s17, 10  ;;  %s572_s6 = scalar_lea.sflag [#allocation13], %s544_s17 }
  0xa9   : > { %s5778_s20 = scalar_lea.vmem [#allocation11], %s3586_s15  ;;  %s5780_s5 = scalar_lea.vmem [#allocation12], %s3585_s19 }
  0xaa   : > { %5419 = dma.done.wait (%p6559_p1), %s572_s6, 8192  }
  0xab   : > { %5421 = vsyncadd (%p6559_p1), %s572_s6, 4294959104 }
  0xac   : > { %580 = sfence }
  0xad   : > { %p642_p5 = scmp.lt.s32.totalorder %s5621_s18, 1  ;;  %p6560_p12 = scmp.ne.s32.totalorder %s5621_s18, 0 }
  0xae   : > { %v657_v0 = vld [vmem:[%s6509_s1] sm:$0xff] (!%p6560_p12)  ;;  %v658_v1 = vld [vmem:[%s6509_s1 + $0x8] sm:$0xff] (!%p6560_p12)  ;;  %v659_v2 = vld [vmem:[%s6509_s1 + $0x10] sm:$0xff] (!%p6560_p12) }
  0xaf   : > { %s5788_s9 = scalar_select %p642_p5, %s5621_s18, 1 }
  0xb0   : > { %656 = sbr.rel (%p6560_p12) target bundleno = 183 (0xb7), region = 100  ;;  %v661_v3 = vmul.f32 (!%p6560_p12), 16.0, %v657_v0  ;;  %v662_v4 = vmul.f32 (!%p6560_p12), 16.0, %v658_v1  ;;  %v663_v5 = vmul.f32 (!%p6560_p12), 16.0, %v659_v2  ;;  %v660_v6 = vld [vmem:[%s6509_s1 + $0x18] sm:$0xff] (!%p6560_p12) }
  0xb1   : > { %s3588_s14 = sshll.u32 %s5788_s9, 1  ;;  %s648_s23 = scalar_lea.vmem %s6516_s8, %s5788_s9  ;;  %v664_v7 = vmul.f32 (!%p6560_p12), 16.0, %v660_v6 }
  0xb2   : > { %s5798_s17 = scalar_lea.vmem %s6515_s7, %s3588_s14  ;;  %s5803_s28 = scalar_lea.vmem %s6519_s11, %s3588_s14  ;;  %665 = vst [vmem:[#allocation2] sm:$0xff] (!%p6560_p12), %v661_v3  ;;  %666 = vst [vmem:[#allocation2 + $0x8] sm:$0xff] (!%p6560_p12), %v662_v4 }
  0xb3   : > { %667 = vst [vmem:[#allocation2 + $0x10] sm:$0xff] (!%p6560_p12), %v663_v5  ;;  %668 = vst [vmem:[#allocation2 + $0x18] sm:$0xff] (!%p6560_p12), %v664_v7 }
  0xb7 PF: > { %v4813_v16 = vld [vmem:[%s5765_s16 + $0x4] ss:$24 sps:$4 sm:$0xff]   ;;  %v4815_v17 = vld [vmem:[%s5765_s16] ss:$24 sps:$4 sm:$0xff]   ;;  %v4816_v19 = vld [vmem:[%s5765_s16 + $0x34] ss:$24 sps:$4 sm:$0xff]   ;;  %v697_v37 = vlaneseq }
  0xb8   : > { %3661 = vmatprep.subr.bf16.mxu0 %v4813_v16  ;;  %v4818_v21 = vld [vmem:[%s5765_s16 + $0x30] ss:$24 sps:$4 sm:$0xff]   ;;  %v4819_v22 = vld [vmem:[%s5765_s16 + $0x64] ss:$24 sps:$4 sm:$0xff]   ;;  %v4821_v23 = vld [vmem:[%s5765_s16 + $0x60] ss:$24 sps:$4 sm:$0xff]  }
  0xb9   : > { %v5819_v8 = vld [vmem:[#allocation2] sm:$0xff]  ;;  %v5821_v9 = vld [vmem:[#allocation2 + $0x8] sm:$0xff]  ;;  %3663 = vmatpush1.bf16.msra.mxu0 %v4815_v17  ;;  %v5856_v40 = vshrl.u32 %v697_v37, 7  ;;  %v5858_v41 = vand.u32 127, %v697_v37  ;;  %v4900_v37 = vld [vmem:[%s5765_s16 + $0x27c] ss:$24 sps:$4 sm:$0xff]  }
  0xba   : > { %v5823_v10 = vld [vmem:[#allocation2 + $0x10] sm:$0xff]  ;;  %v673_v11 = vmul.f32 %v5819_v8, %v5819_v8  ;;  %v674_v12 = vmul.f32 %v5821_v9, %v5821_v9  ;;  %v5829_v13 = vld [vmem:[#allocation2 + $0x18] sm:$0xff]  ;;  %3665 = vmatprep.subr.bf16.mxu0 %v4816_v19  ;;  %v4861_v53 = vld [vmem:[%s5765_s16 + $0xc] ss:$24 sps:$4 sm:$0xff]   ;;  %s5453_s25 = smov 64   ;;  %s6561_s15 = sld [smem:[#allocation24_spill]] }
  0xbb   : > { %v675_v14 = vmul.f32 %v5823_v10, %v5823_v10  ;;  %v676_v15 = vmul.f32 %v5829_v13, %v5829_v13  ;;  %v4822_v24 = vld [vmem:[%s5765_s16 + $0x94] ss:$24 sps:$4 sm:$0xff]   ;;  %v4824_v25 = vld [vmem:[%s5765_s16 + $0x90] ss:$24 sps:$4 sm:$0xff]   ;;  %v4825_v26 = vld [vmem:[%s5765_s16 + $0xc4] ss:$24 sps:$4 sm:$0xff]   ;;  %vm1244_vm0 = vcmp.le.s32.totalorder %v5858_v41, %v5856_v40 }
  0xbc   : > { %v677_v18 = vadd.f32 %v674_v12, %v673_v11  ;;  %v4827_v27 = vld [vmem:[%s5765_s16 + $0xc0] ss:$24 sps:$4 sm:$0xff]   ;;  %v4828_v28 = vld [vmem:[%s5765_s16 + $0xf4] ss:$24 sps:$4 sm:$0xff]   ;;  %v4830_v29 = vld [vmem:[%s5765_s16 + $0xf0] ss:$24 sps:$4 sm:$0xff]  }
  0xbd   : > { %v680_v20 = vadd.f32 %v676_v15, %v675_v14  ;;  %3667 = vmatpush1.bf16.msra.mxu0 %v4818_v21  ;;  %v4831_v30 = vld [vmem:[%s5765_s16 + $0x124] ss:$24 sps:$4 sm:$0xff]   ;;  %v4833_v31 = vld [vmem:[%s5765_s16 + $0x120] ss:$24 sps:$4 sm:$0xff]   ;;  %v4834_v32 = vld [vmem:[%s5765_s16 + $0x154] ss:$24 sps:$4 sm:$0xff]  }
  0xbe   : > { %678 = vadd.xlane.f32.xlu0 %v677_v18  ;;  %3669 = vmatprep.subr.bf16.mxu0 %v4819_v22  ;;  %v4836_v33 = vld [vmem:[%s5765_s16 + $0x150] ss:$24 sps:$4 sm:$0xff]   ;;  %v4837_v34 = vld [vmem:[%s5765_s16 + $0x184] ss:$24 sps:$4 sm:$0xff]   ;;  %v4839_v35 = vld [vmem:[%s5765_s16 + $0x180] ss:$24 sps:$4 sm:$0xff]  }
  0xbf   : > { %v4840_v36 = vld [vmem:[%s5765_s16 + $0x1b4] ss:$24 sps:$4 sm:$0xff]   ;;  %v4842_v38 = vld [vmem:[%s5765_s16 + $0x1b0] ss:$24 sps:$4 sm:$0xff]   ;;  %v4843_v39 = vld [vmem:[%s5765_s16 + $0x1e4] ss:$24 sps:$4 sm:$0xff]  }
  0xc0   : > { %v4845_v42 = vld [vmem:[%s5765_s16 + $0x1e0] ss:$24 sps:$4 sm:$0xff]   ;;  %v4846_v43 = vld [vmem:[%s5765_s16 + $0x214] ss:$24 sps:$4 sm:$0xff]   ;;  %v4848_v44 = vld [vmem:[%s5765_s16 + $0x210] ss:$24 sps:$4 sm:$0xff]   ;;  %s6562_s6 = smov %s6561_s15 }
  0xc1   : > { %3671 = vmatpush1.bf16.msra.mxu0 %v4821_v23  ;;  %v4849_v45 = vld [vmem:[%s5765_s16 + $0x244] ss:$24 sps:$4 sm:$0xff]   ;;  %v4851_v46 = vld [vmem:[%s5765_s16 + $0x240] ss:$24 sps:$4 sm:$0xff]   ;;  %v4852_v47 = vld [vmem:[%s5765_s16 + $0x274] ss:$24 sps:$4 sm:$0xff]  }
  0xc2   : > { %681 = vadd.xlane.f32.xlu0 %v680_v20  ;;  %3673 = vmatprep.subr.bf16.mxu0 %v4822_v24  ;;  %v4854_v48 = vld [vmem:[%s5765_s16 + $0x270] ss:$24 sps:$4 sm:$0xff]   ;;  %v4855_v49 = vld [vmem:[%s5765_s16 + $0x2a4] ss:$24 sps:$4 sm:$0xff]   ;;  %v4857_v50 = vld [vmem:[%s5765_s16 + $0x2a0] ss:$24 sps:$4 sm:$0xff]  }
  0xc3   : > { %v4858_v51 = vld [vmem:[%s5765_s16 + $0x2d4] ss:$24 sps:$4 sm:$0xff]   ;;  %v4860_v52 = vld [vmem:[%s5765_s16 + $0x2d0] ss:$24 sps:$4 sm:$0xff]   ;;  %v694_v60 = vld [vmem:[%s5798_s17] sm:$0x3] }
  0xc4   : > { %v695_v61 = vadd.f32 1.0, %v694_v60  ;;  %v5876_v62 = vsub.s32 1, %v5856_v40  ;;  %v5879_v63 = vsub.s32 0, %v5856_v40  ;;  %v4863_v6 = vld [vmem:[%s5765_s16 + $0x8] ss:$24 sps:$4 sm:$0xff]   ;;  %vm1356_vm1 = vcmask 64512  }
  0xc5   : > { %3675 = vmatpush1.bf16.msra.mxu0 %v4824_v25  ;;  %v4864_v12 = vld [vmem:[%s5765_s16 + $0x3c] ss:$24 sps:$4 sm:$0xff]   ;;  %v4867_v17 = vld [vmem:[%s5765_s16 + $0x6c] ss:$24 sps:$4 sm:$0xff]   ;;  %v4872_v18 = vld [vmem:[%s5765_s16 + $0x98] ss:$24 sps:$4 sm:$0xff]  }
  0xc6   : > { %3677 = vmatprep.subr.bf16.mxu0 %v4825_v26  ;;  %v704_v0 = vrot.slane %v695_v61, %v5876_v62  ;;  %v700_v1 = vrot.slane %v695_v61, %v5879_v63  ;;  %v4873_v19 = vld [vmem:[%s5765_s16 + $0xcc] ss:$24 sps:$4 sm:$0xff]   ;;  %v4875_v20 = vld [vmem:[%s5765_s16 + $0xc8] ss:$24 sps:$4 sm:$0xff]   ;;  %v4876_v21 = vld [vmem:[%s5765_s16 + $0xfc] ss:$24 sps:$4 sm:$0xff]  }
  0xc7   : > { %v4878_v22 = vld [vmem:[%s5765_s16 + $0xf8] ss:$24 sps:$4 sm:$0xff]   ;;  %v4879_v23 = vld [vmem:[%s5765_s16 + $0x12c] ss:$24 sps:$4 sm:$0xff]   ;;  %v4881_v24 = vld [vmem:[%s5765_s16 + $0x128] ss:$24 sps:$4 sm:$0xff]  }
  0xc8   : > { %v4882_v25 = vld [vmem:[%s5765_s16 + $0x15c] ss:$24 sps:$4 sm:$0xff]   ;;  %v4884_v26 = vld [vmem:[%s5765_s16 + $0x158] ss:$24 sps:$4 sm:$0xff]   ;;  %s1238_s10 = sld [smem:[#allocation4 + %s5621_s18]]  ;;  %p3600_p9 = scmp.ne.s32.totalorder %s5621_s18, 1 }
  0xc9   : > { %3679 = vmatpush1.bf16.msra.mxu0 %v4827_v27  ;;  %v4885_v27 = vld [vmem:[%s5765_s16 + $0x18c] ss:$24 sps:$4 sm:$0xff]   ;;  %v4932_v60 = vld [vmem:[%s5765_s16 + $0x160] ss:$24 sps:$4 sm:$0xff]  }
  0xca   : > { %3681 = vmatprep.subr.bf16.mxu0 %v4828_v28  ;;  %v4887_v28 = vld [vmem:[%s5765_s16 + $0x188] ss:$24 sps:$4 sm:$0xff]   ;;  %v4933_v61 = vld [vmem:[%s5765_s16 + $0x194] ss:$24 sps:$4 sm:$0xff]  }
  0xcd   : > { %3683 = vmatpush1.bf16.msra.mxu0 %v4830_v29  ;;  %v4888_v29 = vld [vmem:[%s5765_s16 + $0x1bc] ss:$24 sps:$4 sm:$0xff]  }
  0xce   : > { %3685 = vmatprep.subr.bf16.mxu0 %v4831_v30  ;;  %v4890_v30 = vld [vmem:[%s5765_s16 + $0x1b8] ss:$24 sps:$4 sm:$0xff]  }
  0xd1   : > { %3687 = vmatpush1.bf16.msra.mxu0 %v4833_v31  ;;  %v4891_v31 = vld [vmem:[%s5765_s16 + $0x1ec] ss:$24 sps:$4 sm:$0xff]  }
  0xd2   : > { %3689 = vmatprep.subr.bf16.mxu0 %v4834_v32  ;;  %v4893_v32 = vld [vmem:[%s5765_s16 + $0x1e8] ss:$24 sps:$4 sm:$0xff]  }
  0xd5   : > { %3691 = vmatpush1.bf16.msra.mxu0 %v4836_v33  ;;  %v4894_v33 = vld [vmem:[%s5765_s16 + $0x21c] ss:$24 sps:$4 sm:$0xff]  }
  0xd6   : > { %3693 = vmatprep.subr.bf16.mxu0 %v4837_v34  ;;  %v4896_v34 = vld [vmem:[%s5765_s16 + $0x218] ss:$24 sps:$4 sm:$0xff]  }
  0xd9   : > { %3695 = vmatpush1.bf16.msra.mxu0 %v4839_v35  ;;  %v4897_v35 = vld [vmem:[%s5765_s16 + $0x24c] ss:$24 sps:$4 sm:$0xff]  }
  0xda   : > { %3697 = vmatprep.subr.bf16.mxu0 %v4840_v36  ;;  %v4899_v36 = vld [vmem:[%s5765_s16 + $0x248] ss:$24 sps:$4 sm:$0xff]  }
  0xdd   : > { %3699 = vmatpush1.bf16.msra.mxu0 %v4842_v38  ;;  %v4902_v38 = vld [vmem:[%s5765_s16 + $0x278] ss:$24 sps:$4 sm:$0xff]  }
  0xde   : > { %3701 = vmatprep.subr.bf16.mxu0 %v4843_v39  ;;  %v4903_v39 = vld [vmem:[%s5765_s16 + $0x2ac] ss:$24 sps:$4 sm:$0xff]  }
  0xe1   : > { %3703 = vmatpush1.bf16.msra.mxu0 %v4845_v42  ;;  %v4905_v42 = vld [vmem:[%s5765_s16 + $0x2a8] ss:$24 sps:$4 sm:$0xff]  }
  0xe2   : > { %3705 = vmatprep.subr.bf16.mxu0 %v4846_v43  ;;  %v4906_v43 = vld [vmem:[%s5765_s16 + $0x2dc] ss:$24 sps:$4 sm:$0xff]  }
  0xe5   : > { %3707 = vmatpush1.bf16.msra.mxu0 %v4848_v44  ;;  %v4908_v44 = vld [vmem:[%s5765_s16 + $0x2d8] ss:$24 sps:$4 sm:$0xff]  }
  0xe6   : > { %3709 = vmatprep.subr.bf16.mxu0 %v4849_v45  ;;  %v4909_v45 = vld [vmem:[%s5765_s16 + $0x14] ss:$24 sps:$4 sm:$0xff]  }
  0xe9   : > { %3711 = vmatpush1.bf16.msra.mxu0 %v4851_v46  ;;  %v4911_v46 = vld [vmem:[%s5765_s16 + $0x10] ss:$24 sps:$4 sm:$0xff]  }
  0xea   : > { %3713 = vmatprep.subr.bf16.mxu0 %v4852_v47  ;;  %v4912_v47 = vld [vmem:[%s5765_s16 + $0x44] ss:$24 sps:$4 sm:$0xff]  }
  0xed   : > { %3715 = vmatpush1.bf16.msra.mxu0 %v4854_v48  ;;  %v4914_v48 = vld [vmem:[%s5765_s16 + $0x40] ss:$24 sps:$4 sm:$0xff]  }
  0xee   : > { %3717 = vmatprep.subr.bf16.mxu0 %v4855_v49  ;;  %v4915_v49 = vld [vmem:[%s5765_s16 + $0x74] ss:$24 sps:$4 sm:$0xff]  }
  0xf1   : > { %3719 = vmatpush1.bf16.msra.mxu0 %v4857_v50  ;;  %v4917_v50 = vld [vmem:[%s5765_s16 + $0x70] ss:$24 sps:$4 sm:$0xff]  }
  0xf2   : > { %3721 = vmatprep.subr.bf16.mxu0 %v4858_v51  ;;  %v4918_v51 = vld [vmem:[%s5765_s16 + $0xa4] ss:$24 sps:$4 sm:$0xff]  }
  0xf5   : > { %3723 = vmatpush1.bf16.msra.mxu0 %v4860_v52  ;;  %v4920_v52 = vld [vmem:[%s5765_s16 + $0xa0] ss:$24 sps:$4 sm:$0xff]  }
  0xf6   : > { %3725 = vmatprep.subr.bf16.mxu0 %v4861_v53  ;;  %v4921_v53 = vld [vmem:[%s5765_s16 + $0xd4] ss:$24 sps:$4 sm:$0xff]  }
 0x14b   : > { %v679_v54 = vpop.xlane.xlu0 %678 }
 0x14c   : > { %v684_v55 = vmul.f32 0.00390625, %v679_v54  ;;  %v4923_v54 = vld [vmem:[%s5765_s16 + $0xd0] ss:$24 sps:$4 sm:$0xff]  }
 0x14e   : > { %v686_v56 = vadd.f32 1e-06, %v684_v55  ;;  %v4924_v55 = vld [vmem:[%s5765_s16 + $0x104] ss:$24 sps:$4 sm:$0xff]  }
 0x14f   : > { %v682_v57 = vpop.xlane.xlu0 %681 }
 0x150   : > { %5149 = vrsqrt.f32 %v686_v56  ;;  %v685_v58 = vmul.f32 0.00390625, %v682_v57  ;;  %v4926_v56 = vld [vmem:[%s5765_s16 + $0x100] ss:$24 sps:$4 sm:$0xff]   ;;  %v4927_v57 = vld [vmem:[%s5765_s16 + $0x134] ss:$24 sps:$4 sm:$0xff]  }
 0x152   : > { %v687_v59 = vadd.f32 1e-06, %v685_v58  ;;  %v4929_v58 = vld [vmem:[%s5765_s16 + $0x130] ss:$24 sps:$4 sm:$0xff]  }
 0x154   : > { %5151 = vrsqrt.f32 %v687_v59  ;;  %v4930_v59 = vld [vmem:[%s5765_s16 + $0x164] ss:$24 sps:$4 sm:$0xff]  }
 0x15a   : > { %v5150_v2 = vpop.eup %5149 }
 0x15b   : > { %v691_v3 = vmul.f32 %v5150_v2, %v5821_v9  ;;  %v690_v4 = vmul.f32 %v5150_v2, %v5819_v8  ;;  %v4866_v9 = vld [vmem:[%s5765_s16 + $0x38] ss:$24 sps:$4 sm:$0xff]  }
 0x15c   : > { %v4938_v2 = vld [vmem:[%s5765_s16 + $0x1c0] ss:$24 sps:$4 sm:$0xff]  }
 0x15d   : > { %v5885_v5 = vmul.f32 %v704_v0, %v691_v3  ;;  %v5888_v7 = vmul.f32 %v700_v1, %v690_v4  ;;  %v4939_v3 = vld [vmem:[%s5765_s16 + $0x1f4] ss:$24 sps:$4 sm:$0xff]   ;;  %v4941_v4 = vld [vmem:[%s5765_s16 + $0x1f0] ss:$24 sps:$4 sm:$0xff]  }
 0x15e   : > { %v5152_v11 = vpop.eup %5151 }
 0x15f   : > { %1063 = vmatprep.mubr.f32.mxu0 %v5885_v5  ;;  %v693_v14 = vmul.f32 %v5152_v11, %v5829_v13  ;;  %v692_v15 = vmul.f32 %v5152_v11, %v5823_v10  ;;  %v4869_v10 = vld [vmem:[%s5765_s16 + $0x68] ss:$24 sps:$4 sm:$0xff]   ;;  %v4870_v13 = vld [vmem:[%s5765_s16 + $0x9c] ss:$24 sps:$4 sm:$0xff]  }
 0x160   : > { %1064 = vmatmul.mubr.f32.vlgmr.msra.gmra.mrb[0].mxu0 %v5888_v7  ;;  %v4945_v11 = vld [vmem:[%s5765_s16 + $0x254] ss:$24 sps:$4 sm:$0xff]  }
 0x161   : > { %3727 = vmatpush1.bf16.msra.mxu0 %v4863_v6  ;;  %v5895_v8 = vmul.f32 %v704_v0, %v693_v14  ;;  %v5898_v16 = vmul.f32 %v700_v1, %v692_v15  ;;  %v4935_v0 = vld [vmem:[%s5765_s16 + $0x190] ss:$24 sps:$4 sm:$0xff]   ;;  %v4936_v1 = vld [vmem:[%s5765_s16 + $0x1c4] ss:$24 sps:$4 sm:$0xff]   ;;  %v4944_v6 = vld [vmem:[%s5765_s16 + $0x220] ss:$24 sps:$4 sm:$0xff]  }
 0x162   : > { %3729 = vmatprep.subr.bf16.mxu0 %v4864_v12  ;;  %v4947_v12 = vld [vmem:[%s5765_s16 + $0x250] ss:$24 sps:$4 sm:$0xff]   ;;  %v4948_v14 = vld [vmem:[%s5765_s16 + $0x284] ss:$24 sps:$4 sm:$0xff]   ;;  %v4950_v15 = vld [vmem:[%s5765_s16 + $0x280] ss:$24 sps:$4 sm:$0xff]  }
 0x163   : > { %1069 = vmatprep.mubr.f32.mxu0 %v5895_v8 }
 0x164   : > { %1070 = vmatmul.mubr.f32.gmra.mrb[2].mxu0 %v5898_v16 }
 0x165   : > { %3731 = vmatpush1.bf16.msra.mxu0 %v4866_v9  ;;  %1140 = vmatprep.mubr.f32.mxu0 %v5885_v5  ;;  %v4951_v9 = vld [vmem:[%s5765_s16 + $0x2b4] ss:$24 sps:$4 sm:$0xff]  }
 0x166   : > { %3733 = vmatprep.subr.bf16.mxu0 %v4867_v17  ;;  %v4953_v17 = vld [vmem:[%s5765_s16 + $0x2b0] ss:$24 sps:$4 sm:$0xff]  }
 0x169   : > { %3735 = vmatpush1.bf16.msra.mxu0 %v4869_v10  ;;  %v4954_v10 = vld [vmem:[%s5765_s16 + $0x2e4] ss:$24 sps:$4 sm:$0xff]  }
 0x16a   : > { %3737 = vmatprep.subr.bf16.mxu0 %v4870_v13  ;;  %v4956_v13 = vld [vmem:[%s5765_s16 + $0x2e0] ss:$24 sps:$4 sm:$0xff]  }
 0x16d   : > { %3739 = vmatpush1.bf16.msra.mxu0 %v4872_v18 }
 0x16e   : > { %3741 = vmatprep.subr.bf16.mxu0 %v4873_v19 }
 0x171   : > { %3743 = vmatpush1.bf16.msra.mxu0 %v4875_v20 }
 0x172   : > { %3745 = vmatprep.subr.bf16.mxu0 %v4876_v21 }
 0x175   : > { %3747 = vmatpush1.bf16.msra.mxu0 %v4878_v22 }
 0x176   : > { %3749 = vmatprep.subr.bf16.mxu0 %v4879_v23 }
 0x179   : > { %3751 = vmatpush1.bf16.msra.mxu0 %v4881_v24 }
 0x17a   : > { %3753 = vmatprep.subr.bf16.mxu0 %v4882_v25 }
 0x17d   : > { %3755 = vmatpush1.bf16.msra.mxu0 %v4884_v26 }
 0x17e   : > { %3757 = vmatprep.subr.bf16.mxu0 %v4885_v27 }
 0x181   : > { %3759 = vmatpush1.bf16.msra.mxu0 %v4887_v28 }
 0x182   : > { %3761 = vmatprep.subr.bf16.mxu0 %v4888_v29 }
 0x185   : > { %3763 = vmatpush1.bf16.msra.mxu0 %v4890_v30 }
 0x186   : > { %3765 = vmatprep.subr.bf16.mxu0 %v4891_v31 }
 0x189   : > { %3767 = vmatpush1.bf16.msra.mxu0 %v4893_v32 }
 0x18a   : > { %3769 = vmatprep.subr.bf16.mxu0 %v4894_v33  ;;  %v1234_v33 = vld [vmem:[%s6512_s4] sm:$0xff] }
 0x18d   : > { %3771 = vmatpush1.bf16.msra.mxu0 %v4896_v34  ;;  %v1236_v34 = vld [vmem:[%s6561_s15] sm:$0xff] }
 0x18e   : > { %3773 = vmatprep.subr.bf16.mxu0 %v4897_v35 }
 0x191   : > { %3775 = vmatpush1.bf16.msra.mxu0 %v4899_v36 }
 0x192   : > { %3777 = vmatprep.subr.bf16.mxu0 %v4900_v37 }
 0x195   : > { %3779 = vmatpush1.bf16.msra.mxu0 %v4902_v38 }
 0x196   : > { %3781 = vmatprep.subr.bf16.mxu0 %v4903_v39 }
 0x199   : > { %3783 = vmatpush1.bf16.msra.mxu0 %v4905_v42 }
 0x19a   : > { %3785 = vmatprep.subr.bf16.mxu0 %v4906_v43 }
 0x19d   : > { %3787 = vmatpush1.bf16.msra.mxu0 %v4908_v44 }
 0x19e   : > { %3789 = vmatprep.subr.bf16.mxu0 %v4909_v45 }
 0x1a0   : > { %1141 = vmatmul.mubr.f32.vlgmr.msra.gmra.mrb[4].mxu0 %v5888_v7 }
 0x1a1   : > { %1146 = vmatprep.mubr.f32.mxu0 %v5895_v8  ;;  %3791 = vmatpush1.bf16.msra.mxu0 %v4911_v46 }
 0x1a2   : > { %3793 = vmatprep.subr.bf16.mxu0 %v4912_v47 }
 0x1a4   : > { %1147 = vmatmul.mubr.f32.gmra.mrb[6].mxu0 %v5898_v16 }
 0x1a5   : > { %3795 = vmatpush1.bf16.msra.mxu0 %v4914_v48  ;;  %1217 = vmatprep.mubr.f32.mxu0 %v5885_v5  ;;  %v4942_v5 = vld [vmem:[%s5765_s16 + $0x224] ss:$24 sps:$4 sm:$0xff]  }
 0x1a6   : > { %3797 = vmatprep.subr.bf16.mxu0 %v4915_v49 }
 0x1a9   : > { %3799 = vmatpush1.bf16.msra.mxu0 %v4917_v50 }
 0x1aa   : > { %3801 = vmatprep.subr.bf16.mxu0 %v4918_v51 }
 0x1ad   : > { %3803 = vmatpush1.bf16.msra.mxu0 %v4920_v52 }
 0x1ae   : > { %3805 = vmatprep.subr.bf16.mxu0 %v4921_v53  ;;  %v5454_v53 = vmov -1e+09  }
 0x1b1   : > { %3807 = vmatpush1.bf16.msra.mxu0 %v4923_v54  ;;  %v6002_v54 = vsel %vm1244_vm0, 0.0, %v5454_v53 }
 0x1b2   : > { %3809 = vmatprep.subr.bf16.mxu0 %v4924_v55 }
 0x1b5   : > { %3811 = vmatpush1.bf16.msra.mxu0 %v4926_v56 }
 0x1b6   : > { %3813 = vmatprep.subr.bf16.mxu0 %v4927_v57 }
 0x1b9   : > { %3815 = vmatpush1.bf16.msra.mxu0 %v4929_v58 }
 0x1ba   : > { %3817 = vmatprep.subr.bf16.mxu0 %v4930_v59 }
 0x1bd   : > { %3819 = vmatpush1.bf16.msra.mxu0 %v4932_v60 }
 0x1be   : > { %3821 = vmatprep.subr.bf16.mxu0 %v4933_v61 }
 0x1c1   : > { %3823 = vmatpush1.bf16.msra.mxu0 %v4935_v0 }
 0x1c2   : > { %3825 = vmatprep.subr.bf16.mxu0 %v4936_v1 }
 0x1c5   : > { %3827 = vmatpush1.bf16.msra.mxu0 %v4938_v2 }
 0x1c6   : > { %3829 = vmatprep.subr.bf16.mxu0 %v4939_v3 }
 0x1c9   : > { %3831 = vmatpush1.bf16.msra.mxu0 %v4941_v4 }
 0x1ca   : > { %3833 = vmatprep.subr.bf16.mxu0 %v4942_v5 }
 0x1cd   : > { %3835 = vmatpush1.bf16.msra.mxu0 %v4944_v6 }
 0x1ce   : > { %3837 = vmatprep.subr.bf16.mxu0 %v4945_v11 }
 0x1d1   : > { %3839 = vmatpush1.bf16.msra.mxu0 %v4947_v12 }
 0x1d2   : > { %3841 = vmatprep.subr.bf16.mxu0 %v4948_v14 }
 0x1d5   : > { %3843 = vmatpush1.bf16.msra.mxu0 %v4950_v15 }
 0x1d6   : > { %3845 = vmatprep.subr.bf16.mxu0 %v4951_v9 }
 0x1d9   : > { %3847 = vmatpush1.bf16.msra.mxu0 %v4953_v17 }
 0x1da   : > { %3849 = vmatprep.subr.bf16.mxu0 %v4954_v10 }
 0x1dd   : > { %3851 = vmatpush1.bf16.msra.mxu0 %v4956_v13  ;;  %v1235_v13 = vld [vmem:[%s6512_s4 + $0x8] sm:$0xff] }
 0x1e0   : > { %1218 = vmatmul.mubr.f32.vlgmr.msra.gmra.mrb[8].mxu0 %v5888_v7 }
 0x1e1   : > { %1223 = vmatprep.mubr.f32.mxu0 %v5895_v8  ;;  %v1230_v8 = vld [vmem:[%s6510_s2] sm:$0xff] }
 0x1e4   : > { %1224 = vmatmul.mubr.f32.gmra.mrb[10].mxu0 %v5898_v16  ;;  %v1232_v16 = vld [vmem:[%s6511_s3] sm:$0xff] }
 0x233   : > { %v1065_v18 = vpop.f32.mrb[0].mxu0 }
 0x234   : > { %1255 = vrot.lane.b32.xlu1 %v1065_v18, %s5453_s25  ;;  %v1067_v19 = vpop.f32.mrb[1].mxu0  ;;  %v1251_v26 = vmul.f32 %v1230_v8, %v1065_v18  ;;  %v1237_v18 = vld [vmem:[%s6562_s6 + $0x8] sm:$0xff] }
 0x235   : > { %1257 = vrot.lane.b32.xlu0 %v1067_v19, %s5453_s25  ;;  %v1252_v44 = vmul.f32 %v1230_v8, %v1067_v19 }
 0x237   : > { %v5972_v20 = vpop.f32.mrb[2].mxu0 }
 0x238   : > { %v5974_v21 = vpop.f32.mrb[3].mxu0 }
 0x273   : > { %v1142_v22 = vpop.f32.mrb[4].mxu0 }
 0x274   : > { %v1144_v23 = vpop.f32.mrb[5].mxu0  ;;  %v1253_v45 = vmul.f32 %v1230_v8, %v1142_v22 }
 0x275   : > { %v1254_v50 = vmul.f32 %v1230_v8, %v1144_v23 }
 0x277   : > { %v5976_v24 = vpop.f32.mrb[6].mxu0 }
 0x278   : > { %v5978_v7 = vpop.f32.mrb[7].mxu0 }
 0x2a6   : > { %v1256_v25 = vpop.permute.xlu1 %1255 }
 0x2a7   : > { %v1263_v27 = vmul.f32 %v1256_v25, %v1232_v16  ;;  %v1258_v35 = vpop.permute.xlu0 %1257 }
 0x2a8   : > { %v1264_v39 = vmul.f32 %v1258_v35, %v1232_v16 }
 0x2a9   : > { %v1267_v28 = vadd.f32 %v1263_v27, %v1251_v26 }
 0x2aa   : > { %v1268_v47 = vadd.f32 %v1264_v39, %v1252_v44 }
 0x2ab   : > { %3630 = vmatprep.mubr.f32.mxu1 %v1267_v28 }
 0x2b3   : > { %v1219_v29 = vpop.f32.mrb[8].mxu0 }
 0x2b4   : > { %1247 = vrot.lane.b32.xlu1 %v1219_v29, %s5453_s25  ;;  %v1221_v30 = vpop.f32.mrb[9].mxu0  ;;  %v1246_v37 = vmul.f32 %v1234_v33, %v1219_v29 }
 0x2b7   : > { %v5987_v31 = vpop.f32.mrb[10].mxu0 }
 0x2b8   : > { %1259 = vrot.lane.b32.xlu1 %v1142_v22, %s5453_s25  ;;  %v5990_v32 = vpop.f32.mrb[11].mxu0 }
 0x2bc   : > { %1261 = vrot.lane.b32.xlu1 %v1144_v23, %s5453_s25  ;;  %v1546_v23 = vmul.f32 %v1235_v13, %v5987_v31 }
 0x326   : > { %v1248_v36 = vpop.permute.xlu1 %1247 }
 0x327   : > { %v1249_v38 = vmul.f32 %v1248_v36, %v1236_v34 }
 0x329   : > { %v1250_v42 = vadd.f32 %v1249_v38, %v1246_v37  ;;  %v6034_v37 = vstv %s1238_s10 }
 0x32a   : > { %v1260_v43 = vpop.permute.xlu1 %1259 }
 0x32b   : > { %v1265_v46 = vmul.f32 %v1260_v43, %v1232_v16  ;;  %3628 = vmatprep.subr.mxu1 %v1250_v42 }
 0x32c   : > { %3629 = vmatpush3.xpose.msra.mxu1 %v1250_v42 }
 0x32d   : > { %v1269_v48 = vadd.f32 %v1265_v46, %v1253_v45  ;;  %3636 = vmatprep.subr.mxu1 %v1221_v30 }
 0x32e   : > { %v1262_v49 = vpop.permute.xlu1 %1261 }
 0x32f   : > { %v1266_v51 = vmul.f32 %v1262_v49, %v1232_v16  ;;  %3631 = vmatmul.mubr.f32.vlgmr.msra.gmra.mrb[0].mxu1 %v1268_v47 }
 0x330   : > { %3633 = vmatprep.mubr.f32.mxu1 %v1269_v48  ;;  %3637 = vmatpush3.msra.mxu1 %v1221_v30 }
 0x331   : > { %v1270_v52 = vadd.f32 %v1266_v51, %v1254_v50  ;;  %v1231_v51 = vld [vmem:[%s6510_s2 + $0x8] sm:$0xff] }
 0x333   : > { %3634 = vmatmul.mubr.f32.gmra.mrb[2].mxu1 %v1270_v52  ;;  %v1233_v52 = vld [vmem:[%s6511_s3 + $0x8] sm:$0xff] }
 0x402   : > { %v3632_v55 = vpop.f32.mrb[0].mxu1 }
 0x403   : > { %v1343_v56 = vadd.f32 %v3632_v55, %v6002_v54  ;;  %v1337_v57 = vpop.f32.mrb[1].mxu1 }
 0x404   : > { %v1338_v58 = vadd.f32 %v1337_v57, %v6002_v54 }
 0x405   : > { %v1360_v59 = vsel %vm1356_vm1, %v1343_v56, -inf }
 0x406   : > { %1361 = vmax.xlane.f32.xlu0 %v1360_v59  ;;  %v3635_v60 = vpop.f32.mrb[2].mxu1  ;;  %v1357_v61 = vsel %vm1356_vm1, %v1338_v58, -inf  ;;  %v1551_v59 = vmul.f32 %v1231_v51, %v5972_v20 }
 0x407   : > { %v1347_v0 = vpop.f32.mrb[3].mxu1  ;;  %1358 = vmax.xlane.f32.xlu1 %v1357_v61  ;;  %v1353_v40 = vadd.f32 %v3635_v60, %v6002_v54 }
 0x408   : > { %v1348_v1 = vadd.f32 %v1347_v0, %v6002_v54 }
 0x409   : > { %v1366_v2 = vsel %vm1356_vm1, %v1353_v40, -inf }
 0x40a   : > { %v1363_v41 = vsel %vm1356_vm1, %v1348_v1, -inf }
 0x40b   : > { %1364 = vmax.xlane.f32.xlu1 %v1363_v41  ;;  %v1552_v41 = vmul.f32 %v1231_v51, %v5974_v21 }
 0x40f   : > { %1367 = vmax.xlane.f32.xlu1 %v1366_v2  ;;  %v1553_v2 = vmul.f32 %v1231_v51, %v5976_v24 }
 0x420   : > { %1547 = vrot.lane.b32.xlu1 %v5987_v31, %s5453_s25 }
 0x493   : > { %v1362_v3 = vpop.xlane.xlu0 %1361 }
 0x494   : > { %v1370_v4 = vsub.f32 %v1343_v56, %v1362_v3  ;;  %v1359_v5 = vpop.xlane.xlu1 %1358 }
 0x495   : > { %v1369_v6 = vsub.f32 %v1338_v58, %v1359_v5 }
 0x496   : > { %v1375_v11 = vmul.f32 1.442695, %v1370_v4 }
 0x497   : > { %v1373_v12 = vmul.f32 1.442695, %v1369_v6  ;;  %v1554_v6 = vmul.f32 %v1231_v51, %v5978_v7 }
 0x498   : > { %5153 = vpow2.f32 %v1375_v11  ;;  %v1365_v14 = vpop.xlane.xlu1 %1364 }
 0x499   : > { %5155 = vpow2.f32 %v1373_v12  ;;  %v1371_v15 = vsub.f32 %v1348_v1, %v1365_v14 }
 0x49b   : > { %v1377_v9 = vmul.f32 1.442695, %v1371_v15 }
 0x49c   : > { %v1368_v17 = vpop.xlane.xlu1 %1367 }
 0x49d   : > { %5157 = vpow2.f32 %v1377_v9  ;;  %v1372_v10 = vsub.f32 %v1353_v40, %v1368_v17 }
 0x49f   : > { %v1379_v19 = vmul.f32 1.442695, %v1372_v10 }
 0x4a0   : > { %v1548_v22 = vpop.permute.xlu1 %1547 }
 0x4a1   : > { %5159 = vpow2.f32 %v1379_v19  ;;  %v1549_v8 = vmul.f32 %v1548_v22, %v1237_v18 }
 0x4a2   : > { %v5154_v16 = vpop.eup %5153 }
 0x4a3   : > { %v5156_v25 = vpop.eup %5155  ;;  %v1550_v26 = vadd.f32 %v1549_v8, %v1546_v23  ;;  %v1384_v27 = vsel %vm1356_vm1, %v5154_v16, 0.0 }
 0x4a4   : > { %1385 = vadd.xlane.f32.xlu0 %v1384_v27  ;;  %v1381_v28 = vsel %vm1356_vm1, %v5156_v25, 0.0 }
 0x4a5   : > { %1382 = vadd.xlane.f32.xlu1 %v1381_v28  ;;  %3644 = vmatprep.subr.mxu1 %v1550_v26 }
 0x4a7   : > { %v5158_v29 = vpop.eup %5157 }
 0x4a8   : > { %v1387_v30 = vsel %vm1356_vm1, %v5158_v29, 0.0 }
 0x4a9   : > { %1388 = vadd.xlane.f32.xlu1 %v1387_v30 }
 0x4ab   : > { %v5160_v33 = vpop.eup %5159 }
 0x4ac   : > { %v1390_v31 = vsel %vm1356_vm1, %v5160_v33, 0.0 }
 0x4ad   : > { %1391 = vadd.xlane.f32.xlu0 %v1390_v31 }
 0x4ba   : > { %1557 = vrot.lane.b32.xlu1 %v5974_v21, %s5453_s25 }
 0x4be   : > { %1559 = vrot.lane.b32.xlu1 %v5976_v24, %s5453_s25 }
 0x4c3   : > { %1555 = vrot.lane.b32.xlu0 %v5972_v20, %s5453_s25 }
 0x4c7   : > { %1561 = vrot.lane.b32.xlu0 %v5978_v7, %s5453_s25 }
 0x531   : > { %v1386_v34 = vpop.xlane.xlu0 %1385 }
 0x532   : > { %5161 = vrcp.f32 %v1386_v34  ;;  %v1383_v35 = vpop.xlane.xlu1 %1382 }
 0x533   : > { %5163 = vrcp.f32 %v1383_v35 }
 0x536   : > { %v1389_v36 = vpop.xlane.xlu1 %1388 }
 0x537   : > { %5165 = vrcp.f32 %v1389_v36 }
 0x53a   : > { %v1392_v38 = vpop.xlane.xlu0 %1391  ;;  %v1558_v45 = vpop.permute.xlu1 %1557 }
 0x53b   : > { %5167 = vrcp.f32 %v1392_v38  ;;  %v1564_v60 = vmul.f32 %v1558_v45, %v1233_v52 }
 0x53c   : > { %v5162_v39 = vpop.eup %5161 }
 0x53d   : > { %v5164_v42 = vpop.eup %5163  ;;  %v1399_v43 = vmul.f32 %v5162_v39, %v6034_v37  ;;  %v1568_v3 = vadd.f32 %v1564_v60, %v1552_v41  ;;  %v4960_v41 = vld [vmem:[%s5772_s27 + $0x14] ss:$8 sps:$4 sm:$0xff]  }
 0x53e   : > { %v1398_v44 = vmul.f32 %v5164_v42, %v6034_v37  ;;  %v1556_v49 = vpop.permute.xlu0 %1555  ;;  %v1560_v57 = vpop.permute.xlu1 %1559 }
 0x53f   : > { %v1403_v48 = vmul.f32 %v5154_v16, %v1399_v43  ;;  %v1563_v56 = vmul.f32 %v1556_v49, %v1233_v52  ;;  %v1565_v1 = vmul.f32 %v1560_v57, %v1233_v52 }
 0x540   : > { %v1402_v46 = vmul.f32 %v5156_v25, %v1398_v44 }
 0x541   : > { %v5166_v47 = vpop.eup %5165  ;;  %v1567_v0 = vadd.f32 %v1563_v56, %v1551_v59  ;;  %v1569_v5 = vadd.f32 %v1565_v1, %v1553_v2 }
 0x542   : > { %3638 = vmatprep.mubr.msk.f32.mxu1 %vm1356_vm1, %v1402_v46  ;;  %v1400_v50 = vmul.f32 %v5166_v47, %v6034_v37  ;;  %v1562_v40 = vpop.permute.xlu0 %1561 }
 0x543   : > { %3639 = vmatmul.mubr.msk.f32.vlgmr.msra.gmra.mrb[4].mxu1 %vm1356_vm1, %v1403_v48  ;;  %v1566_v4 = vmul.f32 %v1562_v40, %v1233_v52  ;;  %v4957_v48 = vld [vmem:[%s5772_s27 + $0x4] ss:$8 sps:$4 sm:$0xff]  }
 0x544   : > { %3645 = vmatpush3.xpose.msra.mxu1 %v1550_v26  ;;  %v1404_v53 = vmul.f32 %v5158_v29, %v1400_v50 }
 0x545   : > { %v5168_v55 = vpop.eup %5167  ;;  %3652 = vmatprep.subr.mxu1 %v5990_v32  ;;  %v1570_v20 = vadd.f32 %v1566_v4, %v1554_v6  ;;  %v4962_v6 = vld [vmem:[%s5772_s27 + $0x10] ss:$8 sps:$4 sm:$0xff]  }
 0x546   : > { %3641 = vmatprep.mubr.msk.f32.mxu1 %vm1356_vm1, %v1404_v53  ;;  %v1401_v58 = vmul.f32 %v5168_v55, %v6034_v37 }
 0x548   : > { %v1405_v61 = vmul.f32 %v5160_v33, %v1401_v58 }
 0x54a   : > { %3642 = vmatmul.mubr.msk.f32.gmra.mrb[6].mxu1 %vm1356_vm1, %v1405_v61 }
 0x54b   : > { %3646 = vmatprep.mubr.f32.mxu1 %v1567_v0  ;;  %v4959_v0 = vld [vmem:[%s5772_s27] ss:$8 sps:$4 sm:$0xff]  }
 0x54e   : > { %3647 = vmatmul.mubr.f32.vlgmr.msra.gmra.mrb[8].mxu1 %v1568_v3 }
 0x54f   : > { %3653 = vmatpush3.msra.mxu1 %v5990_v32  ;;  %3649 = vmatprep.mubr.f32.mxu1 %v1569_v5 }
 0x550   : > { %3853 = vmatprep.subr.bf16.mxu1 %v4957_v48 }
 0x552   : > { %3650 = vmatmul.mubr.f32.gmra.mrb[10].mxu1 %v1570_v20 }
 0x616   : > { %v6056_v11 = vpop.f32.mrb[4].mxu1 }
 0x617   : > { %v6058_v12 = vpop.f32.mrb[5].mxu1  ;;  %v1504_v46 = vmul.f32 %v6056_v11, %v6056_v11 }
 0x618   : > { %v1503_v47 = vmul.f32 %v6058_v12, %v6058_v12 }
 0x61d   : > { %v6060_v21 = vpop.f32.mrb[6].mxu1 }
 0x61e   : > { %v6062_v14 = vpop.f32.mrb[7].mxu1 }
 0x621   : > { %v3648_v24 = vpop.f32.mrb[8].mxu1 }
 0x622   : > { %v1643_v15 = vadd.f32 %v3648_v24, %v6002_v54  ;;  %v1637_v9 = vpop.f32.mrb[9].mxu1  ;;  %v4963_v24 = vld [vmem:[%s5772_s27 + $0x24] ss:$8 sps:$4 sm:$0xff]  }
 0x623   : > { %v1638_v7 = vadd.f32 %v1637_v9, %v6002_v54 }
 0x624   : > { %v1659_v17 = vsel %vm1356_vm1, %v1643_v15, -inf }
 0x625   : > { %1660 = vmax.xlane.f32.xlu0 %v1659_v17  ;;  %v3651_v32 = vpop.f32.mrb[10].mxu1  ;;  %v1656_v10 = vsel %vm1356_vm1, %v1638_v7, -inf }
 0x626   : > { %v1653_v13 = vadd.f32 %v3651_v32, %v6002_v54  ;;  %1657 = vmax.xlane.f32.xlu1 %v1656_v10  ;;  %v1647_v18 = vpop.f32.mrb[11].mxu1  ;;  %v4968_v32 = vld [vmem:[%s5772_s27 + $0x30] ss:$8 sps:$4 sm:$0xff]  }
 0x627   : > { %v1648_v19 = vadd.f32 %v1647_v18, %v6002_v54  ;;  %v4971_v18 = vld [vmem:[%s5772_s27 + $0x40] ss:$8 sps:$4 sm:$0xff]  }
 0x628   : > { %v1665_v22 = vsel %vm1356_vm1, %v1653_v13, -inf }
 0x629   : > { %v1662_v23 = vsel %vm1356_vm1, %v1648_v19, -inf }
 0x62a   : > { %1666 = vmax.xlane.f32.xlu1 %v1665_v22  ;;  %1663 = vmax.xlane.f32.xlu0 %v1662_v23  ;;  %v4974_v22 = vld [vmem:[%s5772_s27 + $0x50] ss:$8 sps:$4 sm:$0xff]   ;;  %v4977_v23 = vld [vmem:[%s5772_s27 + $0x60] ss:$8 sps:$4 sm:$0xff]  }
 0x6b2   : > { %v1661_v8 = vpop.xlane.xlu0 %1660 }
 0x6b3   : > { %v1669_v16 = vsub.f32 %v1643_v15, %v1661_v8  ;;  %v1658_v25 = vpop.xlane.xlu1 %1657  ;;  %v4965_v15 = vld [vmem:[%s5772_s27 + $0x20] ss:$8 sps:$4 sm:$0xff]   ;;  %v4978_v8 = vld [vmem:[%s5772_s27 + $0x74] ss:$8 sps:$4 sm:$0xff]  }
 0x6b4   : > { %v1668_v26 = vsub.f32 %v1638_v7, %v1658_v25  ;;  %v6100_v7 = vld [vmem:[%s648_s23] ss:$0 sm:$0xff]  ;;  %v4981_v25 = vld [vmem:[%s5772_s27 + $0x84] ss:$8 sps:$4 sm:$0xff]  }
 0x6b5   : > { %v1674_v27 = vmul.f32 1.442695, %v1669_v16  ;;  %v4980_v16 = vld [vmem:[%s5772_s27 + $0x70] ss:$8 sps:$4 sm:$0xff]  }
 0x6b6   : > { %v1672_v28 = vmul.f32 1.442695, %v1668_v26  ;;  %v4983_v26 = vld [vmem:[%s5772_s27 + $0x80] ss:$8 sps:$4 sm:$0xff]  }
 0x6b7   : > { %5169 = vpow2.f32 %v1674_v27  ;;  %v1664_v29 = vpop.xlane.xlu0 %1663  ;;  %v1667_v30 = vpop.xlane.xlu1 %1666  ;;  %v4984_v27 = vld [vmem:[%s5772_s27 + $0x94] ss:$8 sps:$4 sm:$0xff]  }
 0x6b8   : > { %5171 = vpow2.f32 %v1672_v28  ;;  %v1670_v33 = vsub.f32 %v1648_v19, %v1664_v29  ;;  %v1671_v31 = vsub.f32 %v1653_v13, %v1667_v30  ;;  %v4969_v13 = vld [vmem:[%s5772_s27 + $0x44] ss:$8 sps:$4 sm:$0xff]   ;;  %v4972_v19 = vld [vmem:[%s5772_s27 + $0x54] ss:$8 sps:$4 sm:$0xff]   ;;  %v4986_v28 = vld [vmem:[%s5772_s27 + $0x90] ss:$8 sps:$4 sm:$0xff]  }
 0x6b9   : > { %v4987_v30 = vld [vmem:[%s5772_s27 + $0xa4] ss:$8 sps:$4 sm:$0xff]  }
 0x6ba   : > { %v1676_v34 = vmul.f32 1.442695, %v1670_v33  ;;  %v1678_v54 = vmul.f32 1.442695, %v1671_v31  ;;  %v4989_v31 = vld [vmem:[%s5772_s27 + $0xa0] ss:$8 sps:$4 sm:$0xff]  }
 0x6bc   : > { %5173 = vpow2.f32 %v1676_v34  ;;  %v4990_v34 = vld [vmem:[%s5772_s27 + $0xb4] ss:$8 sps:$4 sm:$0xff]  }
 0x6bd   : > { %5175 = vpow2.f32 %v1678_v54 }
 0x6c1   : > { %v5170_v35 = vpop.eup %5169 }
 0x6c2   : > { %v5172_v36 = vpop.eup %5171  ;;  %v1683_v38 = vsel %vm1356_vm1, %v5170_v35, 0.0 }
 0x6c3   : > { %1684 = vadd.xlane.f32.xlu1 %v1683_v38  ;;  %v1680_v39 = vsel %vm1356_vm1, %v5172_v36, 0.0  ;;  %v4995_v38 = vld [vmem:[%s5772_s27 + $0xc0] ss:$8 sps:$4 sm:$0xff]  }
 0x6c4   : > { %1681 = vadd.xlane.f32.xlu0 %v1680_v39  ;;  %v4996_v39 = vld [vmem:[%s5772_s27 + $0xd4] ss:$8 sps:$4 sm:$0xff]  }
 0x6c6   : > { %v5174_v42 = vpop.eup %5173 }
 0x6c7   : > { %v5176_v43 = vpop.eup %5175  ;;  %v1686_v44 = vsel %vm1356_vm1, %v5174_v42, 0.0 }
 0x6c8   : > { %1687 = vadd.xlane.f32.xlu0 %v1686_v44  ;;  %v1689_v45 = vsel %vm1356_vm1, %v5176_v43, 0.0  ;;  %v5001_v44 = vld [vmem:[%s5772_s27 + $0xe0] ss:$8 sps:$4 sm:$0xff]  }
 0x6c9   : > { %1690 = vadd.xlane.f32.xlu1 %v1689_v45  ;;  %v5002_v45 = vld [vmem:[%s5772_s27 + $0xf4] ss:$8 sps:$4 sm:$0xff]  }
 0x6cc   : > { %1509 = vadd.xlane.f32.xlu0 %v1504_v46 }
 0x6cd   : > { %1507 = vadd.xlane.f32.xlu1 %v1503_v47  ;;  %v5004_v47 = vld [vmem:[%s5772_s27 + $0xf0] ss:$8 sps:$4 sm:$0xff]  }
 0x750   : > { %v1685_v49 = vpop.xlane.xlu1 %1684 }
 0x751   : > { %5177 = vrcp.f32 %v1685_v49  ;;  %v1682_v50 = vpop.xlane.xlu0 %1681 }
 0x752   : > { %5179 = vrcp.f32 %v1682_v50  ;;  %v5005_v50 = vld [vmem:[%s5772_s27 + $0x104] ss:$8 sps:$4 sm:$0xff]  }
 0x755   : > { %v1688_v51 = vpop.xlane.xlu0 %1687 }
 0x756   : > { %5181 = vrcp.f32 %v1688_v51  ;;  %v1691_v52 = vpop.xlane.xlu1 %1690  ;;  %v5007_v51 = vld [vmem:[%s5772_s27 + $0x100] ss:$8 sps:$4 sm:$0xff]  }
 0x757   : > { %5183 = vrcp.f32 %v1691_v52  ;;  %v5008_v52 = vld [vmem:[%s5772_s27 + $0x114] ss:$8 sps:$4 sm:$0xff]  }
 0x759   : > { %v1510_v53 = vpop.xlane.xlu0 %1509 }
 0x75a   : > { %v1517_v55 = vmul.f32 0.0078125, %v1510_v53  ;;  %v1508_v29 = vpop.xlane.xlu1 %1507  ;;  %v5010_v53 = vld [vmem:[%s5772_s27 + $0x110] ss:$8 sps:$4 sm:$0xff]  }
 0x75b   : > { %v5178_v56 = vpop.eup %5177  ;;  %v1516_v33 = vmul.f32 0.0078125, %v1508_v29  ;;  %v5052_v29 = vld [vmem:[%s5772_s27 + $0x1f0] ss:$8 sps:$4 sm:$0xff]  }
 0x75c   : > { %v5180_v57 = vpop.eup %5179  ;;  %v1697_v58 = vmul.f32 %v5178_v56, %v6034_v37  ;;  %v1521_v59 = vadd.f32 1e-05, %v1517_v55  ;;  %v5011_v55 = vld [vmem:[%s5772_s27 + $0x124] ss:$8 sps:$4 sm:$0xff]   ;;  %v5014_v56 = vld [vmem:[%s5772_s27 + $0x134] ss:$8 sps:$4 sm:$0xff]  }
 0x75d   : > { %v1696_v60 = vmul.f32 %v5180_v57, %v6034_v37  ;;  %v1520_v54 = vadd.f32 1e-05, %v1516_v33  ;;  %v5016_v57 = vld [vmem:[%s5772_s27 + $0x130] ss:$8 sps:$4 sm:$0xff]  }
 0x75e   : > { %5185 = vrsqrt.f32 %v1521_v59  ;;  %v1701_v40 = vmul.f32 %v5170_v35, %v1697_v58  ;;  %v4992_v35 = vld [vmem:[%s5772_s27 + $0xb0] ss:$8 sps:$4 sm:$0xff]   ;;  %v5017_v58 = vld [vmem:[%s5772_s27 + $0x144] ss:$8 sps:$4 sm:$0xff]   ;;  %v5019_v59 = vld [vmem:[%s5772_s27 + $0x140] ss:$8 sps:$4 sm:$0xff]  }
 0x75f   : > { %v1700_v61 = vmul.f32 %v5172_v36, %v1696_v60  ;;  %v4993_v36 = vld [vmem:[%s5772_s27 + $0xc4] ss:$8 sps:$4 sm:$0xff]   ;;  %5187 = vrsqrt.f32 %v1520_v54  ;;  %v5020_v60 = vld [vmem:[%s5772_s27 + $0x154] ss:$8 sps:$4 sm:$0xff]  }
 0x760   : > { %v5182_v1 = vpop.eup %5181 }
 0x761   : > { %v5184_v2 = vpop.eup %5183  ;;  %3654 = vmatprep.mubr.msk.f32.mxu1 %vm1356_vm1, %v1700_v61  ;;  %v1698_v3 = vmul.f32 %v5182_v1, %v6034_v37  ;;  %v5022_v61 = vld [vmem:[%s5772_s27 + $0x150] ss:$8 sps:$4 sm:$0xff]   ;;  %v5025_v1 = vld [vmem:[%s5772_s27 + $0x160] ss:$8 sps:$4 sm:$0xff]  }
 0x762   : > { %3655 = vmatmul.mubr.msk.f32.vlgmr.msra.gmra.mrb[12].mxu1 %vm1356_vm1, %v1701_v40  ;;  %v1699_v4 = vmul.f32 %v5184_v2, %v6034_v37  ;;  %v4966_v37 = vld [vmem:[%s5772_s27 + $0x34] ss:$8 sps:$4 sm:$0xff]   ;;  %v5029_v2 = vld [vmem:[%s5772_s27 + $0x184] ss:$8 sps:$4 sm:$0xff]  }
 0x763   : > { %3855 = vmatpush1.bf16.msra.mxu1 %v4959_v0  ;;  %v1702_v5 = vmul.f32 %v5174_v42, %v1698_v3  ;;  %v4998_v42 = vld [vmem:[%s5772_s27 + $0xd0] ss:$8 sps:$4 sm:$0xff]   ;;  %v5023_v0 = vld [vmem:[%s5772_s27 + $0x164] ss:$8 sps:$4 sm:$0xff]   ;;  %v5026_v40 = vld [vmem:[%s5772_s27 + $0x174] ss:$8 sps:$4 sm:$0xff]  }
 0x764   : > { %3857 = vmatprep.subr.bf16.mxu1 %v4960_v41  ;;  %v1703_v20 = vmul.f32 %v5176_v43, %v1699_v4  ;;  %v4999_v43 = vld [vmem:[%s5772_s27 + $0xe4] ss:$8 sps:$4 sm:$0xff]   ;;  %v5028_v41 = vld [vmem:[%s5772_s27 + $0x170] ss:$8 sps:$4 sm:$0xff]   ;;  %v5031_v3 = vld [vmem:[%s5772_s27 + $0x180] ss:$8 sps:$4 sm:$0xff]  }
 0x765   : > { %3657 = vmatprep.mubr.msk.f32.mxu1 %vm1356_vm1, %v1702_v5  ;;  %v5032_v4 = vld [vmem:[%s5772_s27 + $0x194] ss:$8 sps:$4 sm:$0xff]   ;;  %v5034_v5 = vld [vmem:[%s5772_s27 + $0x190] ss:$8 sps:$4 sm:$0xff]  }
 0x766   : > { %3658 = vmatmul.mubr.msk.f32.gmra.mrb[14].mxu1 %vm1356_vm1, %v1703_v20 }
 0x767   : > { %3859 = vmatpush1.bf16.msra.mxu1 %v4962_v6 }
 0x768   : > { %v5186_v9 = vpop.eup %5185  ;;  %3861 = vmatprep.subr.bf16.mxu1 %v4963_v24 }
 0x769   : > { %v1529_v17 = vmul.f32 %v5186_v9, %v6056_v11  ;;  %v4975_v11 = vld [vmem:[%s5772_s27 + $0x64] ss:$8 sps:$4 sm:$0xff]   ;;  %v5188_v46 = vpop.eup %5187 }
 0x76a   : > { %v1528_v48 = vmul.f32 %v5188_v46, %v6058_v12  ;;  %v5013_v12 = vld [vmem:[%s5772_s27 + $0x120] ss:$8 sps:$4 sm:$0xff]  }
 0x76b   : > { %3863 = vmatpush1.bf16.msra.mxu1 %v4965_v15  ;;  %v1539_v10 = vmul.f32 %v6100_v7, %v1529_v17  ;;  %v1506_v17 = vmul.f32 %v6060_v21, %v6060_v21 }
 0x76c   : > { %3865 = vmatprep.subr.bf16.mxu1 %v4966_v37  ;;  %v1538_v49 = vmul.f32 %v6100_v7, %v1528_v48 }
 0x76d   : > { %2101 = vmatprep.mubr.f32.mxu1 %v1539_v10 }
 0x76f   : > { %3867 = vmatpush1.bf16.msra.mxu1 %v4968_v32  ;;  %v1505_v32 = vmul.f32 %v6062_v14, %v6062_v14 }
 0x770   : > { %3869 = vmatprep.subr.bf16.mxu1 %v4969_v13 }
 0x773   : > { %3871 = vmatpush1.bf16.msra.mxu1 %v4971_v18  ;;  %v5035_v18 = vld [vmem:[%s5772_s27 + $0x1a4] ss:$8 sps:$4 sm:$0xff]  }
 0x774   : > { %3873 = vmatprep.subr.bf16.mxu1 %v4972_v19  ;;  %v5037_v19 = vld [vmem:[%s5772_s27 + $0x1a0] ss:$8 sps:$4 sm:$0xff]  }
 0x777   : > { %3875 = vmatpush1.bf16.msra.mxu1 %v4974_v22  ;;  %v5038_v22 = vld [vmem:[%s5772_s27 + $0x1b4] ss:$8 sps:$4 sm:$0xff]  }
 0x778   : > { %3877 = vmatprep.subr.bf16.mxu1 %v4975_v11  ;;  %v5040_v11 = vld [vmem:[%s5772_s27 + $0x1b0] ss:$8 sps:$4 sm:$0xff]  }
 0x77b   : > { %3879 = vmatpush1.bf16.msra.mxu1 %v4977_v23  ;;  %v5041_v23 = vld [vmem:[%s5772_s27 + $0x1c4] ss:$8 sps:$4 sm:$0xff]  }
 0x77c   : > { %3881 = vmatprep.subr.bf16.mxu1 %v4978_v8  ;;  %v5043_v8 = vld [vmem:[%s5772_s27 + $0x1c0] ss:$8 sps:$4 sm:$0xff]  }
 0x77f   : > { %3883 = vmatpush1.bf16.msra.mxu1 %v4980_v16  ;;  %v5044_v16 = vld [vmem:[%s5772_s27 + $0x1d4] ss:$8 sps:$4 sm:$0xff]  }
 0x780   : > { %3885 = vmatprep.subr.bf16.mxu1 %v4981_v25  ;;  %v5046_v25 = vld [vmem:[%s5772_s27 + $0x1d0] ss:$8 sps:$4 sm:$0xff]  }
 0x783   : > { %3887 = vmatpush1.bf16.msra.mxu1 %v4983_v26  ;;  %v5047_v26 = vld [vmem:[%s5772_s27 + $0x1e4] ss:$8 sps:$4 sm:$0xff]  }
 0x784   : > { %3889 = vmatprep.subr.bf16.mxu1 %v4984_v27  ;;  %v5049_v27 = vld [vmem:[%s5772_s27 + $0x1e0] ss:$8 sps:$4 sm:$0xff]  }
 0x787   : > { %3891 = vmatpush1.bf16.msra.mxu1 %v4986_v28  ;;  %v5050_v28 = vld [vmem:[%s5772_s27 + $0x1f4] ss:$8 sps:$4 sm:$0xff]  }
 0x788   : > { %3893 = vmatprep.subr.bf16.mxu1 %v4987_v30 }
 0x78b   : > { %3895 = vmatpush1.bf16.msra.mxu1 %v4989_v31 }
 0x78c   : > { %3897 = vmatprep.subr.bf16.mxu1 %v4990_v34 }
 0x78f   : > { %3899 = vmatpush1.bf16.msra.mxu1 %v4992_v35 }
 0x790   : > { %3901 = vmatprep.subr.bf16.mxu1 %v4993_v36 }
 0x793   : > { %3903 = vmatpush1.bf16.msra.mxu1 %v4995_v38 }
 0x794   : > { %3905 = vmatprep.subr.bf16.mxu1 %v4996_v39 }
 0x797   : > { %3907 = vmatpush1.bf16.msra.mxu1 %v4998_v42 }
 0x798   : > { %3909 = vmatprep.subr.bf16.mxu1 %v4999_v43 }
 0x79b   : > { %3911 = vmatpush1.bf16.msra.mxu1 %v5001_v44 }
 0x79c   : > { %3913 = vmatprep.subr.bf16.mxu1 %v5002_v45 }
 0x79f   : > { %3915 = vmatpush1.bf16.msra.mxu1 %v5004_v47 }
 0x7a0   : > { %3917 = vmatprep.subr.bf16.mxu1 %v5005_v50 }
 0x7a2   : > { %2102 = vmatmul.mubr.f32.vlgmr.msra.gmra.mrb[16].mxu1 %v1538_v49 }
 0x7a3   : > { %3919 = vmatpush1.bf16.msra.mxu1 %v5007_v51 }
 0x7a4   : > { %3921 = vmatprep.subr.bf16.mxu1 %v5008_v52 }
 0x7a7   : > { %3923 = vmatpush1.bf16.msra.mxu1 %v5010_v53 }
 0x7a8   : > { %3925 = vmatprep.subr.bf16.mxu1 %v5011_v55 }
 0x7ab   : > { %3927 = vmatpush1.bf16.msra.mxu1 %v5013_v12 }
 0x7ac   : > { %3929 = vmatprep.subr.bf16.mxu1 %v5014_v56 }
 0x7af   : > { %3931 = vmatpush1.bf16.msra.mxu1 %v5016_v57 }
 0x7b0   : > { %3933 = vmatprep.subr.bf16.mxu1 %v5017_v58 }
 0x7b3   : > { %3935 = vmatpush1.bf16.msra.mxu1 %v5019_v59 }
 0x7b4   : > { %3937 = vmatprep.subr.bf16.mxu1 %v5020_v60 }
 0x7b7   : > { %3939 = vmatpush1.bf16.msra.mxu1 %v5022_v61 }
 0x7b8   : > { %3941 = vmatprep.subr.bf16.mxu1 %v5023_v0 }
 0x7bb   : > { %3943 = vmatpush1.bf16.msra.mxu1 %v5025_v1 }
 0x7bc   : > { %3945 = vmatprep.subr.bf16.mxu1 %v5026_v40 }
 0x7bf   : > { %3947 = vmatpush1.bf16.msra.mxu1 %v5028_v41 }
 0x7c0   : > { %3949 = vmatprep.subr.bf16.mxu1 %v5029_v2 }
 0x7c3   : > { %3951 = vmatpush1.bf16.msra.mxu1 %v5031_v3  ;;  %v2228_v3 = vld [vmem:[%s5778_s20] sm:$0xff] }
 0x7c4   : > { %3953 = vmatprep.subr.bf16.mxu1 %v5032_v4  ;;  %v2232_v4 = vld [vmem:[%s5778_s20 + $0x20] sm:$0xff] }
 0x7c7   : > { %3955 = vmatpush1.bf16.msra.mxu1 %v5034_v5  ;;  %v2230_v5 = vld [vmem:[%s5778_s20 + $0x10] sm:$0xff] }
 0x7c8   : > { %3957 = vmatprep.subr.bf16.mxu1 %v5035_v18 }
 0x7cb   : > { %3959 = vmatpush1.bf16.msra.mxu1 %v5037_v19  ;;  %v2248_v19 = vld [vmem:[%s5778_s20 + $0xa0] sm:$0xff] }
 0x7cc   : > { %3961 = vmatprep.subr.bf16.mxu1 %v5038_v22  ;;  %v2246_v22 = vld [vmem:[%s5778_s20 + $0x90] sm:$0xff] }
 0x7cf   : > { %3963 = vmatpush1.bf16.msra.mxu1 %v5040_v11  ;;  %v2250_v11 = vld [vmem:[%s5778_s20 + $0xb0] sm:$0xff] }
 0x7d0   : > { %3965 = vmatprep.subr.bf16.mxu1 %v5041_v23 }
 0x7d3   : > { %3967 = vmatpush1.bf16.msra.mxu1 %v5043_v8 }
 0x7d4   : > { %3969 = vmatprep.subr.bf16.mxu1 %v5044_v16 }
 0x7d7   : > { %3971 = vmatpush1.bf16.msra.mxu1 %v5046_v25  ;;  %v4604_v25 = vcombine.high %v2246_v22, %v2250_v11 }
 0x7d8   : > { %3973 = vmatprep.subr.bf16.mxu1 %v5047_v26  ;;  %v2252_v26 = vld [vmem:[%s5778_s20 + $0xc0] sm:$0xff] }
 0x7db   : > { %3975 = vmatpush1.bf16.msra.mxu1 %v5049_v27  ;;  %v2256_v27 = vld [vmem:[%s5778_s20 + $0xe0] sm:$0xff] }
 0x7dc   : > { %3977 = vmatprep.subr.bf16.mxu1 %v5050_v28  ;;  %v2254_v28 = vld [vmem:[%s5778_s20 + $0xd0] sm:$0xff] }
 0x7df   : > { %3979 = vmatpush1.bf16.msra.mxu1 %v5052_v29  ;;  %v2258_v29 = vld [vmem:[%s5778_s20 + $0xf0] sm:$0xff] }
 0x835   : > { %v6151_v6 = vpop.f32.mrb[12].mxu1 }
 0x836   : > { %v6153_v20 = vpop.f32.mrb[13].mxu1  ;;  %v1802_v24 = vmul.f32 %v6151_v6, %v6151_v6 }
 0x837   : > { %v1801_v15 = vmul.f32 %v6153_v20, %v6153_v20 }
 0x838   : > { %1807 = vadd.xlane.f32.xlu0 %v1802_v24  ;;  %v2234_v24 = vld [vmem:[%s5778_s20 + $0x30] sm:$0xff] }
 0x839   : > { %1805 = vadd.xlane.f32.xlu1 %v1801_v15  ;;  %v6159_v9 = vpop.f32.mrb[14].mxu1  ;;  %v2236_v15 = vld [vmem:[%s5778_s20 + $0x40] sm:$0xff] }
 0x83a   : > { %v6161_v37 = vpop.f32.mrb[15].mxu1  ;;  %v1804_v10 = vmul.f32 %v6159_v9, %v6159_v9 }
 0x83b   : > { %v1803_v13 = vmul.f32 %v6161_v37, %v6161_v37 }
 0x83c   : > { %1513 = vadd.xlane.f32.xlu0 %v1506_v17  ;;  %v4601_v17 = vcombine.low %v2230_v5, %v2234_v24 }
 0x83d   : > { %1511 = vadd.xlane.f32.xlu1 %v1505_v32 }
 0x840   : > { %1811 = vadd.xlane.f32.xlu0 %v1804_v10  ;;  %v2238_v10 = vld [vmem:[%s5778_s20 + $0x50] sm:$0xff] }
 0x841   : > { %1809 = vadd.xlane.f32.xlu1 %v1803_v13  ;;  %v2242_v13 = vld [vmem:[%s5778_s20 + $0x70] sm:$0xff] }
 0x842   : > { %v4602_v18 = vcombine.high %v2238_v10, %v2242_v13  ;;  %v4603_v8 = vcombine.low %v2238_v10, %v2242_v13  ;;  %v2306_v10 = vld [vmem:[%s5778_s20 + $0x270] sm:$0xff] }
 0x8c5   : > { %v1808_v30 = vpop.xlane.xlu0 %1807 }
 0x8c6   : > { %v1814_v33 = vmul.f32 0.0078125, %v1808_v30  ;;  %v1806_v31 = vpop.xlane.xlu1 %1805 }
 0x8c7   : > { %v1813_v34 = vmul.f32 0.0078125, %v1806_v31  ;;  %v4542_v31 = vcombine.high %v2252_v26, %v2256_v27 }
 0x8c8   : > { %v1818_v54 = vadd.f32 1e-05, %v1814_v33  ;;  %v4605_v33 = vcombine.low %v2246_v22, %v2250_v11  ;;  %v2308_v22 = vld [vmem:[%s5778_s20 + $0x280] sm:$0xff] }
 0x8c9   : > { %v1817_v35 = vadd.f32 1e-05, %v1813_v34  ;;  %v1514_v36 = vpop.xlane.xlu0 %1513  ;;  %v4606_v34 = vcombine.high %v2254_v28, %v2258_v29  ;;  %v2312_v11 = vld [vmem:[%s5778_s20 + $0x2a0] sm:$0xff] }
 0x8ca   : > { %5189 = vrsqrt.f32 %v1818_v54  ;;  %v1519_v38 = vmul.f32 0.0078125, %v1514_v36  ;;  %v1512_v39 = vpop.xlane.xlu1 %1511  ;;  %v2260_v54 = vld [vmem:[%s5778_s20 + $0x100] sm:$0xff]  ;;  %v2262_v36 = vld [vmem:[%s5778_s20 + $0x110] sm:$0xff] }
 0x8cb   : > { %5191 = vrsqrt.f32 %v1817_v35  ;;  %v1518_v42 = vmul.f32 0.0078125, %v1512_v39  ;;  %v2264_v35 = vld [vmem:[%s5778_s20 + $0x120] sm:$0xff]  ;;  %v4543_v39 = vcombine.low %v2252_v26, %v2256_v27  ;;  %v4556_v26 = vcombine.high %v2308_v22, %v2312_v11 }
 0x8cc   : > { %v1523_v43 = vadd.f32 1e-05, %v1519_v38  ;;  %v2266_v38 = vld [vmem:[%s5778_s20 + $0x130] sm:$0xff] }
 0x8cd   : > { %v1522_v44 = vadd.f32 1e-05, %v1518_v42  ;;  %v1812_v45 = vpop.xlane.xlu0 %1811  ;;  %v4607_v42 = vcombine.low %v2254_v28, %v2258_v29  ;;  %v2316_v28 = vld [vmem:[%s5778_s20 + $0x2c0] sm:$0xff] }
 0x8ce   : > { %5193 = vrsqrt.f32 %v1523_v43  ;;  %v1816_v46 = vmul.f32 0.0078125, %v1812_v45  ;;  %v1810_v47 = vpop.xlane.xlu1 %1809  ;;  %v4544_v43 = vcombine.high %v2260_v54, %v2264_v35  ;;  %v2268_v45 = vld [vmem:[%s5778_s20 + $0x140] sm:$0xff] }
 0x8cf   : > { %5195 = vrsqrt.f32 %v1522_v44  ;;  %v1815_v48 = vmul.f32 0.0078125, %v1810_v47  ;;  %v4608_v44 = vcombine.high %v2262_v36, %v2266_v38  ;;  %v2270_v47 = vld [vmem:[%s5778_s20 + $0x150] sm:$0xff]  ;;  %v2320_v29 = vld [vmem:[%s5778_s20 + $0x2e0] sm:$0xff] }
 0x8d0   : > { %v1820_v49 = vadd.f32 1e-05, %v1816_v46  ;;  %v2272_v46 = vld [vmem:[%s5778_s20 + $0x160] sm:$0xff] }
 0x8d1   : > { %v1819_v50 = vadd.f32 1e-05, %v1815_v48  ;;  %v2274_v48 = vld [vmem:[%s5778_s20 + $0x170] sm:$0xff] }
 0x8d2   : > { %5197 = vrsqrt.f32 %v1820_v49  ;;  %v4545_v49 = vcombine.low %v2260_v54, %v2264_v35  ;;  %v5221_v35 = vld [vmem:[#allocation2] sm:$0xff] }
 0x8d3   : > { %5199 = vrsqrt.f32 %v1819_v50  ;;  %v4609_v50 = vcombine.low %v2262_v36, %v2266_v38 }
 0x8d4   : > { %v5190_v51 = vpop.eup %5189 }
 0x8d5   : > { %v5192_v52 = vpop.eup %5191  ;;  %v1826_v53 = vmul.f32 %v5190_v51, %v6151_v6  ;;  %v4536_v6 = vcombine.high %v2228_v3, %v2232_v4  ;;  %v4546_v51 = vcombine.high %v2268_v45, %v2272_v46 }
 0x8d6   : > { %v1825_v55 = vmul.f32 %v5192_v52, %v6153_v20  ;;  %v4537_v20 = vcombine.low %v2228_v3, %v2232_v4  ;;  %v4610_v52 = vcombine.high %v2270_v47, %v2274_v48  ;;  %v2292_v3 = vld [vmem:[%s5778_s20 + $0x200] sm:$0xff] }
 0x8d7   : > { %v1830_v12 = vmul.f32 %v6100_v7, %v1826_v53  ;;  %3981 = vmatprep.subr.bf16.mxu0 %v4536_v6  ;;  %v2276_v53 = vld [vmem:[%s5778_s20 + $0x180] sm:$0xff]  ;;  %v2298_v6 = vld [vmem:[%s5778_s20 + $0x230] sm:$0xff] }
 0x8d8   : > { %v5194_v56 = vpop.eup %5193  ;;  %v1829_v57 = vmul.f32 %v6100_v7, %v1825_v55  ;;  %3983 = vmatpush1.bf16.msra.mxu0 %v4537_v20  ;;  %v2280_v55 = vld [vmem:[%s5778_s20 + $0x1a0] sm:$0xff] }
 0x8d9   : > { %v5196_v58 = vpop.eup %5195  ;;  %2107 = vmatprep.mubr.f32.mxu1 %v1830_v12  ;;  %v1531_v59 = vmul.f32 %v5194_v56, %v6060_v21  ;;  %v2278_v12 = vld [vmem:[%s5778_s20 + $0x190] sm:$0xff]  ;;  %v2296_v4 = vld [vmem:[%s5778_s20 + $0x220] sm:$0xff] }
 0x8da   : > { %v1530_v60 = vmul.f32 %v5196_v58, %v6062_v14  ;;  %2108 = vmatmul.mubr.f32.gmra.mrb[18].mxu1 %v1829_v57  ;;  %v2282_v56 = vld [vmem:[%s5778_s20 + $0x1b0] sm:$0xff]  ;;  %v4547_v57 = vcombine.low %v2268_v45, %v2272_v46  ;;  %v4611_v58 = vcombine.low %v2270_v47, %v2274_v48  ;;  %v4553_v13 = vcombine.low %v2292_v3, %v2296_v4 }
 0x8db   : > { %v1541_v61 = vmul.f32 %v6100_v7, %v1531_v59  ;;  %v4548_v59 = vcombine.high %v2276_v53, %v2280_v55  ;;  %v5223_v46 = vld [vmem:[#allocation2 + $0x10] sm:$0xff] }
 0x8dc   : > { %v5198_v0 = vpop.eup %5197  ;;  %v1540_v1 = vmul.f32 %v6100_v7, %v1530_v60  ;;  %v4612_v60 = vcombine.high %v2278_v12, %v2282_v56 }
 0x8dd   : > { %v5200_v40 = vpop.eup %5199  ;;  %2178 = vmatprep.mubr.f32.mxu1 %v1541_v61  ;;  %v1828_v41 = vmul.f32 %v5198_v0, %v6159_v9  ;;  %v2240_v9 = vld [vmem:[%s5778_s20 + $0x60] sm:$0xff] }
 0x8de   : > { %2179 = vmatmul.mubr.f32.vlgmr.msra.gmra.mrb[16].mxu1 %v1540_v1  ;;  %v1827_v21 = vmul.f32 %v5200_v40, %v6161_v37  ;;  %v4600_v37 = vcombine.high %v2230_v5, %v2234_v24  ;;  %v4538_v32 = vcombine.high %v2236_v15, %v2240_v9  ;;  %v4539_v23 = vcombine.low %v2236_v15, %v2240_v9  ;;  %v2284_v61 = vld [vmem:[%s5778_s20 + $0x1c0] sm:$0xff]  ;;  %v2286_v1 = vld [vmem:[%s5778_s20 + $0x1d0] sm:$0xff] }
 0x8df   : > { %v1832_v14 = vmul.f32 %v6100_v7, %v1828_v41  ;;  %v2288_v0 = vld [vmem:[%s5778_s20 + $0x1e0] sm:$0xff]  ;;  %v2290_v40 = vld [vmem:[%s5778_s20 + $0x1f0] sm:$0xff]  ;;  %v4549_v41 = vcombine.low %v2276_v53, %v2280_v55  ;;  %v4552_v15 = vcombine.high %v2292_v3, %v2296_v4 }
 0x8e0   : > { %v1831_v2 = vmul.f32 %v6100_v7, %v1827_v21  ;;  %v2244_v7 = vld [vmem:[%s5778_s20 + $0x80] sm:$0xff]  ;;  %4109 = vmatprep.subr.bf16.mxu1 %v4600_v37  ;;  %3985 = vmatprep.subr.bf16.mxu0 %v4538_v32  ;;  %v4613_v21 = vcombine.low %v2278_v12, %v2282_v56  ;;  %v2294_v5 = vld [vmem:[%s5778_s20 + $0x210] sm:$0xff]  ;;  %v4551_v20 = vcombine.low %v2284_v61, %v2288_v0 }
 0x8e1   : > { %2184 = vmatprep.mubr.f32.mxu1 %v1832_v14  ;;  %4111 = vmatpush1.bf16.msra.mxu1 %v4601_v17  ;;  %v4540_v16 = vcombine.high %v2244_v7, %v2248_v19  ;;  %v4541_v30 = vcombine.low %v2244_v7, %v2248_v19  ;;  %v4550_v14 = vcombine.high %v2284_v61, %v2288_v0  ;;  %v2300_v37 = vld [vmem:[%s5778_s20 + $0x240] sm:$0xff]  ;;  %v2302_v32 = vld [vmem:[%s5778_s20 + $0x250] sm:$0xff] }
 0x8e2   : > { %2185 = vmatmul.mubr.f32.gmra.mrb[18].mxu1 %v1831_v2  ;;  %4113 = vmatprep.subr.bf16.mxu1 %v4602_v18  ;;  %v4614_v2 = vcombine.high %v2286_v1, %v2290_v40  ;;  %v4615_v24 = vcombine.low %v2286_v1, %v2290_v40  ;;  %v4616_v9 = vcombine.high %v2294_v5, %v2298_v6  ;;  %v2304_v17 = vld [vmem:[%s5778_s20 + $0x260] sm:$0xff]  ;;  %v2318_v12 = vld [vmem:[%s5778_s20 + $0x2d0] sm:$0xff] }
 0x8e3   : > { %3987 = vmatpush1.bf16.msra.mxu0 %v4539_v23  ;;  %v4617_v7 = vcombine.low %v2294_v5, %v2298_v6  ;;  %v4554_v18 = vcombine.high %v2300_v37, %v2304_v17  ;;  %v4618_v19 = vcombine.high %v2302_v32, %v2306_v10  ;;  %v2310_v23 = vld [vmem:[%s5778_s20 + $0x290] sm:$0xff] }
 0x8e4   : > { %3989 = vmatprep.subr.bf16.mxu0 %v4540_v16  ;;  %v4555_v16 = vcombine.low %v2300_v37, %v2304_v17  ;;  %v2322_v56 = vld [vmem:[%s5778_s20 + $0x2f0] sm:$0xff] }
 0x8e5   : > { %4115 = vmatpush1.bf16.msra.mxu1 %v4603_v8  ;;  %v2314_v8 = vld [vmem:[%s5778_s20 + $0x2b0] sm:$0xff] }
 0x8e6   : > { %4117 = vmatprep.subr.bf16.mxu1 %v4604_v25  ;;  %v4619_v25 = vcombine.low %v2302_v32, %v2306_v10  ;;  %v4620_v27 = vcombine.high %v2310_v23, %v2314_v8  ;;  %v2326_v0 = vld [vmem:[%s5778_s20 + $0x310] sm:$0xff] }
 0x8e7   : > { %3991 = vmatpush1.bf16.msra.mxu0 %v4541_v30  ;;  %v4557_v30 = vcombine.low %v2308_v22, %v2312_v11  ;;  %v2330_v1 = vld [vmem:[%s5778_s20 + $0x330] sm:$0xff] }
 0x8e8   : > { %3993 = vmatprep.subr.bf16.mxu0 %v4542_v31  ;;  %v4558_v31 = vcombine.high %v2316_v28, %v2320_v29  ;;  %v2334_v4 = vld [vmem:[%s5778_s20 + $0x350] sm:$0xff] }
 0x8e9   : > { %4119 = vmatpush1.bf16.msra.mxu1 %v4605_v33  ;;  %v4621_v33 = vcombine.low %v2310_v23, %v2314_v8  ;;  %v2338_v5 = vld [vmem:[%s5778_s20 + $0x370] sm:$0xff] }
 0x8ea   : > { %4121 = vmatprep.subr.bf16.mxu1 %v4606_v34  ;;  %v4559_v34 = vcombine.low %v2316_v28, %v2320_v29  ;;  %v2342_v17 = vld [vmem:[%s5778_s20 + $0x390] sm:$0xff] }
 0x8eb   : > { %3995 = vmatpush1.bf16.msra.mxu0 %v4543_v39  ;;  %v5222_v39 = vld [vmem:[#allocation2 + $0x8] sm:$0xff]  ;;  %v2346_v32 = vld [vmem:[%s5778_s20 + $0x3b0] sm:$0xff] }
 0x8ec   : > { %3997 = vmatprep.subr.bf16.mxu0 %v4544_v43  ;;  %v2350_v11 = vld [vmem:[%s5778_s20 + $0x3d0] sm:$0xff] }
 0x8ed   : > { %4123 = vmatpush1.bf16.msra.mxu1 %v4607_v42  ;;  %v2354_v23 = vld [vmem:[%s5778_s20 + $0x3f0] sm:$0xff] }
 0x8ee   : > { %4125 = vmatprep.subr.bf16.mxu1 %v4608_v44 }
 0x8ef   : > { %3999 = vmatpush1.bf16.msra.mxu0 %v4545_v49  ;;  %v5224_v49 = vld [vmem:[#allocation2 + $0x18] sm:$0xff] }
 0x8f0   : > { %4001 = vmatprep.subr.bf16.mxu0 %v4546_v51 }
 0x8f1   : > { %4127 = vmatpush1.bf16.msra.mxu1 %v4609_v50 }
 0x8f2   : > { %4129 = vmatprep.subr.bf16.mxu1 %v4610_v52 }
 0x8f3   : > { %4003 = vmatpush1.bf16.msra.mxu0 %v4547_v57  ;;  %v4622_v57 = vcombine.high %v2318_v12, %v2322_v56 }
 0x8f4   : > { %4005 = vmatprep.subr.bf16.mxu0 %v4548_v59  ;;  %v2324_v59 = vld [vmem:[%s5778_s20 + $0x300] sm:$0xff] }
 0x8f5   : > { %4131 = vmatpush1.bf16.msra.mxu1 %v4611_v58  ;;  %v4623_v58 = vcombine.low %v2318_v12, %v2322_v56 }
 0x8f6   : > { %4133 = vmatprep.subr.bf16.mxu1 %v4612_v60  ;;  %v2328_v60 = vld [vmem:[%s5778_s20 + $0x320] sm:$0xff] }
 0x8f7   : > { %4007 = vmatpush1.bf16.msra.mxu0 %v4549_v41  ;;  %v4560_v61 = vcombine.high %v2324_v59, %v2328_v60  ;;  %v4561_v40 = vcombine.low %v2324_v59, %v2328_v60  ;;  %v4624_v41 = vcombine.high %v2326_v0, %v2330_v1  ;;  %v2249_v59 = vld [vmem:[%s5778_s20 + $0xa8] sm:$0xff] }
 0x8f8   : > { %4009 = vmatprep.subr.bf16.mxu0 %v4550_v14  ;;  %v2332_v14 = vld [vmem:[%s5778_s20 + $0x340] sm:$0xff] }
 0x8f9   : > { %4135 = vmatpush1.bf16.msra.mxu1 %v4613_v21  ;;  %v4625_v21 = vcombine.low %v2326_v0, %v2330_v1 }
 0x8fa   : > { %4137 = vmatprep.subr.bf16.mxu1 %v4614_v2  ;;  %v2336_v2 = vld [vmem:[%s5778_s20 + $0x360] sm:$0xff] }
 0x8fb   : > { %4011 = vmatpush1.bf16.msra.mxu0 %v4551_v20  ;;  %v4562_v3 = vcombine.high %v2332_v14, %v2336_v2  ;;  %v4563_v6 = vcombine.low %v2332_v14, %v2336_v2  ;;  %v4626_v20 = vcombine.high %v2334_v4, %v2338_v5  ;;  %v5055_v14 = vld [vmem:[%s5780_s5] ss:$8 sps:$4 sm:$0xff]   ;;  %v5056_v2 = vld [vmem:[%s5780_s5 + $0x14] ss:$8 sps:$4 sm:$0xff]  }
 0x8fc   : > { %4013 = vmatprep.subr.bf16.mxu0 %v4552_v15  ;;  %v2340_v15 = vld [vmem:[%s5778_s20 + $0x380] sm:$0xff] }
 0x8fd   : > { %4139 = vmatpush1.bf16.msra.mxu1 %v4615_v24  ;;  %v4627_v24 = vcombine.low %v2334_v4, %v2338_v5  ;;  %v2261_v5 = vld [vmem:[%s5778_s20 + $0x108] sm:$0xff] }
 0x8fe   : > { %4141 = vmatprep.subr.bf16.mxu1 %v4616_v9  ;;  %v2344_v9 = vld [vmem:[%s5778_s20 + $0x3a0] sm:$0xff] }
 0x8ff   : > { %4015 = vmatpush1.bf16.msra.mxu0 %v4553_v13  ;;  %v4564_v37 = vcombine.high %v2340_v15, %v2344_v9  ;;  %v4565_v10 = vcombine.low %v2340_v15, %v2344_v9  ;;  %v4628_v13 = vcombine.high %v2342_v17, %v2346_v32 }
 0x900   : > { %4017 = vmatprep.subr.bf16.mxu0 %v4554_v18  ;;  %v2348_v18 = vld [vmem:[%s5778_s20 + $0x3c0] sm:$0xff] }
 0x901   : > { %4143 = vmatpush1.bf16.msra.mxu1 %v4617_v7  ;;  %v4629_v7 = vcombine.low %v2342_v17, %v2346_v32  ;;  %v2273_v17 = vld [vmem:[%s5778_s20 + $0x168] sm:$0xff] }
 0x902   : > { %4145 = vmatprep.subr.bf16.mxu1 %v4618_v19  ;;  %v2352_v19 = vld [vmem:[%s5778_s20 + $0x3e0] sm:$0xff] }
 0x903   : > { %4019 = vmatpush1.bf16.msra.mxu0 %v4555_v16  ;;  %v4566_v22 = vcombine.high %v2348_v18, %v2352_v19  ;;  %v4567_v8 = vcombine.low %v2348_v18, %v2352_v19  ;;  %v4630_v16 = vcombine.high %v2350_v11, %v2354_v23  ;;  %v5061_v32 = vld [vmem:[%s5780_s5 + $0x20] ss:$8 sps:$4 sm:$0xff]  }
 0x904   : > { %4021 = vmatprep.subr.bf16.mxu0 %v4556_v26  ;;  %v2229_v26 = vld [vmem:[%s5778_s20 + $0x8] sm:$0xff] }
 0x905   : > { %4147 = vmatpush1.bf16.msra.mxu1 %v4619_v25  ;;  %v4631_v25 = vcombine.low %v2350_v11, %v2354_v23  ;;  %v2277_v18 = vld [vmem:[%s5778_s20 + $0x188] sm:$0xff] }
 0x906   : > { %4149 = vmatprep.subr.bf16.mxu1 %v4620_v27  ;;  %v2233_v27 = vld [vmem:[%s5778_s20 + $0x28] sm:$0xff] }
 0x907   : > { %4023 = vmatpush1.bf16.msra.mxu0 %v4557_v30  ;;  %v4568_v28 = vcombine.high %v2229_v26, %v2233_v27  ;;  %v4569_v29 = vcombine.low %v2229_v26, %v2233_v27  ;;  %v2281_v19 = vld [vmem:[%s5778_s20 + $0x1a8] sm:$0xff]  ;;  %v5068_v27 = vld [vmem:[%s5780_s5 + $0x54] ss:$8 sps:$4 sm:$0xff]  }
 0x908   : > { %4025 = vmatprep.subr.bf16.mxu0 %v4558_v31  ;;  %v5065_v11 = vld [vmem:[%s5780_s5 + $0x44] ss:$8 sps:$4 sm:$0xff]   ;;  %v5067_v26 = vld [vmem:[%s5780_s5 + $0x40] ss:$8 sps:$4 sm:$0xff]  }
 0x909   : > { %4151 = vmatpush1.bf16.msra.mxu1 %v4621_v33 }
 0x90a   : > { %4153 = vmatprep.subr.bf16.mxu1 %v4622_v57 }
 0x90b   : > { %4027 = vmatpush1.bf16.msra.mxu0 %v4559_v34 }
 0x90c   : > { %4029 = vmatprep.subr.bf16.mxu0 %v4560_v61 }
 0x90d   : > { %4155 = vmatpush1.bf16.msra.mxu1 %v4623_v58  ;;  %v2245_v58 = vld [vmem:[%s5778_s20 + $0x88] sm:$0xff] }
 0x90e   : > { %4157 = vmatprep.subr.bf16.mxu1 %v4624_v41  ;;  %v4572_v1 = vcombine.high %v2245_v58, %v2249_v59  ;;  %v2257_v41 = vld [vmem:[%s5778_s20 + $0xe8] sm:$0xff] }
 0x90f   : > { %4031 = vmatpush1.bf16.msra.mxu0 %v4561_v40  ;;  %v2253_v40 = vld [vmem:[%s5778_s20 + $0xc8] sm:$0xff] }
 0x910   : > { %4033 = vmatprep.subr.bf16.mxu0 %v4562_v3  ;;  %v4573_v3 = vcombine.low %v2245_v58, %v2249_v59  ;;  %v4574_v4 = vcombine.high %v2253_v40, %v2257_v41  ;;  %v4575_v15 = vcombine.low %v2253_v40, %v2257_v41 }
 0x911   : > { %4159 = vmatpush1.bf16.msra.mxu1 %v4625_v21  ;;  %v5053_v21 = vld [vmem:[%s5780_s5 + $0x4] ss:$8 sps:$4 sm:$0xff]  }
 0x912   : > { %4161 = vmatprep.subr.bf16.mxu1 %v4626_v20  ;;  %v5058_v20 = vld [vmem:[%s5780_s5 + $0x10] ss:$8 sps:$4 sm:$0xff]  }
 0x913   : > { %4035 = vmatpush1.bf16.msra.mxu0 %v4563_v6  ;;  %v2265_v6 = vld [vmem:[%s5778_s20 + $0x128] sm:$0xff] }
 0x914   : > { %4037 = vmatprep.subr.bf16.mxu0 %v4564_v37  ;;  %v4576_v9 = vcombine.high %v2261_v5, %v2265_v6  ;;  %v2269_v37 = vld [vmem:[%s5778_s20 + $0x148] sm:$0xff] }
 0x915   : > { %4163 = vmatpush1.bf16.msra.mxu1 %v4627_v24  ;;  %v5059_v24 = vld [vmem:[%s5780_s5 + $0x24] ss:$8 sps:$4 sm:$0xff]   ;;  %v4579_v23 = vcombine.low %v2269_v37, %v2273_v17 }
 0x916   : > { %4165 = vmatprep.subr.bf16.mxu1 %v4628_v13  ;;  %v4577_v13 = vcombine.low %v2261_v5, %v2265_v6  ;;  %v2345_v5 = vld [vmem:[%s5778_s20 + $0x3a8] sm:$0xff] }
 0x917   : > { %4039 = vmatpush1.bf16.msra.mxu0 %v4565_v10  ;;  %v5062_v10 = vld [vmem:[%s5780_s5 + $0x34] ss:$8 sps:$4 sm:$0xff]  }
 0x918   : > { %4041 = vmatprep.subr.bf16.mxu0 %v4566_v22  ;;  %v5064_v22 = vld [vmem:[%s5780_s5 + $0x30] ss:$8 sps:$4 sm:$0xff]  }
 0x919   : > { %4167 = vmatpush1.bf16.msra.mxu1 %v4629_v7  ;;  %v4578_v7 = vcombine.high %v2269_v37, %v2273_v17  ;;  %v2231_v17 = vld [vmem:[%s5778_s20 + $0x18] sm:$0xff] }
 0x91a   : > { %4169 = vmatprep.subr.bf16.mxu1 %v4630_v16  ;;  %v2285_v16 = vld [vmem:[%s5778_s20 + $0x1c8] sm:$0xff] }
 0x91b   : > { %4043 = vmatpush1.bf16.msra.mxu0 %v4567_v8  ;;  %v4580_v8 = vcombine.high %v2277_v18, %v2281_v19 }
 0x91c   : > { %4045 = vmatprep.subr.bf16.mxu0 %v4568_v28  ;;  %v4581_v28 = vcombine.low %v2277_v18, %v2281_v19  ;;  %v2243_v18 = vld [vmem:[%s5778_s20 + $0x78] sm:$0xff] }
 0x91d   : > { %4171 = vmatpush1.bf16.msra.mxu1 %v4631_v25  ;;  %v2289_v25 = vld [vmem:[%s5778_s20 + $0x1e8] sm:$0xff] }
 0x91e   : > { %4237 = vmatprep.subr.bf16.mxu1 %v5053_v21  ;;  %v2333_v21 = vld [vmem:[%s5778_s20 + $0x348] sm:$0xff] }
 0x9b1   : > { %v2180_v54 = vpop.f32.mrb[16].mxu1 }
 0x9b2   : > { %v6241_v36 = vadd.f32 %v5221_v35, %v2180_v54  ;;  %v2182_v38 = vpop.f32.mrb[17].mxu1  ;;  %v2211_v35 = vld [vmem:[%s5803_s28] sm:$0x3] }
 0x9b3   : > { %v6243_v42 = vadd.f32 %v5222_v39, %v2182_v38  ;;  %v2212_v39 = vadd.f32 1.0, %v2211_v35 }
 0x9b4   : > { %v2191_v43 = vmul.f32 %v6241_v36, %v6241_v36 }
 0x9b5   : > { %v2186_v44 = vpop.f32.mrb[18].mxu1  ;;  %v2192_v45 = vmul.f32 %v6243_v42, %v6243_v42 }
 0x9b6   : > { %v6249_v47 = vadd.f32 %v5223_v46, %v2186_v44  ;;  %v2188_v48 = vpop.f32.mrb[19].mxu1  ;;  %v2221_v44 = vrot.slane %v2212_v39, %v5876_v62 }
 0x9b7   : > { %v6251_v50 = vadd.f32 %v5224_v49, %v2188_v48  ;;  %v2195_v51 = vadd.f32 %v2192_v45, %v2191_v43  ;;  %v2217_v43 = vrot.slane %v2212_v39, %v5879_v63  ;;  %v2237_v49 = vld [vmem:[%s5778_s20 + $0x48] sm:$0xff] }
 0x9b8   : > { %v2193_v52 = vmul.f32 %v6249_v47, %v6249_v47  ;;  %v2305_v39 = vld [vmem:[%s5778_s20 + $0x268] sm:$0xff] }
 0x9b9   : > { %2196 = vadd.xlane.f32.xlu0 %v2195_v51  ;;  %v2194_v53 = vmul.f32 %v6251_v50, %v6251_v50  ;;  %v2241_v51 = vld [vmem:[%s5778_s20 + $0x68] sm:$0xff] }
 0x9ba   : > { %v4570_v12 = vcombine.high %v2237_v49, %v2241_v51  ;;  %v4571_v61 = vcombine.low %v2237_v49, %v2241_v51  ;;  %v2313_v49 = vld [vmem:[%s5778_s20 + $0x2a8] sm:$0xff]  ;;  %v5076_v51 = vld [vmem:[%s5780_s5 + $0x70] ss:$8 sps:$4 sm:$0xff]  }
 0x9bb   : > { %v2198_v55 = vadd.f32 %v2194_v53, %v2193_v52 }
 0x9bd   : > { %2199 = vadd.xlane.f32.xlu1 %v2198_v55 }
 0xa46   : > { %v2197_v30 = vpop.xlane.xlu0 %2196 }
 0xa47   : > { %v2201_v33 = vmul.f32 0.00390625, %v2197_v30  ;;  %v2293_v30 = vld [vmem:[%s5778_s20 + $0x208] sm:$0xff] }
 0xa49   : > { %v2203_v31 = vadd.f32 1e-06, %v2201_v33  ;;  %v2297_v33 = vld [vmem:[%s5778_s20 + $0x228] sm:$0xff] }
 0xa4a   : > { %v2200_v34 = vpop.xlane.xlu1 %2199  ;;  %v4584_v35 = vcombine.high %v2293_v30, %v2297_v33 }
 0xa4b   : > { %5201 = vrsqrt.f32 %v2203_v31  ;;  %v2202_v54 = vmul.f32 0.00390625, %v2200_v34  ;;  %v5070_v31 = vld [vmem:[%s5780_s5 + $0x50] ss:$8 sps:$4 sm:$0xff]   ;;  %v5071_v34 = vld [vmem:[%s5780_s5 + $0x64] ss:$8 sps:$4 sm:$0xff]  }
 0xa4d   : > { %v2204_v38 = vadd.f32 1e-06, %v2202_v54  ;;  %v4583_v54 = vcombine.low %v2285_v16, %v2289_v25 }
 0xa4f   : > { %5203 = vrsqrt.f32 %v2204_v38  ;;  %v2301_v38 = vld [vmem:[%s5778_s20 + $0x248] sm:$0xff] }
 0xa55   : > { %v5202_v45 = vpop.eup %5201 }
 0xa56   : > { %v2207_v46 = vmul.f32 %v5202_v45, %v6241_v36  ;;  %v2208_v48 = vmul.f32 %v5202_v45, %v6243_v42  ;;  %v4585_v45 = vcombine.low %v2293_v30, %v2297_v33  ;;  %v2267_v30 = vld [vmem:[%s5778_s20 + $0x138] sm:$0xff] }
 0xa58   : > { %v6284_v52 = vmul.f32 %v2221_v44, %v2208_v48  ;;  %v6286_v53 = vmul.f32 %v2217_v43, %v2207_v46  ;;  %v4586_v46 = vcombine.high %v2301_v38, %v2305_v39  ;;  %v2309_v48 = vld [vmem:[%s5778_s20 + $0x288] sm:$0xff] }
 0xa59   : > { %v5204_v55 = vpop.eup %5203  ;;  %v4589_v58 = vcombine.low %v2309_v48, %v2313_v49 }
 0xa5a   : > { %2676 = vmatprep.mubr.f32.mxu0 %v6284_v52  ;;  %2830 = vmatprep.mubr.f32.mxu1 %v6284_v52  ;;  %v2210_v56 = vmul.f32 %v5204_v55, %v6251_v50  ;;  %v2209_v57 = vmul.f32 %v5204_v55, %v6249_v47  ;;  %v4587_v55 = vcombine.low %v2301_v38, %v2305_v39  ;;  %v2279_v38 = vld [vmem:[%s5778_s20 + $0x198] sm:$0xff] }
 0xa5b   : > { %2677 = vmatmul.mubr.f32.vlgmr.msra.gmra.mrb[12].mxu0 %v6286_v53  ;;  %2831 = vmatmul.mubr.f32.vlgmr.msra.gmra.mrb[20].mxu1 %v6286_v53  ;;  %v2283_v39 = vld [vmem:[%s5778_s20 + $0x1b8] sm:$0xff] }
 0xa5c   : > { %4047 = vmatpush1.bf16.msra.mxu0 %v4569_v29  ;;  %v6296_v60 = vmul.f32 %v2221_v44, %v2210_v56  ;;  %v6298_v0 = vmul.f32 %v2217_v43, %v2209_v57  ;;  %4239 = vmatpush1.bf16.msra.mxu1 %v5055_v14  ;;  %v4582_v29 = vcombine.high %v2285_v16, %v2289_v25  ;;  %v5073_v43 = vld [vmem:[%s5780_s5 + $0x60] ss:$8 sps:$4 sm:$0xff]   ;;  %v5074_v44 = vld [vmem:[%s5780_s5 + $0x74] ss:$8 sps:$4 sm:$0xff]  }
 0xa5d   : > { %4049 = vmatprep.subr.bf16.mxu0 %v4570_v12  ;;  %4241 = vmatprep.subr.bf16.mxu1 %v5056_v2  ;;  %v4588_v12 = vcombine.high %v2309_v48, %v2313_v49  ;;  %v2317_v56 = vld [vmem:[%s5778_s20 + $0x2c8] sm:$0xff]  ;;  %v2255_v25 = vld [vmem:[%s5778_s20 + $0xd8] sm:$0xff] }
 0xa5e   : > { %2682 = vmatprep.mubr.f32.mxu0 %v6296_v60  ;;  %2836 = vmatprep.mubr.f32.mxu1 %v6296_v60  ;;  %v2321_v57 = vld [vmem:[%s5778_s20 + $0x2e8] sm:$0xff]  ;;  %v2291_v48 = vld [vmem:[%s5778_s20 + $0x1f8] sm:$0xff] }
 0xa5f   : > { %2683 = vmatmul.mubr.f32.gmra.mrb[14].mxu0 %v6298_v0  ;;  %2837 = vmatmul.mubr.f32.gmra.mrb[22].mxu1 %v6298_v0  ;;  %v4590_v59 = vcombine.high %v2317_v56, %v2321_v57  ;;  %v4591_v40 = vcombine.low %v2317_v56, %v2321_v57  ;;  %v2337_v14 = vld [vmem:[%s5778_s20 + $0x368] sm:$0xff]  ;;  %v2295_v56 = vld [vmem:[%s5778_s20 + $0x218] sm:$0xff] }
 0xa60   : > { %4051 = vmatpush1.bf16.msra.mxu0 %v4571_v61  ;;  %2753 = vmatprep.mubr.f32.mxu0 %v6284_v52  ;;  %v2325_v61 = vld [vmem:[%s5778_s20 + $0x308] sm:$0xff]  ;;  %v4595_v6 = vcombine.low %v2333_v21, %v2337_v14  ;;  %v2299_v57 = vld [vmem:[%s5778_s20 + $0x238] sm:$0xff] }
 0xa61   : > { %4053 = vmatprep.subr.bf16.mxu0 %v4572_v1  ;;  %4243 = vmatpush1.bf16.msra.mxu1 %v5058_v20  ;;  %v2329_v1 = vld [vmem:[%s5778_s20 + $0x328] sm:$0xff] }
 0xa62   : > { %4245 = vmatprep.subr.bf16.mxu1 %v5059_v24  ;;  %v4592_v41 = vcombine.high %v2325_v61, %v2329_v1  ;;  %v4593_v2 = vcombine.low %v2325_v61, %v2329_v1  ;;  %v2349_v24 = vld [vmem:[%s5778_s20 + $0x3c8] sm:$0xff]  ;;  %v4648_v61 = vcombine.high %v2295_v56, %v2299_v57 }
 0xa63   : > { %v5079_v49 = vld [vmem:[%s5780_s5 + $0x80] ss:$8 sps:$4 sm:$0xff]   ;;  %v5083_v1 = vld [vmem:[%s5780_s5 + $0xa4] ss:$8 sps:$4 sm:$0xff]  }
 0xa64   : > { %4055 = vmatpush1.bf16.msra.mxu0 %v4573_v3  ;;  %v4594_v3 = vcombine.high %v2333_v21, %v2337_v14  ;;  %v5085_v21 = vld [vmem:[%s5780_s5 + $0xa0] ss:$8 sps:$4 sm:$0xff]   ;;  %v4649_v14 = vcombine.low %v2295_v56, %v2299_v57 }
 0xa65   : > { %4057 = vmatprep.subr.bf16.mxu0 %v4574_v4  ;;  %4247 = vmatpush1.bf16.msra.mxu1 %v5061_v32  ;;  %v2341_v4 = vld [vmem:[%s5778_s20 + $0x388] sm:$0xff]  ;;  %v2235_v32 = vld [vmem:[%s5778_s20 + $0x38] sm:$0xff] }
 0xa66   : > { %4249 = vmatprep.subr.bf16.mxu1 %v5062_v10  ;;  %v4596_v20 = vcombine.high %v2341_v4, %v2345_v5  ;;  %v4633_v19 = vcombine.low %v2231_v17, %v2235_v32 }
 0xa68   : > { %4059 = vmatpush1.bf16.msra.mxu0 %v4575_v15  ;;  %v2353_v15 = vld [vmem:[%s5778_s20 + $0x3e8] sm:$0xff] }
 0xa69   : > { %4061 = vmatprep.subr.bf16.mxu0 %v4576_v9  ;;  %4251 = vmatpush1.bf16.msra.mxu1 %v5064_v22  ;;  %v4597_v9 = vcombine.low %v2341_v4, %v2345_v5  ;;  %v4598_v37 = vcombine.high %v2349_v24, %v2353_v15  ;;  %v4599_v10 = vcombine.low %v2349_v24, %v2353_v15  ;;  %v2311_v4 = vld [vmem:[%s5778_s20 + $0x298] sm:$0xff]  ;;  %v5089_v15 = vld [vmem:[%s5780_s5 + $0xc4] ss:$8 sps:$4 sm:$0xff]  }
 0xa6a   : > { %4253 = vmatprep.subr.bf16.mxu1 %v5065_v11  ;;  %v2247_v11 = vld [vmem:[%s5778_s20 + $0x98] sm:$0xff] }
 0xa6b   : > { %v2315_v5 = vld [vmem:[%s5778_s20 + $0x2b8] sm:$0xff] }
 0xa6c   : > { %4063 = vmatpush1.bf16.msra.mxu0 %v4577_v13  ;;  %v4632_v13 = vcombine.high %v2231_v17, %v2235_v32  ;;  %v4652_v24 = vcombine.high %v2311_v4, %v2315_v5  ;;  %v5091_v17 = vld [vmem:[%s5780_s5 + $0xc0] ss:$8 sps:$4 sm:$0xff]   ;;  %v4653_v32 = vcombine.low %v2311_v4, %v2315_v5 }
 0xa6d   : > { %4065 = vmatprep.subr.bf16.mxu0 %v4578_v7  ;;  %4255 = vmatpush1.bf16.msra.mxu1 %v5067_v26  ;;  %v2239_v7 = vld [vmem:[%s5778_s20 + $0x58] sm:$0xff] }
 0xa6e   : > { %4257 = vmatprep.subr.bf16.mxu1 %v5068_v27  ;;  %v4634_v22 = vcombine.high %v2239_v7, %v2243_v18  ;;  %v2259_v26 = vld [vmem:[%s5778_s20 + $0xf8] sm:$0xff] }
 0xa6f   : > { %v4639_v33 = vcombine.low %v2255_v25, %v2259_v26 }
 0xa70   : > { %4067 = vmatpush1.bf16.msra.mxu0 %v4579_v23  ;;  %v2251_v23 = vld [vmem:[%s5778_s20 + $0xb8] sm:$0xff] }
 0xa71   : > { %4069 = vmatprep.subr.bf16.mxu0 %v4580_v8  ;;  %4259 = vmatpush1.bf16.msra.mxu1 %v5070_v31  ;;  %v4635_v8 = vcombine.low %v2239_v7, %v2243_v18  ;;  %v4636_v16 = vcombine.high %v2247_v11, %v2251_v23  ;;  %v4637_v27 = vcombine.low %v2247_v11, %v2251_v23  ;;  %v2327_v7 = vld [vmem:[%s5778_s20 + $0x318] sm:$0xff]  ;;  %v5095_v23 = vld [vmem:[%s5780_s5 + $0xe4] ss:$8 sps:$4 sm:$0xff]  }
 0xa72   : > { %4261 = vmatprep.subr.bf16.mxu1 %v5071_v34  ;;  %v2271_v34 = vld [vmem:[%s5778_s20 + $0x158] sm:$0xff] }
 0xa73   : > { %v2331_v18 = vld [vmem:[%s5778_s20 + $0x338] sm:$0xff] }
 0xa74   : > { %4071 = vmatpush1.bf16.msra.mxu0 %v4581_v28  ;;  %v4638_v28 = vcombine.high %v2255_v25, %v2259_v26  ;;  %v4656_v11 = vcombine.high %v2327_v7, %v2331_v18  ;;  %v5097_v25 = vld [vmem:[%s5780_s5 + $0xe0] ss:$8 sps:$4 sm:$0xff]   ;;  %v4657_v26 = vcombine.low %v2327_v7, %v2331_v18 }
 0xa75   : > { %4073 = vmatprep.subr.bf16.mxu0 %v4582_v29  ;;  %4263 = vmatpush1.bf16.msra.mxu1 %v5073_v43  ;;  %v2263_v29 = vld [vmem:[%s5778_s20 + $0x118] sm:$0xff] }
 0xa76   : > { %4265 = vmatprep.subr.bf16.mxu1 %v5074_v44  ;;  %v4640_v31 = vcombine.high %v2263_v29, %v2267_v30  ;;  %v4644_v44 = vcombine.high %v2279_v38, %v2283_v39 }
 0xa78   : > { %4075 = vmatpush1.bf16.msra.mxu0 %v4583_v54  ;;  %v2275_v54 = vld [vmem:[%s5778_s20 + $0x178] sm:$0xff] }
 0xa79   : > { %4077 = vmatprep.subr.bf16.mxu0 %v4584_v35  ;;  %4267 = vmatpush1.bf16.msra.mxu1 %v5076_v51  ;;  %v4641_v35 = vcombine.low %v2263_v29, %v2267_v30  ;;  %v4643_v43 = vcombine.low %v2271_v34, %v2275_v54  ;;  %v4645_v51 = vcombine.low %v2279_v38, %v2283_v39  ;;  %v2343_v29 = vld [vmem:[%s5778_s20 + $0x398] sm:$0xff] }
 0xa7a   : > { %v2347_v30 = vld [vmem:[%s5778_s20 + $0x3b8] sm:$0xff] }
 0xa7c   : > { %4079 = vmatpush1.bf16.msra.mxu0 %v4585_v45  ;;  %v5077_v45 = vld [vmem:[%s5780_s5 + $0x84] ss:$8 sps:$4 sm:$0xff]  }
 0xa7d   : > { %4081 = vmatprep.subr.bf16.mxu0 %v4586_v46  ;;  %v2287_v46 = vld [vmem:[%s5778_s20 + $0x1d8] sm:$0xff]  ;;  %4269 = vmatprep.subr.bf16.mxu1 %v5077_v45 }
 0xa7e   : > { %4271 = vmatpush1.bf16.msra.mxu1 %v5079_v49 }
 0xa80   : > { %4083 = vmatpush1.bf16.msra.mxu0 %v4587_v55  ;;  %v4646_v55 = vcombine.high %v2287_v46, %v2291_v48 }
 0xa81   : > { %4085 = vmatprep.subr.bf16.mxu0 %v4588_v12  ;;  %v5080_v12 = vld [vmem:[%s5780_s5 + $0x94] ss:$8 sps:$4 sm:$0xff]  }
 0xa82   : > { %4273 = vmatprep.subr.bf16.mxu1 %v5080_v12 }
 0xa84   : > { %4087 = vmatpush1.bf16.msra.mxu0 %v4589_v58  ;;  %v5082_v58 = vld [vmem:[%s5780_s5 + $0x90] ss:$8 sps:$4 sm:$0xff]  }
 0xa85   : > { %4089 = vmatprep.subr.bf16.mxu0 %v4590_v59  ;;  %v4647_v59 = vcombine.low %v2287_v46, %v2291_v48  ;;  %4275 = vmatpush1.bf16.msra.mxu1 %v5082_v58 }
 0xa86   : > { %4277 = vmatprep.subr.bf16.mxu1 %v5083_v1 }
 0xa88   : > { %4091 = vmatpush1.bf16.msra.mxu0 %v4591_v40  ;;  %v2303_v40 = vld [vmem:[%s5778_s20 + $0x258] sm:$0xff] }
 0xa89   : > { %4093 = vmatprep.subr.bf16.mxu0 %v4592_v41  ;;  %v2307_v41 = vld [vmem:[%s5778_s20 + $0x278] sm:$0xff]  ;;  %4279 = vmatpush1.bf16.msra.mxu1 %v5085_v21 }
 0xa8c   : > { %4095 = vmatpush1.bf16.msra.mxu0 %v4593_v2  ;;  %v4650_v2 = vcombine.high %v2303_v40, %v2307_v41 }
 0xa8d   : > { %4097 = vmatprep.subr.bf16.mxu0 %v4594_v3  ;;  %v5086_v3 = vld [vmem:[%s5780_s5 + $0xb4] ss:$8 sps:$4 sm:$0xff]  }
 0xa8e   : > { %4281 = vmatprep.subr.bf16.mxu1 %v5086_v3 }
 0xa90   : > { %4099 = vmatpush1.bf16.msra.mxu0 %v4595_v6  ;;  %v5088_v6 = vld [vmem:[%s5780_s5 + $0xb0] ss:$8 sps:$4 sm:$0xff]  }
 0xa91   : > { %4101 = vmatprep.subr.bf16.mxu0 %v4596_v20  ;;  %v4651_v20 = vcombine.low %v2303_v40, %v2307_v41  ;;  %4283 = vmatpush1.bf16.msra.mxu1 %v5088_v6 }
 0xa92   : > { %4285 = vmatprep.subr.bf16.mxu1 %v5089_v15 }
 0xa94   : > { %4103 = vmatpush1.bf16.msra.mxu0 %v4597_v9  ;;  %v2319_v9 = vld [vmem:[%s5778_s20 + $0x2d8] sm:$0xff] }
 0xa95   : > { %4105 = vmatprep.subr.bf16.mxu0 %v4598_v37  ;;  %v2323_v37 = vld [vmem:[%s5778_s20 + $0x2f8] sm:$0xff]  ;;  %4287 = vmatpush1.bf16.msra.mxu1 %v5091_v17 }
 0xa98   : > { %4107 = vmatpush1.bf16.msra.mxu0 %v4599_v10  ;;  %v4654_v10 = vcombine.high %v2319_v9, %v2323_v37 }
 0xa99   : > { %4173 = vmatprep.subr.bf16.mxu0 %v4632_v13  ;;  %v5092_v13 = vld [vmem:[%s5780_s5 + $0xd4] ss:$8 sps:$4 sm:$0xff]  }
 0xa9a   : > { %4289 = vmatprep.subr.bf16.mxu1 %v5092_v13 }
 0xa9b   : > { %2754 = vmatmul.mubr.f32.vlgmr.msra.gmra.mrb[16].mxu0 %v6286_v53 }
 0xa9c   : > { %2759 = vmatprep.mubr.f32.mxu0 %v6296_v60  ;;  %4175 = vmatpush1.bf16.msra.mxu0 %v4633_v19  ;;  %v5094_v19 = vld [vmem:[%s5780_s5 + $0xd0] ss:$8 sps:$4 sm:$0xff]  }
 0xa9d   : > { %4177 = vmatprep.subr.bf16.mxu0 %v4634_v22  ;;  %v4655_v22 = vcombine.low %v2319_v9, %v2323_v37  ;;  %4291 = vmatpush1.bf16.msra.mxu1 %v5094_v19 }
 0xa9e   : > { %4293 = vmatprep.subr.bf16.mxu1 %v5095_v23 }
 0xa9f   : > { %2760 = vmatmul.mubr.f32.gmra.mrb[18].mxu0 %v6298_v0 }
 0xaa0   : > { %4179 = vmatpush1.bf16.msra.mxu0 %v4635_v8  ;;  %2907 = vmatprep.mubr.f32.mxu0 %v6284_v52  ;;  %v4642_v52 = vcombine.high %v2271_v34, %v2275_v54  ;;  %v2335_v8 = vld [vmem:[%s5778_s20 + $0x358] sm:$0xff]  ;;  %v4660_v34 = vcombine.high %v2343_v29, %v2347_v30 }
 0xaa1   : > { %4181 = vmatprep.subr.bf16.mxu0 %v4636_v16  ;;  %v2339_v16 = vld [vmem:[%s5778_s20 + $0x378] sm:$0xff]  ;;  %4295 = vmatpush1.bf16.msra.mxu1 %v5097_v25 }
 0xaa2   : > { %v2351_v54 = vld [vmem:[%s5778_s20 + $0x3d8] sm:$0xff] }
 0xaa4   : > { %4183 = vmatpush1.bf16.msra.mxu0 %v4637_v27  ;;  %v4658_v27 = vcombine.high %v2335_v8, %v2339_v16 }
 0xaa5   : > { %4185 = vmatprep.subr.bf16.mxu0 %v4638_v28  ;;  %v5098_v28 = vld [vmem:[%s5780_s5 + $0xf4] ss:$8 sps:$4 sm:$0xff]  }
 0xaa6   : > { %4297 = vmatprep.subr.bf16.mxu1 %v5098_v28  ;;  %v5104_v28 = vld [vmem:[%s5780_s5 + $0x114] ss:$8 sps:$4 sm:$0xff]  }
 0xaa8   : > { %4187 = vmatpush1.bf16.msra.mxu0 %v4639_v33  ;;  %v5100_v33 = vld [vmem:[%s5780_s5 + $0xf0] ss:$8 sps:$4 sm:$0xff]  }
 0xaa9   : > { %4189 = vmatprep.subr.bf16.mxu0 %v4640_v31  ;;  %v4659_v31 = vcombine.low %v2335_v8, %v2339_v16  ;;  %4299 = vmatpush1.bf16.msra.mxu1 %v5100_v33 }
 0xaac   : > { %4191 = vmatpush1.bf16.msra.mxu0 %v4641_v35  ;;  %v2355_v35 = vld [vmem:[%s5778_s20 + $0x3f8] sm:$0xff] }
 0xaad   : > { %4193 = vmatprep.subr.bf16.mxu0 %v4642_v52  ;;  %v4661_v52 = vcombine.low %v2343_v29, %v2347_v30  ;;  %v4662_v38 = vcombine.high %v2351_v54, %v2355_v35  ;;  %v4663_v39 = vcombine.low %v2351_v54, %v2355_v35  ;;  %v5109_v54 = vld [vmem:[%s5780_s5 + $0x120] ss:$8 sps:$4 sm:$0xff]   ;;  %v5110_v35 = vld [vmem:[%s5780_s5 + $0x134] ss:$8 sps:$4 sm:$0xff]  }
 0xab0   : > { %4195 = vmatpush1.bf16.msra.mxu0 %v4643_v43  ;;  %v5101_v43 = vld [vmem:[%s5780_s5 + $0x104] ss:$8 sps:$4 sm:$0xff]  }
 0xab1   : > { %4197 = vmatprep.subr.bf16.mxu0 %v4644_v44  ;;  %4301 = vmatprep.subr.bf16.mxu1 %v5101_v43  ;;  %v5116_v43 = vld [vmem:[%s5780_s5 + $0x154] ss:$8 sps:$4 sm:$0xff]  }
 0xab4   : > { %4199 = vmatpush1.bf16.msra.mxu0 %v4645_v51 }
 0xab5   : > { %4201 = vmatprep.subr.bf16.mxu0 %v4646_v55 }
 0xab8   : > { %4203 = vmatpush1.bf16.msra.mxu0 %v4647_v59 }
 0xab9   : > { %4205 = vmatprep.subr.bf16.mxu0 %v4648_v61 }
 0xabc   : > { %4207 = vmatpush1.bf16.msra.mxu0 %v4649_v14 }
 0xabd   : > { %4209 = vmatprep.subr.bf16.mxu0 %v4650_v2 }
 0xac0   : > { %4211 = vmatpush1.bf16.msra.mxu0 %v4651_v20 }
 0xac1   : > { %4213 = vmatprep.subr.bf16.mxu0 %v4652_v24 }
 0xac4   : > { %4215 = vmatpush1.bf16.msra.mxu0 %v4653_v32 }
 0xac5   : > { %4217 = vmatprep.subr.bf16.mxu0 %v4654_v10 }
 0xac8   : > { %4219 = vmatpush1.bf16.msra.mxu0 %v4655_v22 }
 0xac9   : > { %4221 = vmatprep.subr.bf16.mxu0 %v4656_v11 }
 0xacc   : > { %4223 = vmatpush1.bf16.msra.mxu0 %v4657_v26  ;;  %v5103_v26 = vld [vmem:[%s5780_s5 + $0x100] ss:$8 sps:$4 sm:$0xff]  }
 0xacd   : > { %4225 = vmatprep.subr.bf16.mxu0 %v4658_v27 }
 0xad0   : > { %4227 = vmatpush1.bf16.msra.mxu0 %v4659_v31  ;;  %v5106_v31 = vld [vmem:[%s5780_s5 + $0x110] ss:$8 sps:$4 sm:$0xff]  }
 0xad1   : > { %4229 = vmatprep.subr.bf16.mxu0 %v4660_v34  ;;  %v5107_v34 = vld [vmem:[%s5780_s5 + $0x124] ss:$8 sps:$4 sm:$0xff]  }
 0xad4   : > { %4231 = vmatpush1.bf16.msra.mxu0 %v4661_v52  ;;  %v5112_v52 = vld [vmem:[%s5780_s5 + $0x130] ss:$8 sps:$4 sm:$0xff]  }
 0xad5   : > { %4233 = vmatprep.subr.bf16.mxu0 %v4662_v38  ;;  %v5113_v38 = vld [vmem:[%s5780_s5 + $0x144] ss:$8 sps:$4 sm:$0xff]  }
 0xad8   : > { %4235 = vmatpush1.bf16.msra.mxu0 %v4663_v39  ;;  %v5115_v39 = vld [vmem:[%s5780_s5 + $0x140] ss:$8 sps:$4 sm:$0xff]  }
 0xadb   : > { %2908 = vmatmul.mubr.f32.vlgmr.msra.gmra.mrb[20].mxu0 %v6286_v53 }
 0xadc   : > { %2913 = vmatprep.mubr.f32.mxu0 %v6296_v60 }
 0xadf   : > { %2914 = vmatmul.mubr.f32.gmra.mrb[22].mxu0 %v6298_v0 }
 0xb2e   : > { %v2678_v44 = vpop.f32.mrb[12].mxu0  ;;  %v2832_v45 = vpop.f32.mrb[20].mxu1 }
 0xb2f   : > { %v2920_v46 = vmul.f32 %v2678_v44, %v2678_v44  ;;  %v2680_v48 = vpop.f32.mrb[13].mxu0  ;;  %v2834_v49 = vpop.f32.mrb[21].mxu1 }
 0xb30   : > { %v2921_v51 = vmul.f32 %v2680_v48, %v2680_v48 }
 0xb31   : > { %v2928_v55 = vmul.f32 %v2920_v46, %v2678_v44  ;;  %v5121_v46 = vld [vmem:[%s5780_s5 + $0x160] ss:$8 sps:$4 sm:$0xff]  }
 0xb32   : > { %v2929_v12 = vmul.f32 %v2921_v51, %v2680_v48  ;;  %v2684_v56 = vpop.f32.mrb[14].mxu0  ;;  %v2838_v57 = vpop.f32.mrb[22].mxu1  ;;  %v5125_v51 = vld [vmem:[%s5780_s5 + $0x184] ss:$8 sps:$4 sm:$0xff]  }
 0xb33   : > { %v2936_v58 = vmul.f32 0.044715, %v2928_v55  ;;  %v2924_v59 = vmul.f32 %v2684_v56, %v2684_v56  ;;  %v2686_v61 = vpop.f32.mrb[15].mxu0  ;;  %v2840_v53 = vpop.f32.mrb[23].mxu1  ;;  %v5127_v55 = vld [vmem:[%s5780_s5 + $0x180] ss:$8 sps:$4 sm:$0xff]  }
 0xb34   : > { %v2937_v1 = vmul.f32 0.044715, %v2929_v12  ;;  %v2925_v60 = vmul.f32 %v2686_v61, %v2686_v61  ;;  %v5128_v12 = vld [vmem:[%s5780_s5 + $0x194] ss:$8 sps:$4 sm:$0xff]  }
 0xb35   : > { %v2944_v40 = vadd.f32 %v2936_v58, %v2678_v44  ;;  %v2932_v0 = vmul.f32 %v2924_v59, %v2684_v56  ;;  %v5130_v58 = vld [vmem:[%s5780_s5 + $0x190] ss:$8 sps:$4 sm:$0xff]   ;;  %v5131_v59 = vld [vmem:[%s5780_s5 + $0x1a4] ss:$8 sps:$4 sm:$0xff]  }
 0xb36   : > { %v2945_v41 = vadd.f32 %v2937_v1, %v2680_v48  ;;  %v2933_v21 = vmul.f32 %v2925_v60, %v2686_v61  ;;  %v5133_v1 = vld [vmem:[%s5780_s5 + $0x1a0] ss:$8 sps:$4 sm:$0xff]   ;;  %v5134_v60 = vld [vmem:[%s5780_s5 + $0x1b4] ss:$8 sps:$4 sm:$0xff]  }
 0xb37   : > { %v2952_v14 = vmul.f32 0.7978846, %v2944_v40  ;;  %v2940_v2 = vmul.f32 0.044715, %v2932_v0  ;;  %v5136_v40 = vld [vmem:[%s5780_s5 + $0x1b0] ss:$8 sps:$4 sm:$0xff]  }
 0xb38   : > { %v2953_v3 = vmul.f32 0.7978846, %v2945_v41  ;;  %v2941_v4 = vmul.f32 0.044715, %v2933_v21  ;;  %v5137_v0 = vld [vmem:[%s5780_s5 + $0x1c4] ss:$8 sps:$4 sm:$0xff]  }
 0xb39   : > { %5205 = vtanh.f32 %v2952_v14  ;;  %v2948_v5 = vadd.f32 %v2940_v2, %v2684_v56  ;;  %v5139_v41 = vld [vmem:[%s5780_s5 + $0x1c0] ss:$8 sps:$4 sm:$0xff]   ;;  %v5140_v21 = vld [vmem:[%s5780_s5 + $0x1d4] ss:$8 sps:$4 sm:$0xff]   ;;  %v5142_v14 = vld [vmem:[%s5780_s5 + $0x1d0] ss:$8 sps:$4 sm:$0xff]  }
 0xb3a   : > { %5207 = vtanh.f32 %v2953_v3  ;;  %v2949_v6 = vadd.f32 %v2941_v4, %v2686_v61  ;;  %v5143_v2 = vld [vmem:[%s5780_s5 + $0x1e4] ss:$8 sps:$4 sm:$0xff]   ;;  %v5145_v3 = vld [vmem:[%s5780_s5 + $0x1e0] ss:$8 sps:$4 sm:$0xff]  }
 0xb3b   : > { %v2956_v20 = vmul.f32 0.7978846, %v2948_v5  ;;  %v5146_v5 = vld [vmem:[%s5780_s5 + $0x1f4] ss:$8 sps:$4 sm:$0xff]  }
 0xb3c   : > { %v2957_v24 = vmul.f32 0.7978846, %v2949_v6 }
 0xb3d   : > { %5209 = vtanh.f32 %v2956_v20  ;;  %v5148_v20 = vld [vmem:[%s5780_s5 + $0x1f0] ss:$8 sps:$4 sm:$0xff]  }
 0xb3e   : > { %5211 = vtanh.f32 %v2957_v24 }
 0xb43   : > { %v5206_v15 = vpop.eup %5205 }
 0xb44   : > { %v5208_v9 = vpop.eup %5207  ;;  %v2968_v37 = vadd.f32 1.0, %v5206_v15 }
 0xb45   : > { %v2969_v17 = vadd.f32 1.0, %v5208_v9 }
 0xb46   : > { %v2976_v32 = vmul.f32 0.5, %v2968_v37 }
 0xb47   : > { %v5210_v10 = vpop.eup %5209  ;;  %v2977_v13 = vmul.f32 0.5, %v2969_v17 }
 0xb48   : > { %v5212_v7 = vpop.eup %5211  ;;  %v2984_v18 = vmul.f32 %v2976_v32, %v2678_v44  ;;  %v2972_v19 = vadd.f32 1.0, %v5210_v10  ;;  %v5118_v44 = vld [vmem:[%s5780_s5 + $0x150] ss:$8 sps:$4 sm:$0xff]  }
 0xb49   : > { %v2985_v22 = vmul.f32 %v2977_v13, %v2680_v48  ;;  %v2973_v11 = vadd.f32 1.0, %v5212_v7  ;;  %v5122_v48 = vld [vmem:[%s5780_s5 + $0x174] ss:$8 sps:$4 sm:$0xff]  }
 0xb4a   : > { %v2992_v23 = vmul.f32 %v2984_v18, %v2832_v45  ;;  %v2980_v8 = vmul.f32 0.5, %v2972_v19  ;;  %v5119_v45 = vld [vmem:[%s5780_s5 + $0x164] ss:$8 sps:$4 sm:$0xff]  }
 0xb4b   : > { %v2993_v16 = vmul.f32 %v2985_v22, %v2834_v49  ;;  %v2981_v25 = vmul.f32 0.5, %v2973_v11  ;;  %v5124_v49 = vld [vmem:[%s5780_s5 + $0x170] ss:$8 sps:$4 sm:$0xff]   ;;  %s6563_s5 = sld [smem:[#allocation25_spill]] (!%p3600_p9) }
 0xb4c   : > { %v2988_v27 = vmul.f32 %v2980_v8, %v2684_v56 }
 0xb4d   : > { %v2989_v29 = vmul.f32 %v2981_v25, %v2686_v61  ;;  %3256 = vmatprep.mubr.f32.mxu1 %v2993_v16 }
 0xb4e   : > { %v2996_v30 = vmul.f32 %v2988_v27, %v2838_v57  ;;  %3257 = vmatmul.mubr.f32.vlgmr.msra.gmra.mrb[24].mxu1 %v2992_v23 }
 0xb4f   : > { %v2997_v33 = vmul.f32 %v2989_v29, %v2840_v53  ;;  %4303 = vmatpush1.bf16.msra.mxu1 %v5103_v26 }
 0xb50   : > { %4305 = vmatprep.subr.bf16.mxu1 %v5104_v28 }
 0xb51   : > { %3262 = vmatprep.mubr.f32.mxu1 %v2997_v33 }
 0xb52   : > { %3263 = vmatmul.mubr.f32.gmra.mrb[26].mxu1 %v2996_v30 }
 0xb53   : > { %4307 = vmatpush1.bf16.msra.mxu1 %v5106_v31 }
 0xb54   : > { %4309 = vmatprep.subr.bf16.mxu1 %v5107_v34 }
 0xb57   : > { %4311 = vmatpush1.bf16.msra.mxu1 %v5109_v54 }
 0xb58   : > { %4313 = vmatprep.subr.bf16.mxu1 %v5110_v35 }
 0xb5b   : > { %4315 = vmatpush1.bf16.msra.mxu1 %v5112_v52 }
 0xb5c   : > { %4317 = vmatprep.subr.bf16.mxu1 %v5113_v38 }
 0xb5f   : > { %4319 = vmatpush1.bf16.msra.mxu1 %v5115_v39 }
 0xb60   : > { %4321 = vmatprep.subr.bf16.mxu1 %v5116_v43 }
 0xb63   : > { %4323 = vmatpush1.bf16.msra.mxu1 %v5118_v44 }
 0xb64   : > { %4325 = vmatprep.subr.bf16.mxu1 %v5119_v45 }
 0xb67   : > { %4327 = vmatpush1.bf16.msra.mxu1 %v5121_v46 }
 0xb68   : > { %4329 = vmatprep.subr.bf16.mxu1 %v5122_v48 }
 0xb6b   : > { %4331 = vmatpush1.bf16.msra.mxu1 %v5124_v49 }
 0xb6c   : > { %4333 = vmatprep.subr.bf16.mxu1 %v5125_v51 }
 0xb6e   : > { %v6421_v56 = vpop.f32.mrb[16].mxu0 }
 0xb6f   : > { %v6423_v57 = vpop.f32.mrb[17].mxu0  ;;  %4335 = vmatpush1.bf16.msra.mxu1 %v5127_v55  ;;  %v2922_v4 = vmul.f32 %v6421_v56, %v6421_v56 }
 0xb70   : > { %4337 = vmatprep.subr.bf16.mxu1 %v5128_v12  ;;  %v2923_v6 = vmul.f32 %v6423_v57, %v6423_v57 }
 0xb71   : > { %v2930_v24 = vmul.f32 %v2922_v4, %v6421_v56 }
 0xb72   : > { %v6427_v61 = vpop.f32.mrb[18].mxu0  ;;  %v2931_v9 = vmul.f32 %v2923_v6, %v6423_v57 }
 0xb73   : > { %v6429_v53 = vpop.f32.mrb[19].mxu0  ;;  %4339 = vmatpush1.bf16.msra.mxu1 %v5130_v58  ;;  %v2926_v15 = vmul.f32 %v6427_v61, %v6427_v61  ;;  %v2938_v17 = vmul.f32 0.044715, %v2930_v24 }
 0xb74   : > { %4341 = vmatprep.subr.bf16.mxu1 %v5131_v59  ;;  %v2927_v37 = vmul.f32 %v6429_v53, %v6429_v53  ;;  %v2939_v10 = vmul.f32 0.044715, %v2931_v9 }
 0xb75   : > { %v2934_v32 = vmul.f32 %v2926_v15, %v6427_v61  ;;  %v2946_v7 = vadd.f32 %v2938_v17, %v6421_v56 }
 0xb76   : > { %v2935_v13 = vmul.f32 %v2927_v37, %v6429_v53  ;;  %v2947_v19 = vadd.f32 %v2939_v10, %v6423_v57 }
 0xb77   : > { %4343 = vmatpush1.bf16.msra.mxu1 %v5133_v1  ;;  %v2942_v18 = vmul.f32 0.044715, %v2934_v32  ;;  %v2954_v11 = vmul.f32 0.7978846, %v2946_v7 }
 0xb78   : > { %4345 = vmatprep.subr.bf16.mxu1 %v5134_v60  ;;  %v2943_v22 = vmul.f32 0.044715, %v2935_v13  ;;  %v2955_v8 = vmul.f32 0.7978846, %v2947_v19 }
 0xb79   : > { %v2950_v23 = vadd.f32 %v2942_v18, %v6427_v61  ;;  %5213 = vtanh.f32 %v2954_v11 }
 0xb7a   : > { %v2951_v16 = vadd.f32 %v2943_v22, %v6429_v53  ;;  %5215 = vtanh.f32 %v2955_v8 }
 0xb7b   : > { %4347 = vmatpush1.bf16.msra.mxu1 %v5136_v40  ;;  %v2958_v25 = vmul.f32 0.7978846, %v2950_v23 }
 0xb7c   : > { %4349 = vmatprep.subr.bf16.mxu1 %v5137_v0  ;;  %v2959_v26 = vmul.f32 0.7978846, %v2951_v16 }
 0xb7d   : > { %5217 = vtanh.f32 %v2958_v25 }
 0xb7e   : > { %5219 = vtanh.f32 %v2959_v26 }
 0xb7f   : > { %4351 = vmatpush1.bf16.msra.mxu1 %v5139_v41 }
 0xb80   : > { %4353 = vmatprep.subr.bf16.mxu1 %v5140_v21 }
 0xb83   : > { %4355 = vmatpush1.bf16.msra.mxu1 %v5142_v14  ;;  %v5214_v27 = vpop.eup %5213 }
 0xb84   : > { %4357 = vmatprep.subr.bf16.mxu1 %v5143_v2  ;;  %v5216_v28 = vpop.eup %5215  ;;  %v2970_v29 = vadd.f32 1.0, %v5214_v27 }
 0xb85   : > { %v2971_v33 = vadd.f32 1.0, %v5216_v28 }
 0xb86   : > { %v2978_v34 = vmul.f32 0.5, %v2970_v29 }
 0xb87   : > { %4359 = vmatpush1.bf16.msra.mxu1 %v5145_v3  ;;  %v5218_v30 = vpop.eup %5217  ;;  %v2979_v35 = vmul.f32 0.5, %v2971_v33 }
 0xb88   : > { %4361 = vmatprep.subr.bf16.mxu1 %v5146_v5  ;;  %v5220_v31 = vpop.eup %5219  ;;  %v2974_v54 = vadd.f32 1.0, %v5218_v30  ;;  %v2986_v38 = vmul.f32 %v2978_v34, %v6421_v56 }
 0xb89   : > { %v2975_v52 = vadd.f32 1.0, %v5220_v31  ;;  %v2987_v44 = vmul.f32 %v2979_v35, %v6423_v57 }
 0xb8a   : > { %v2982_v39 = vmul.f32 0.5, %v2974_v54 }
 0xb8b   : > { %4363 = vmatpush1.bf16.msra.mxu1 %v5148_v20  ;;  %v2983_v45 = vmul.f32 0.5, %v2975_v52 }
 0xb8c   : > { %v2990_v51 = vmul.f32 %v2982_v39, %v6427_v61 }
 0xb8d   : > { %v2991_v12 = vmul.f32 %v2983_v45, %v6429_v53 }
 0xbae   : > { %v2909_v43 = vpop.f32.mrb[20].mxu0 }
 0xbaf   : > { %v2994_v46 = vmul.f32 %v2986_v38, %v2909_v43  ;;  %v2911_v48 = vpop.f32.mrb[21].mxu0 }
 0xbb0   : > { %v2995_v49 = vmul.f32 %v2987_v44, %v2911_v48 }
 0xbb2   : > { %v2915_v55 = vpop.f32.mrb[22].mxu0  ;;  %3333 = vmatprep.mubr.f32.mxu1 %v2995_v49 }
 0xbb3   : > { %v2998_v58 = vmul.f32 %v2990_v51, %v2915_v55  ;;  %v2917_v59 = vpop.f32.mrb[23].mxu0  ;;  %3334 = vmatmul.mubr.f32.vlgmr.msra.gmra.mrb[24].mxu1 %v2994_v46 }
 0xbb4   : > { %v2999_v1 = vmul.f32 %v2991_v12, %v2917_v59 }
 0xbb6   : > { %3339 = vmatprep.mubr.f32.mxu1 %v2999_v1 }
 0xbb7   : > { %3340 = vmatmul.mubr.f32.gmra.mrb[26].mxu1 %v2998_v58 }
 0xc86   : > { %v3335_v56 = vpop.f32.mrb[24].mxu1 }
 0xc87   : > { %v3346_v60 = vadd.f32 %v6241_v36, %v3335_v56  ;;  %v3337_v57 = vpop.f32.mrb[25].mxu1 }
 0xc88   : > { %v3347_v40 = vadd.f32 %v6243_v42, %v3337_v57  ;;  %3357 = sbr.rel (%p3600_p9) target bundleno = 3380 (0xd34), region = 104 }
 0xc89   : > { %3350 = vst [vmem:[#allocation2] sm:$0xff] %v3346_v60  ;;  %v3358_v21 = vmul.f32 (!%p3600_p9), %v3346_v60, %v3346_v60 }
 0xc8a   : > { %3351 = vst [vmem:[#allocation2 + $0x8] sm:$0xff] %v3347_v40  ;;  %v3341_v0 = vpop.f32.mrb[26].mxu1  ;;  %v3359_v14 = vmul.f32 (!%p3600_p9), %v3347_v40, %v3347_v40 }
 0xc8b   : > { %v3348_v61 = vadd.f32 %v6249_v47, %v3341_v0  ;;  %v3343_v41 = vpop.f32.mrb[27].mxu1 }
 0xc8c   : > { %v3349_v53 = vadd.f32 %v6251_v50, %v3343_v41  ;;  %v3362_v3 = vadd.f32 (!%p3600_p9), %v3359_v14, %v3358_v21  ;;  %v3378_v50 = vld [vmem:[%s6563_s5] sm:$0x3] (!%p3600_p9) }
 0xc8d   : > { %3352 = vst [vmem:[#allocation2 + $0x10] sm:$0xff] %v3348_v61  ;;  %v3360_v2 = vmul.f32 (!%p3600_p9), %v3348_v61, %v3348_v61  ;;  %v3379_v15 = vadd.f32 (!%p3600_p9), 1.0, %v3378_v50 }
 0xc8e   : > { %3353 = vst [vmem:[#allocation2 + $0x18] sm:$0xff] %v3349_v53  ;;  %v3361_v36 = vmul.f32 (!%p3600_p9), %v3349_v53, %v3349_v53  ;;  %3363 = vadd.xlane.f32.xlu0 (!%p3600_p9), %v3362_v3 }
 0xc8f   : > { %v3384_v9 = vrot.slane %v3379_v15, %v5879_v63  ;;  %v3388_v37 = vrot.slane %v3379_v15, %v5876_v62 }
 0xc90   : > { %v3365_v42 = vadd.f32 %v3361_v36, %v3360_v2 }
 0xc92   : > { %3366 = vadd.xlane.f32.xlu0 %v3365_v42 }
 0xd1b   : > { %v3364_v4 = vpop.xlane.xlu0 %3363 }
 0xd1c   : > { %v3368_v5 = vmul.f32 0.00390625, %v3364_v4 }
 0xd1e   : > { %v3370_v6 = vadd.f32 1e-06, %v3368_v5 }
 0xd1f   : > { %v3367_v47 = vpop.xlane.xlu0 %3366 }
 0xd20   : > { %5225 = vrsqrt.f32 %v3370_v6  ;;  %v3369_v20 = vmul.f32 0.00390625, %v3367_v47 }
 0xd22   : > { %v3371_v24 = vadd.f32 1e-06, %v3369_v20 }
 0xd24   : > { %5227 = vrsqrt.f32 %v3371_v24 }
 0xd2a   : > { %v5226_v17 = vpop.eup %5225 }
 0xd2b   : > { %v3374_v32 = vmul.f32 %v5226_v17, %v3346_v60  ;;  %v3375_v10 = vmul.f32 %v5226_v17, %v3347_v40 }
 0xd2d   : > { %v3391_v13 = vmul.f32 %v3384_v9, %v3374_v32  ;;  %v3392_v7 = vmul.f32 %v3388_v37, %v3375_v10 }
 0xd2e   : > { %v5228_v18 = vpop.eup %5227 }
 0xd2f   : > { %3395 = vst [vmem:[#allocation14] sm:$0xff] %v3391_v13  ;;  %3396 = vst [vmem:[#allocation14 + $0x8] sm:$0xff] %v3392_v7  ;;  %v3376_v19 = vmul.f32 %v5228_v18, %v3348_v61  ;;  %v3377_v22 = vmul.f32 %v5228_v18, %v3349_v53 }
 0xd31   : > { %v3393_v11 = vmul.f32 %v3384_v9, %v3376_v19  ;;  %v3394_v23 = vmul.f32 %v3388_v37, %v3377_v22 }
 0xd33   : > { %3397 = vst [vmem:[#allocation14 + $0x10] sm:$0xff] %v3393_v11  ;;  %3398 = vst [vmem:[#allocation14 + $0x18] sm:$0xff] %v3394_v23 }
 0xd34 PF: > { %p4767_p2 = scmp.eq.s32.totalorder %s5621_s18, 1  ;;  %s5455_s9 = smov [#allocation14]  }
 0xd35   : > { %s3405_s23 = sshll.u32 %s5455_s9, 4  ;;  %s3406_s23 = int_to_ptr.vmem [resolvable:$true] %s3405_s23 }
 0xd36   : > { %s5364_s28 = scalar_lea.vmem %s3406_s23, 512  ;;  %p5371_p0 = scmp.lt.s32.totalorder %s3406_s23, %s3406_s23 }
 0xd37   : > { %p5365_p11 = scmp.ne.s32.totalorder %s3406_s23, %s5364_s28  ;;  %p5372_p6 = scmp.lt.s32.totalorder %s5364_s28, %s5364_s28 }
 0xd39   : > { %p5366_p13 = pnand %p5365_p11, %p4767_p2  ;;  %p5373_p8 = por %p5372_p6, %p5371_p0 }
 0xd3b   : > { %p5367_p3 = pneg %p5366_p13 }
 0xd3d   : > { %p5374_p7 = pnand %p5373_p8, %p5367_p3 }
 0xd3f   : > { %5377 = shalt.err (!%p5374_p7)
}
 0xd40   : > { %s6564_s0 = sld [smem:[#allocation28_spill]] }
 0xd46   : > { %s5378_s14 = scalar_lea.hbm %s6564_s0, 512 }
 0xd47   : > { %p5379_p4 = scmp.ne.s32.totalorder %s6564_s0, %s5378_s14  ;;  %p5384_p5 = scmp.lt.u32.totalorder %s5378_s14, %s6564_s0 }
 0xd49   : > { %p5380_p10 = pnand %p5379_p4, %p4767_p2 }
 0xd4b   : > { %p5381_p1 = pneg %p5380_p10 }
 0xd4d   : > { %p5386_p12 = pnand %p5384_p5, %p5381_p1 }
 0xd4f   : > { %5389 = shalt.err (!%p5386_p12)
}
 0xd50   : > { %s5456_s17 = smov 256   ;;  %s5457_s22 = smov 16  }
 0xd51   : > { %4744 = dma.vmem_to_hbm [thread:$0]  (%p4767_p2), %s3406_s23, 512, %s6564_s0, [#allocation6], %s5456_s17, %s5456_s17, %s5457_s22  }
 0xd52   : > { %5423 = dma.done.wait (%p4767_p2), [#allocation6], 512  }
 0xd53   : > { %5425 = vsyncadd (%p4767_p2), [#allocation6], 4294966784 }
 0xd54 PF: > { %s6565_s16 = sld [smem:[#allocation21_spill]]  ;;  %s6566_s19 = sld [smem:[#allocation20_spill]] }
 0xd55   : > { %s6567_s15 = sld [smem:[#allocation22_spill]]  ;;  %s6568_s29 = smov %s5432_s30 }
 0xd5a   : > { %p32_p9 = scmp.ge.s32.totalorder %s6565_s16, 4   ;;  %s6569_s30 = smov %s6566_s19 }
 0xd5c   :  { %34 = sbr.rel (!%p32_p9) target bundleno = 16 (0x10), region = 172 }
 0xd63   :  { %3421 = vsyncpa [#allocation5], 1 }
 0xd64   :  { %3423 = vsyncpa [#allocation5 + $0x1], 1 }
 0xd65   :  { %3424 = vsyncpa [#allocation10], 1 }
 0xd66   :  { %3426 = vsyncpa [#allocation10 + $0x1], 1 }
 0xd67   :  { %3427 = vsyncpa [#allocation13], 1 }
 0xd68   :  { %3429 = vsyncpa [#allocation13 + $0x1], 1 }
 0xd69   :  { %3430 = vsyncpa [#allocation6], 1 }
 0xd6a   :  { %3432 = vsyncpa [#allocation6 + $0x1], 1 }
 0xd6b   :  { %3433 = vsyncpa [#allocation7], 1 }
 0xd6c   :  { %3435 = vsyncpa [#allocation7 + $0x1], 1 }

</bundles_post_ra>
